<compile_context>
chip_gen: v6e
topology: v6e:2x2x1
jax: 0.10.0
libtpu: 0.0.40
codegen_flags: <defaults>
</compile_context>

<pallas_src>
import jax
import jax.numpy as jnp
from jax import lax
from jax.experimental import pallas as pl
from jax.experimental.pallas import tpu as pltpu

EPS = 1e-5
LANE = 128  # conv feature channels padded to a lane-dense 128


def _round_up(x, m):
    return -(-x // m) * m


# ---------------------------------------------------------------------------
# Pallas kernels
# ---------------------------------------------------------------------------
def _conv_pool_bn_math(p_ref, w_ref, b_ref, g_ref, be_ref, *, npool, mp_pad, mp_real):
    """Shared conv(+bias)+ReLU+max_pool+BatchNorm2d math on ONE big matmul.

    p_ref : (npool*mp_pad, Kd) bf16   pool-offset-major im2col patches
    w_ref : (Kd, LANE)         bf16   block-diagonal grouped-conv weight
    b/g/be: (1, LANE)          f32    bias / BN gamma / BN beta (zero padded)
    returns (mp_pad, LANE) f32        pooled + batch-normalized activations
    """
    acc = jnp.dot(p_ref[...], w_ref[...], preferred_element_type=jnp.float32)
    y = acc[0:mp_pad]
    for s in range(1, npool):                    # max over pool offsets (aligned blocks)
        y = jnp.maximum(y, acc[s * mp_pad:(s + 1) * mp_pad])
    # max_s relu(dot_s + b) == relu(max_s(dot_s) + b)
    y = jnp.maximum(y + b_ref[...], 0.0)
    if mp_real == mp_pad:
        mean = jnp.mean(y, axis=0, keepdims=True)
        d = y - mean
        var = jnp.mean(d * d, axis=0, keepdims=True)
    else:                                        # exclude padded rows from batch stats
        rows = lax.broadcasted_iota(jnp.int32, (mp_pad, 1), 0)
        mask = (rows < mp_real).astype(jnp.float32)
        inv_n = 1.0 / float(mp_real)
        mean = jnp.sum(y * mask, axis=0, keepdims=True) * inv_n
        d = (y - mean) * mask
        var = jnp.sum(d * d, axis=0, keepdims=True) * inv_n
    return (y - mean) * lax.rsqrt(var + EPS) * g_ref[...] + be_ref[...]


def _make_conv_pool_bn_kernel(npool, mp_pad, mp_real):
    """Fused grouped Conv2d + bias + ReLU + max_pool2d + BatchNorm2d (not last layer)."""
    def kernel(p_ref, w_ref, b_ref, g_ref, be_ref, o_ref):
        o_ref[...] = _conv_pool_bn_math(
            p_ref, w_ref, b_ref, g_ref, be_ref,
            npool=npool, mp_pad=mp_pad, mp_real=mp_real).astype(o_ref.dtype)
    return kernel


def _bn1d_scalar(h, g_ref, b_ref):
    """BatchNorm1d(1) on a (B, F) block: one mean/var over batch AND features."""
    m = jnp.mean(h, axis=(0, 1), keepdims=True)
    v = jnp.mean((h - m) * (h - m), axis=(0, 1), keepdims=True)
    return (h - m) * lax.rsqrt(v + EPS) * g_ref[...] + b_ref[...]


def _make_last_conv_fc_kernel(npool, mp_pad, mp_real, n_pos, batch, n_hidden):
    """Last conv layer + the ENTIRE FC head in one kernel.

    Conv rows are emitted position-major (p, b); the PyTorch NCHW flatten + first
    Linear is a sum over positions of small (B, LANE)x(LANE, F) dots against a
    (n_pos, LANE, F) weight, so the flattened activation never leaves VMEM.
    """
    def kernel(*refs):
        p_ref, w_ref, b_ref, g_ref, be_ref = refs[:5]
        fc = refs[5:-2]
        o_ref, y_ref = refs[-2], refs[-1]

        yn = _conv_pool_bn_math(p_ref, w_ref, b_ref, g_ref, be_ref,
                                npool=npool, mp_pad=mp_pad, mp_real=mp_real)
        y_ref[...] = yn.astype(jnp.bfloat16)

        # FC0: NCHW flatten permutation folded into a per-position weight.
        w0 = fc[0]
        h = jnp.dot(y_ref[pl.ds(0, batch), :], w0[0],
                    preferred_element_type=jnp.float32)
        for p in range(1, n_pos):
            h = h + jnp.dot(y_ref[pl.ds(p * batch, batch), :], w0[p],
                            preferred_element_type=jnp.float32)
        h = jnp.maximum(h + fc[1][...], 0.0)
        h = _bn1d_scalar(h, fc[2], fc[3])
        idx = 4
        for _ in range(1, n_hidden):             # remaining Linear + ReLU + BatchNorm1d(1)
            wi, bi, gi, bei = fc[idx], fc[idx + 1], fc[idx + 2], fc[idx + 3]
            idx += 4
            h = jnp.dot(h.astype(jnp.bfloat16), wi[...],
                        preferred_element_type=jnp.float32) + bi[...]
            h = jnp.maximum(h, 0.0)
            h = _bn1d_scalar(h, gi, bei)
        wl, bl = fc[idx], fc[idx + 1]
        z = jnp.dot(h.astype(jnp.bfloat16), wl[...],
                    preferred_element_type=jnp.float32) + bl[...]
        # sigmoid via tanh (EUP path, numerically safe)
        o_ref[...] = 0.5 * (jnp.tanh(0.5 * z) + 1.0)
    return kernel


# ---------------------------------------------------------------------------
# Wrappers / glue
# ---------------------------------------------------------------------------
def _pallas_full(kernel, out_sd, *inputs, scratch_shapes=()):
    """Single-invocation pallas_call: no grid, whole operands resident in VMEM."""
    return pl.pallas_call(kernel, out_shape=out_sd,
                          scratch_shapes=scratch_shapes)(*inputs)


def _pool_patches(x_nhwc, cfg, kd_pad, row_order):
    """im2col patches grouped by pool offset, built with ONE XLA patches op.

    Returns (npool*mp_pad, kd_pad) bf16 plus (hp, wp, mp_real, mp_pad).
    Patch feature order is channel-major (ci, kh, kw), matching the block-diagonal
    weight from prepare_params.  Row order inside each pool slab:
    "bhw" -> (b, hp, wp)  (intermediate layers);  "hwb" -> (hp, wp, b) (last layer).
    """
    k, pad, pool = cfg["filter_size"], cfg["padding"], cfg["pool_size"]
    stride, dil = cfg["stride"], cfg["dilation"]
    b, _, _, cin = x_nhwc.shape
    kd = cin * k * k
    patches = lax.conv_general_dilated_patches(
        x_nhwc, (k, k), (stride, stride), ((pad, pad), (pad, pad)),
        rhs_dilation=(dil, dil),
        dimension_numbers=("NHWC", "HWIO", "NHWC"))           # (B, Ho, Wo, kd)
    ho, wo = patches.shape[1], patches.shape[2]
    hp, wp = ho // pool, wo // pool
    patches = patches[:, :hp * pool, :wp * pool, :]
    patches = patches.reshape(b, hp, pool, wp, pool, kd)
    if row_order == "bhw":
        patches = patches.transpose(2, 4, 0, 1, 3, 5)          # (i, j, b, hp, wp, kd)
    else:                                                      # "hwb": position-major
        patches = patches.transpose(2, 4, 1, 3, 0, 5)          # (i, j, hp, wp, b, kd)
    mp = b * hp * wp
    mp_pad = _round_up(mp, 8)
    patches = patches.reshape(pool * pool, mp, kd)
    if mp_pad > mp or kd_pad > kd:
        patches = jnp.pad(patches, ((0, 0), (0, mp_pad - mp), (0, kd_pad - kd)))
    patches = patches.reshape(pool * pool * mp_pad, kd_pad).astype(jnp.bfloat16)
    return patches, hp, wp, mp, mp_pad


def _block_diag_weight(w, cin_total, cout_total, groups):
    """Torch grouped-conv weight (CF, cin_g, k, k) -> dense block-diagonal
    (cin_total*k*k, cout_total) f32 with rows ordered (ci_global, kh, kw)."""
    cf, cin_g, k, _ = w.shape
    cout_g = cf // groups
    wt = jnp.zeros((cin_total, k, k, cout_total), jnp.float32)
    for g in range(groups):
        blk = jnp.transpose(w[g * cout_g:(g + 1) * cout_g], (1, 2, 3, 0))
        wt = wt.at[g * cin_g:(g + 1) * cin_g, :, :,
                   g * cout_g:(g + 1) * cout_g].set(blk)
    return wt.reshape(cin_total * k * k, cout_total)


def _fold_fc0_weight(w0, oh, ow, cf, c_pad):
    """First FC weight (F0, cf*oh*ow) -> (oh*ow, c_pad, F0): PyTorch NCHW flatten
    permutation + channel padding folded in, indexed by pooled spatial position."""
    f0 = w0.shape[0]
    wr = jnp.transpose(w0.reshape(f0, cf, oh * ow), (2, 1, 0))   # (P, cf, F0)
    return jnp.zeros((oh * ow, c_pad, f0), jnp.float32).at[:, :cf, :].set(wr)


def _conv_output_hw(cfg):
    h, w = cfg["num_kmers"], cfg["max_size"]
    k, pad, dil, s, pool = (cfg["filter_size"], cfg["padding"], cfg["dilation"],
                            cfg["stride"], cfg["pool_size"])
    for _ in range(cfg["num_convs"]):
        h = (h + 2 * pad - dil * (k - 1) - 1) // s + 1
        w = (w + 2 * pad - dil * (k - 1) - 1) // s + 1
        h, w = h // pool, w // pool
    return h, w


def prepare_params(params, cfg):
    """One-time weight preparation (hoisted out of the jitted per-step forward)."""
    k, groups = cfg["filter_size"], cfg["groups"]
    num_convs, num_fcs = cfg["num_convs"], cfg["num_fcs"]
    cf = params["conv_w"][0].shape[0]

    def pad_vec(v):
        return jnp.zeros((1, LANE), jnp.float32).at[0, :v.shape[0]].set(v)

    prep = {"emb": [e.astype(jnp.float32) for e in params["emb"]]}
    conv_w, conv_b, bn2_g, bn2_b, kd_pads = [], [], [], [], []
    for i in range(num_convs):
        cin_total = cfg["num_channels"] if i == 0 else LANE
        kd = cin_total * k * k
        kd_pad = _round_up(kd, 32)
        wbd = _block_diag_weight(params["conv_w"][i], cin_total, LANE, groups)
        wbd = jnp.zeros((kd_pad, LANE), jnp.float32).at[:kd, :].set(wbd)
        conv_w.append(wbd.astype(jnp.bfloat16))
        conv_b.append(pad_vec(params["conv_b"][i]))
        bn2_g.append(pad_vec(params["bn2_g"][i]))
        bn2_b.append(pad_vec(params["bn2_b"][i]))
        kd_pads.append(kd_pad)

    oh, ow = _conv_output_hw(cfg)
    fc_w = [_fold_fc0_weight(params["fc_w"][0], oh, ow, cf, LANE).astype(jnp.bfloat16)]
    fc_w += [params["fc_w"][j].T.astype(jnp.bfloat16) for j in range(1, num_fcs)]
    fc_b = [params["fc_b"][j].reshape(1, -1).astype(jnp.float32) for j in range(num_fcs)]
    bn1_g = [params["bn1_g"][j].reshape(1, 1).astype(jnp.float32)
             for j in range(num_fcs - 1)]
    bn1_b = [params["bn1_b"][j].reshape(1, 1).astype(jnp.float32)
             for j in range(num_fcs - 1)]
    prep.update(conv_w=conv_w, conv_b=conv_b, bn2_g=bn2_g, bn2_b=bn2_b,
                conv_kd_pad=kd_pads, fc_w=fc_w, fc_b=fc_b, bn1_g=bn1_g, bn1_b=bn1_b)
    return prep


def kmer_cnn_forward(kmers, prep, cfg):
    assert cfg["num_fcs"] >= 2 and cfg["num_convs"] >= 1
    bsz = kmers.shape[0]
    npool = cfg["pool_size"] * cfg["pool_size"]

    # nn.Embedding gather stays in plain JAX.
    # TODO(synk): tiny-vocab gather has no useful Pallas tiling at this size.
    emb = jnp.stack([jnp.take(t, kmers, axis=0) for t in prep["emb"]], axis=-1)
    x = emb.astype(jnp.float32)               # (B, NUM_KMERS, MAX_SIZE, C)  == NHWC

    # All conv layers except the last: fused conv + ReLU + pool + BN (lane-dense out).
    for i in range(cfg["num_convs"] - 1):
        patches, hp, wp, mp, mp_pad = _pool_patches(x, cfg, prep["conv_kd_pad"][i], "bhw")
        out = _pallas_full(
            _make_conv_pool_bn_kernel(npool, mp_pad, mp),
            jax.ShapeDtypeStruct((mp_pad, LANE), jnp.bfloat16),
            patches, prep["conv_w"][i], prep["conv_b"][i],
            prep["bn2_g"][i], prep["bn2_b"][i])
        x = out[:mp].reshape(bsz, hp, wp, LANE)

    # Last conv layer fused with the ENTIRE FC head -> (B, 1).
    i = cfg["num_convs"] - 1
    patches, hp, wp, mp, mp_pad = _pool_patches(x, cfg, prep["conv_kd_pad"][i], "hwb")
    n_hidden = cfg["num_fcs"] - 1
    fc_in = [prep["fc_w"][0], prep["fc_b"][0], prep["bn1_g"][0], prep["bn1_b"][0]]
    for j in range(1, n_hidden):
        fc_in += [prep["fc_w"][j], prep["fc_b"][j], prep["bn1_g"][j], prep["bn1_b"][j]]
    fc_in += [prep["fc_w"][-1], prep["fc_b"][-1]]

    out = _pallas_full(
        _make_last_conv_fc_kernel(npool, mp_pad, mp, hp * wp, bsz, n_hidden),
        jax.ShapeDtypeStruct((bsz, prep["fc_b"][-1].shape[-1]), jnp.float32),
        patches, prep["conv_w"][i], prep["conv_b"][i],
        prep["bn2_g"][i], prep["bn2_b"][i], *fc_in,
        scratch_shapes=[pltpu.VMEM((mp_pad, LANE), jnp.bfloat16)])
    return out.reshape(bsz, 1, 1)             # matches torch output shape (B, 1, 1)


if __name__ == "__main__":
    key = jax.random.PRNGKey(0)

    # Module hyper-parameters (small, consistent with __init__).
    NUM_CHANNELS = 2
    KMER_SIZES = [1, 2]
    VOCAB_SIZE = sum(4 ** k for k in KMER_SIZES)      # 20
    NUM_KMERS = 8
    VEC_SIZES = [6, 8]
    MAX_SIZE = max(VEC_SIZES)
    NUM_CONVS = 2
    NUM_FCS = 2
    FC_SIZE = 32
    CONV_FEATURES = 99 if NUM_CHANNELS == 3 else 100
    FILTER_SIZE, PADDING, POOL_SIZE, STRIDE, DILATION = 3, 3, 2, 1, 1
    GROUPS = NUM_CHANNELS
    B = 2

    cfg = dict(num_channels=NUM_CHANNELS, num_convs=NUM_CONVS, num_fcs=NUM_FCS,
               groups=GROUPS, filter_size=FILTER_SIZE, padding=PADDING,
               pool_size=POOL_SIZE, stride=STRIDE, dilation=DILATION,
               num_kmers=NUM_KMERS, max_size=MAX_SIZE)

    oh, ow = _conv_output_hw(cfg)
    fc_sizes = [oh * ow * CONV_FEATURES] + [FC_SIZE] * (NUM_FCS - 1) + [1]

    keys = jax.random.split(key, 16)

    # Embedding tables: per-channel vecs, zero-padded to MAX_SIZE columns.
    emb = []
    for i in range(NUM_CHANNELS):
        v = 0.1 * jax.random.normal(keys[i], (VOCAB_SIZE, VEC_SIZES[i]), jnp.float32)
        padded = jnp.zeros((VOCAB_SIZE, MAX_SIZE), jnp.float32).at[:, :VEC_SIZES[i]].set(v)
        emb.append(padded)

    conv_w, conv_b, bn2_g, bn2_b = [], [], [], []
    in_ch = NUM_CHANNELS
    for i in range(NUM_CONVS):
        kk = keys[4 + i]
        conv_w.append(0.1 * jax.random.normal(
            kk, (CONV_FEATURES, in_ch // GROUPS, FILTER_SIZE, FILTER_SIZE), jnp.float32))
        conv_b.append(0.01 * jax.random.normal(
            jax.random.fold_in(kk, 1), (CONV_FEATURES,), jnp.float32))
        bn2_g.append(jnp.ones((CONV_FEATURES,), jnp.float32))   # BatchNorm2d default init
        bn2_b.append(jnp.zeros((CONV_FEATURES,), jnp.float32))
        in_ch = CONV_FEATURES

    fc_w, fc_b, bn1_g, bn1_b = [], [], [], []
    for i in range(NUM_FCS):
        kk = keys[8 + i]
        fc_w.append(0.05 * jax.random.normal(kk, (fc_sizes[i + 1], fc_sizes[i]), jnp.float32))
        fc_b.append(0.01 * jax.random.normal(
            jax.random.fold_in(kk, 1), (fc_sizes[i + 1],), jnp.float32))
    for i in range(NUM_FCS - 1):
        bn1_g.append(jnp.ones((1,), jnp.float32))               # BatchNorm1d default init
        bn1_b.append(jnp.zeros((1,), jnp.float32))

    params = dict(emb=emb, conv_w=conv_w, conv_b=conv_b, bn2_g=bn2_g, bn2_b=bn2_b,
                  fc_w=fc_w, fc_b=fc_b, bn1_g=bn1_g, bn1_b=bn1_b)

    # One-time weight preparation, hoisted out of the per-step forward.
    prep = prepare_params(params, cfg)

    kmers = jax.random.randint(keys[15], (B, NUM_KMERS), 0, VOCAB_SIZE)

    fwd = jax.jit(lambda kk: kmer_cnn_forward(kk, prep, cfg))
    out = jax.block_until_ready(fwd(kmers))
    assert out.shape == (B, 1, 1)
    assert bool(jnp.all(jnp.isfinite(out)))
    assert bool(jnp.all((out >= 0.0) & (out <= 1.0)))
    print("KERNEL_OK")
</pallas_src>

<mosaic_0001>
module attributes {stable_mosaic.version = 11 : i64} {
  func.func @kernel(%arg0: memref<288x32xbf16, #tpu.memory_space<vmem>>, %arg1: memref<32x128xbf16, #tpu.memory_space<vmem>>, %arg2: memref<1x128xf32, #tpu.memory_space<vmem>>, %arg3: memref<1x128xf32, #tpu.memory_space<vmem>>, %arg4: memref<1x128xf32, #tpu.memory_space<vmem>>, %arg5: memref<72x128xbf16, #tpu.memory_space<vmem>>) attributes {dimension_semantics = [], scalar_prefetch = 0 : i64, scratch_operands = 0 : i64, tpu.core_type = #tpu.core_type<tc>} {
    %c0 = arith.constant 0 : index
    %c0_0 = arith.constant 0 : index
    %0 = vector.load %arg0[%c0, %c0_0] : memref<288x32xbf16, #tpu.memory_space<vmem>>, vector<288x32xbf16>
    %c0_1 = arith.constant 0 : index
    %c0_2 = arith.constant 0 : index
    %1 = vector.load %arg1[%c0_1, %c0_2] : memref<32x128xbf16, #tpu.memory_space<vmem>>, vector<32x128xbf16>
    %cst = arith.constant dense<0.000000e+00> : vector<288x128xf32>
    %2 = tpu.matmul %0, %1, %cst {dimension_numbers = #tpu.dot_dimension_numbers<[1], [0], [0], [1], [0, 0, 1, 1], [], []>} : vector<288x32xbf16>, vector<32x128xbf16>, vector<288x128xf32> -> vector<288x128xf32>
    %3 = vector.extract_strided_slice %2 {offsets = [0, 0], sizes = [72, 128], strides = [1, 1]} : vector<288x128xf32> to vector<72x128xf32>
    %4 = vector.extract_strided_slice %2 {offsets = [72, 0], sizes = [72, 128], strides = [1, 1]} : vector<288x128xf32> to vector<72x128xf32>
    %5 = arith.maximumf %3, %4 : vector<72x128xf32>
    %6 = vector.extract_strided_slice %2 {offsets = [144, 0], sizes = [72, 128], strides = [1, 1]} : vector<288x128xf32> to vector<72x128xf32>
    %7 = arith.maximumf %5, %6 : vector<72x128xf32>
    %8 = vector.extract_strided_slice %2 {offsets = [216, 0], sizes = [72, 128], strides = [1, 1]} : vector<288x128xf32> to vector<72x128xf32>
    %9 = arith.maximumf %7, %8 : vector<72x128xf32>
    %c0_3 = arith.constant 0 : index
    %c0_4 = arith.constant 0 : index
    %10 = vector.load %arg2[%c0_3, %c0_4] : memref<1x128xf32, #tpu.memory_space<vmem>>, vector<1x128xf32>
    %11 = vector.broadcast %10 : vector<1x128xf32> to vector<72x128xf32>
    %12 = arith.addf %9, %11 : vector<72x128xf32>
    %cst_5 = arith.constant 0.000000e+00 : f32
    %13 = vector.broadcast %cst_5 : f32 to vector<72x128xf32>
    %14 = arith.maximumf %12, %13 : vector<72x128xf32>
    %cst_6 = arith.constant dense<0.000000e+00> : vector<128xf32>
    %15 = vector.multi_reduction <add>, %14, %cst_6 [0] : vector<72x128xf32> to vector<128xf32>
    %16 = vector.shape_cast %15 : vector<128xf32> to vector<1x128xf32>
    %cst_7 = arith.constant 7.200000e+01 : f32
    %17 = vector.broadcast %cst_7 : f32 to vector<1x128xf32>
    %18 = arith.divf %16, %17 : vector<1x128xf32>
    %19 = vector.broadcast %18 : vector<1x128xf32> to vector<72x128xf32>
    %20 = arith.subf %14, %19 : vector<72x128xf32>
    %21 = arith.mulf %20, %20 : vector<72x128xf32>
    %cst_8 = arith.constant dense<0.000000e+00> : vector<128xf32>
    %22 = vector.multi_reduction <add>, %21, %cst_8 [0] : vector<72x128xf32> to vector<128xf32>
    %23 = vector.shape_cast %22 : vector<128xf32> to vector<1x128xf32>
    %cst_9 = arith.constant 7.200000e+01 : f32
    %24 = vector.broadcast %cst_9 : f32 to vector<1x128xf32>
    %25 = arith.divf %23, %24 : vector<1x128xf32>
    %26 = vector.broadcast %18 : vector<1x128xf32> to vector<72x128xf32>
    %27 = arith.subf %14, %26 : vector<72x128xf32>
    %cst_10 = arith.constant 9.99999974E-6 : f32
    %28 = vector.broadcast %cst_10 : f32 to vector<1x128xf32>
    %29 = arith.addf %25, %28 : vector<1x128xf32>
    %30 = math.rsqrt %29 : vector<1x128xf32>
    %31 = vector.broadcast %30 : vector<1x128xf32> to vector<72x128xf32>
    %32 = arith.mulf %27, %31 : vector<72x128xf32>
    %c0_11 = arith.constant 0 : index
    %c0_12 = arith.constant 0 : index
    %33 = vector.load %arg3[%c0_11, %c0_12] : memref<1x128xf32, #tpu.memory_space<vmem>>, vector<1x128xf32>
    %34 = vector.broadcast %33 : vector<1x128xf32> to vector<72x128xf32>
    %35 = arith.mulf %32, %34 : vector<72x128xf32>
    %c0_13 = arith.constant 0 : index
    %c0_14 = arith.constant 0 : index
    %36 = vector.load %arg4[%c0_13, %c0_14] : memref<1x128xf32, #tpu.memory_space<vmem>>, vector<1x128xf32>
    %37 = vector.broadcast %36 : vector<1x128xf32> to vector<72x128xf32>
    %38 = arith.addf %35, %37 : vector<72x128xf32>
    %39 = arith.truncf %38 : vector<72x128xf32> to vector<72x128xbf16>
    %c0_15 = arith.constant 0 : index
    %c0_16 = arith.constant 0 : index
    %40 = vector.load %arg5[%c0_15, %c0_16] : memref<72x128xbf16, #tpu.memory_space<vmem>>, vector<72x128xbf16>
    tpu.vector_store %arg5[%c0_15, %c0_16], %39 {strides = array<i32>} : memref<72x128xbf16, #tpu.memory_space<vmem>>, vector<72x128xbf16>,
    return
  }
}

module attributes {stable_mosaic.version = 11 : i64} {
  func.func @kernel(%arg0: memref<224x1152xbf16, #tpu.memory_space<vmem>>, %arg1: memref<1152x128xbf16, #tpu.memory_space<vmem>>, %arg2: memref<1x128xf32, #tpu.memory_space<vmem>>, %arg3: memref<1x128xf32, #tpu.memory_space<vmem>>, %arg4: memref<1x128xf32, #tpu.memory_space<vmem>>, %arg5: memref<25x128x32xbf16, #tpu.memory_space<vmem>>, %arg6: memref<1x32xf32, #tpu.memory_space<vmem>>, %arg7: memref<1x1xf32, #tpu.memory_space<vmem>>, %arg8: memref<1x1xf32, #tpu.memory_space<vmem>>, %arg9: memref<32x1xbf16, #tpu.memory_space<vmem>>, %arg10: memref<1x1xf32, #tpu.memory_space<vmem>>, %arg11: memref<2x1xf32, #tpu.memory_space<vmem>>, %arg12: memref<56x128xbf16, #tpu.memory_space<vmem>>) attributes {dimension_semantics = [], scalar_prefetch = 0 : i64, scratch_operands = 1 : i64, tpu.core_type = #tpu.core_type<tc>} {
    %c0 = arith.constant 0 : index
    %c0_0 = arith.constant 0 : index
    %0 = vector.load %arg0[%c0, %c0_0] : memref<224x1152xbf16, #tpu.memory_space<vmem>>, vector<224x1152xbf16>
    %c0_1 = arith.constant 0 : index
    %c0_2 = arith.constant 0 : index
    %1 = vector.load %arg1[%c0_1, %c0_2] : memref<1152x128xbf16, #tpu.memory_space<vmem>>, vector<1152x128xbf16>
    %cst = arith.constant dense<0.000000e+00> : vector<224x128xf32>
    %2 = tpu.matmul %0, %1, %cst {dimension_numbers = #tpu.dot_dimension_numbers<[1], [0], [0], [1], [0, 0, 1, 1], [], []>} : vector<224x1152xbf16>, vector<1152x128xbf16>, vector<224x128xf32> -> vector<224x128xf32>
    %3 = vector.extract_strided_slice %2 {offsets = [0, 0], sizes = [56, 128], strides = [1, 1]} : vector<224x128xf32> to vector<56x128xf32>
    %4 = vector.extract_strided_slice %2 {offsets = [56, 0], sizes = [56, 128], strides = [1, 1]} : vector<224x128xf32> to vector<56x128xf32>
    %5 = arith.maximumf %3, %4 : vector<56x128xf32>
    %6 = vector.extract_strided_slice %2 {offsets = [112, 0], sizes = [56, 128], strides = [1, 1]} : vector<224x128xf32> to vector<56x128xf32>
    %7 = arith.maximumf %5, %6 : vector<56x128xf32>
    %8 = vector.extract_strided_slice %2 {offsets = [168, 0], sizes = [56, 128], strides = [1, 1]} : vector<224x128xf32> to vector<56x128xf32>
    %9 = arith.maximumf %7, %8 : vector<56x128xf32>
    %c0_3 = arith.constant 0 : index
    %c0_4 = arith.constant 0 : index
    %10 = vector.load %arg2[%c0_3, %c0_4] : memref<1x128xf32, #tpu.memory_space<vmem>>, vector<1x128xf32>
    %11 = vector.broadcast %10 : vector<1x128xf32> to vector<56x128xf32>
    %12 = arith.addf %9, %11 : vector<56x128xf32>
    %cst_5 = arith.constant 0.000000e+00 : f32
    %13 = vector.broadcast %cst_5 : f32 to vector<56x128xf32>
    %14 = arith.maximumf %12, %13 : vector<56x128xf32>
    %15 = tpu.iota {dimensions = array<i32: 0>} : vector<56x1xi32>
    %c50_i32 = arith.constant 50 : i32
    %16 = vector.broadcast %c50_i32 : i32 to vector<56x1xi32>
    %17 = arith.cmpi slt, %15, %16 : vector<56x1xi32>
    %18 = arith.extui %17 : vector<56x1xi1> to vector<56x1xi32>
    %19 = arith.sitofp %18 : vector<56x1xi32> to vector<56x1xf32>
    %20 = vector.broadcast %19 : vector<56x1xf32> to vector<56x128xf32>
    %21 = arith.mulf %14, %20 : vector<56x128xf32>
    %cst_6 = arith.constant dense<0.000000e+00> : vector<128xf32>
    %22 = vector.multi_reduction <add>, %21, %cst_6 [0] : vector<56x128xf32> to vector<128xf32>
    %23 = vector.shape_cast %22 : vector<128xf32> to vector<1x128xf32>
    %cst_7 = arith.constant 2.000000e-02 : f32
    %24 = vector.broadcast %cst_7 : f32 to vector<1x128xf32>
    %25 = arith.mulf %23, %24 : vector<1x128xf32>
    %26 = vector.broadcast %25 : vector<1x128xf32> to vector<56x128xf32>
    %27 = arith.subf %14, %26 : vector<56x128xf32>
    %28 = vector.broadcast %19 : vector<56x1xf32> to vector<56x128xf32>
    %29 = arith.mulf %27, %28 : vector<56x128xf32>
    %30 = arith.mulf %29, %29 : vector<56x128xf32>
    %cst_8 = arith.constant dense<0.000000e+00> : vector<128xf32>
    %31 = vector.multi_reduction <add>, %30, %cst_8 [0] : vector<56x128xf32> to vector<128xf32>
    %32 = vector.shape_cast %31 : vector<128xf32> to vector<1x128xf32>
    %cst_9 = arith.constant 2.000000e-02 : f32
    %33 = vector.broadcast %cst_9 : f32 to vector<1x128xf32>
    %34 = arith.mulf %32, %33 : vector<1x128xf32>
    %35 = vector.broadcast %25 : vector<1x128xf32> to vector<56x128xf32>
    %36 = arith.subf %14, %35 : vector<56x128xf32>
    %cst_10 = arith.constant 9.99999974E-6 : f32
    %37 = vector.broadcast %cst_10 : f32 to vector<1x128xf32>
    %38 = arith.addf %34, %37 : vector<1x128xf32>
    %39 = math.rsqrt %38 : vector<1x128xf32>
    %40 = vector.broadcast %39 : vector<1x128xf32> to vector<56x128xf32>
    %41 = arith.mulf %36, %40 : vector<56x128xf32>
    %c0_11 = arith.constant 0 : index
    %c0_12 = arith.constant 0 : index
    %42 = vector.load %arg3[%c0_11, %c0_12] : memref<1x128xf32, #tpu.memory_space<vmem>>, vector<1x128xf32>
    %43 = vector.broadcast %42 : vector<1x128xf32> to vector<56x128xf32>
    %44 = arith.mulf %41, %43 : vector<56x128xf32>
    %c0_13 = arith.constant 0 : index
    %c0_14 = arith.constant 0 : index
    %45 = vector.load %arg4[%c0_13, %c0_14] : memref<1x128xf32, #tpu.memory_space<vmem>>, vector<1x128xf32>
    %46 = vector.broadcast %45 : vector<1x128xf32> to vector<56x128xf32>
    %47 = arith.addf %44, %46 : vector<56x128xf32>
    %48 = arith.truncf %47 : vector<56x128xf32> to vector<56x128xbf16>
    %c0_15 = arith.constant 0 : index
    %c0_16 = arith.constant 0 : index
    %49 = vector.load %arg12[%c0_15, %c0_16] : memref<56x128xbf16, #tpu.memory_space<vmem>>, vector<56x128xbf16>
    tpu.vector_store %arg12[%c0_15, %c0_16], %48 {strides = array<i32>} : memref<56x128xbf16, #tpu.memory_space<vmem>>, vector<56x128xbf16>,
    %c0_17 = arith.constant 0 : index
    %c0_18 = arith.constant 0 : index
    %50 = vector.load %arg12[%c0_17, %c0_18] : memref<56x128xbf16, #tpu.memory_space<vmem>>, vector<2x128xbf16>
    %c0_19 = arith.constant 0 : index
    %c0_20 = arith.constant 0 : index
    %c0_21 = arith.constant 0 : index
    %51 = vector.load %arg5[%c0_19, %c0_20, %c0_21] : memref<25x128x32xbf16, #tpu.memory_space<vmem>>, vector<1x128x32xbf16>
    %52 = vector.shape_cast %51 : vector<1x128x32xbf16> to vector<128x32xbf16>
    %cst_22 = arith.constant dense<0.000000e+00> : vector<2x32xf32>
    %53 = tpu.matmul %50, %52, %cst_22 {dimension_numbers = #tpu.dot_dimension_numbers<[1], [0], [0], [1], [0, 0, 1, 1], [], []>} : vector<2x128xbf16>, vector<128x32xbf16>, vector<2x32xf32> -> vector<2x32xf32>
    %c2 = arith.constant 2 : index
    %c0_23 = arith.constant 0 : index
    %54 = vector.load %arg12[%c2, %c0_23] : memref<56x128xbf16, #tpu.memory_space<vmem>>, vector<2x128xbf16>
    %c1 = arith.constant 1 : index
    %c0_24 = arith.constant 0 : index
    %c0_25 = arith.constant 0 : index
    %55 = vector.load %arg5[%c1, %c0_24, %c0_25] : memref<25x128x32xbf16, #tpu.memory_space<vmem>>, vector<1x128x32xbf16>
    %56 = vector.shape_cast %55 : vector<1x128x32xbf16> to vector<128x32xbf16>
    %cst_26 = arith.constant dense<0.000000e+00> : vector<2x32xf32>
    %57 = tpu.matmul %54, %56, %cst_26 {dimension_numbers = #tpu.dot_dimension_numbers<[1], [0], [0], [1], [0, 0, 1, 1], [], []>} : vector<2x128xbf16>, vector<128x32xbf16>, vector<2x32xf32> -> vector<2x32xf32>
    %58 = arith.addf %53, %57 : vector<2x32xf32>
    %c4 = arith.constant 4 : index
    %c0_27 = arith.constant 0 : index
    %59 = vector.load %arg12[%c4, %c0_27] : memref<56x128xbf16, #tpu.memory_space<vmem>>, vector<2x128xbf16>
    %c2_28 = arith.constant 2 : index
    %c0_29 = arith.constant 0 : index
    %c0_30 = arith.constant 0 : index
    %60 = vector.load %arg5[%c2_28, %c0_29, %c0_30] : memref<25x128x32xbf16, #tpu.memory_space<vmem>>, vector<1x128x32xbf16>
    %61 = vector.shape_cast %60 : vector<1x128x32xbf16> to vector<128x32xbf16>
    %cst_31 = arith.constant dense<0.000000e+00> : vector<2x32xf32>
    %62 = tpu.matmul %59, %61, %cst_31 {dimension_numbers = #tpu.dot_dimension_numbers<[1], [0], [0], [1], [0, 0, 1, 1], [], []>} : vector<2x128xbf16>, vector<128x32xbf16>, vector<2x32xf32> -> vector<2x32xf32>
    %63 = arith.addf %58, %62 : vector<2x32xf32>
    %c6 = arith.constant 6 : index
    %c0_32 = arith.constant 0 : index
    %64 = vector.load %arg12[%c6, %c0_32] : memref<56x128xbf16, #tpu.memory_space<vmem>>, vector<2x128xbf16>
    %c3 = arith.constant 3 : index
    %c0_33 = arith.constant 0 : index
    %c0_34 = arith.constant 0 : index
    %65 = vector.load %arg5[%c3, %c0_33, %c0_34] : memref<25x128x32xbf16, #tpu.memory_space<vmem>>, vector<1x128x32xbf16>
    %66 = vector.shape_cast %65 : vector<1x128x32xbf16> to vector<128x32xbf16>
    %cst_35 = arith.constant dense<0.000000e+00> : vector<2x32xf32>
    %67 = tpu.matmul %64, %66, %cst_35 {dimension_numbers = #tpu.dot_dimension_numbers<[1], [0], [0], [1], [0, 0, 1, 1], [], []>} : vector<2x128xbf16>, vector<128x32xbf16>, vector<2x32xf32> -> vector<2x32xf32>
    %68 = arith.addf %63, %67 : vector<2x32xf32>
    %c8 = arith.constant 8 : index
    %c0_36 = arith.constant 0 : index
    %69 = vector.load %arg12[%c8, %c0_36] : memref<56x128xbf16, #tpu.memory_space<vmem>>, vector<2x128xbf16>
    %c4_37 = arith.constant 4 : index
    %c0_38 = arith.constant 0 : index
    %c0_39 = arith.constant 0 : index
    %70 = vector.load %arg5[%c4_37, %c0_38, %c0_39] : memref<25x128x32xbf16, #tpu.memory_space<vmem>>, vector<1x128x32xbf16>
    %71 = vector.shape_cast %70 : vector<1x128x32xbf16> to vector<128x32xbf16>
    %cst_40 = arith.constant dense<0.000000e+00> : vector<2x32xf32>
    %72 = tpu.matmul %69, %71, %cst_40 {dimension_numbers = #tpu.dot_dimension_numbers<[1], [0], [0], [1], [0, 0, 1, 1], [], []>} : vector<2x128xbf16>, vector<128x32xbf16>, vector<2x32xf32> -> vector<2x32xf32>
    %73 = arith.addf %68, %72 : vector<2x32xf32>
    %c10 = arith.constant 10 : index
    %c0_41 = arith.constant 0 : index
    %74 = vector.load %arg12[%c10, %c0_41] : memref<56x128xbf16, #tpu.memory_space<vmem>>, vector<2x128xbf16>
    %c5 = arith.constant 5 : index
    %c0_42 = arith.constant 0 : index
    %c0_43 = arith.constant 0 : index
    %75 = vector.load %arg5[%c5, %c0_42, %c0_43] : memref<25x128x32xbf16, #tpu.memory_space<vmem>>, vector<1x128x32xbf16>
    %76 = vector.shape_cast %75 : vector<1x128x32xbf16> to vector<128x32xbf16>
    %cst_44 = arith.constant dense<0.000000e+00> : vector<2x32xf32>
    %77 = tpu.matmul %74, %76, %cst_44 {dimension_numbers = #tpu.dot_dimension_numbers<[1], [0], [0], [1], [0, 0, 1, 1], [], []>} : vector<2x128xbf16>, vector<128x32xbf16>, vector<2x32xf32> -> vector<2x32xf32>
    %78 = arith.addf %73, %77 : vector<2x32xf32>
    %c12 = arith.constant 12 : index
    %c0_45 = arith.constant 0 : index
    %79 = vector.load %arg12[%c12, %c0_45] : memref<56x128xbf16, #tpu.memory_space<vmem>>, vector<2x128xbf16>
    %c6_46 = arith.constant 6 : index
    %c0_47 = arith.constant 0 : index
    %c0_48 = arith.constant 0 : index
    %80 = vector.load %arg5[%c6_46, %c0_47, %c0_48] : memref<25x128x32xbf16, #tpu.memory_space<vmem>>, vector<1x128x32xbf16>
    %81 = vector.shape_cast %80 : vector<1x128x32xbf16> to vector<128x32xbf16>
    %cst_49 = arith.constant dense<0.000000e+00> : vector<2x32xf32>
    %82 = tpu.matmul %79, %81, %cst_49 {dimension_numbers = #tpu.dot_dimension_numbers<[1], [0], [0], [1], [0, 0, 1, 1], [], []>} : vector<2x128xbf16>, vector<128x32xbf16>, vector<2x32xf32> -> vector<2x32xf32>
    %83 = arith.addf %78, %82 : vector<2x32xf32>
    %c14 = arith.constant 14 : index
    %c0_50 = arith.constant 0 : index
    %84 = vector.load %arg12[%c14, %c0_50] : memref<56x128xbf16, #tpu.memory_space<vmem>>, vector<2x128xbf16>
    %c7 = arith.constant 7 : index
    %c0_51 = arith.constant 0 : index
    %c0_52 = arith.constant 0 : index
    %85 = vector.load %arg5[%c7, %c0_51, %c0_52] : memref<25x128x32xbf16, #tpu.memory_space<vmem>>, vector<1x128x32xbf16>
    %86 = vector.shape_cast %85 : vector<1x128x32xbf16> to vector<128x32xbf16>
    %cst_53 = arith.constant dense<0.000000e+00> : vector<2x32xf32>
    %87 = tpu.matmul %84, %86, %cst_53 {dimension_numbers = #tpu.dot_dimension_numbers<[1], [0], [0], [1], [0, 0, 1, 1], [], []>} : vector<2x128xbf16>, vector<128x32xbf16>, vector<2x32xf32> -> vector<2x32xf32>
    %88 = arith.addf %83, %87 : vector<2x32xf32>
    %c16 = arith.constant 16 : index
    %c0_54 = arith.constant 0 : index
    %89 = vector.load %arg12[%c16, %c0_54] : memref<56x128xbf16, #tpu.memory_space<vmem>>, vector<2x128xbf16>
    %c8_55 = arith.constant 8 : index
    %c0_56 = arith.constant 0 : index
    %c0_57 = arith.constant 0 : index
    %90 = vector.load %arg5[%c8_55, %c0_56, %c0_57] : memref<25x128x32xbf16, #tpu.memory_space<vmem>>, vector<1x128x32xbf16>
    %91 = vector.shape_cast %90 : vector<1x128x32xbf16> to vector<128x32xbf16>
    %cst_58 = arith.constant dense<0.000000e+00> : vector<2x32xf32>
    %92 = tpu.matmul %89, %91, %cst_58 {dimension_numbers = #tpu.dot_dimension_numbers<[1], [0], [0], [1], [0, 0, 1, 1], [], []>} : vector<2x128xbf16>, vector<128x32xbf16>, vector<2x32xf32> -> vector<2x32xf32>
    %93 = arith.addf %88, %92 : vector<2x32xf32>
    %c18 = arith.constant 18 : index
    %c0_59 = arith.constant 0 : index
    %94 = vector.load %arg12[%c18, %c0_59] : memref<56x128xbf16, #tpu.memory_space<vmem>>, vector<2x128xbf16>
    %c9 = arith.constant 9 : index
    %c0_60 = arith.constant 0 : index
    %c0_61 = arith.constant 0 : index
    %95 = vector.load %arg5[%c9, %c0_60, %c0_61] : memref<25x128x32xbf16, #tpu.memory_space<vmem>>, vector<1x128x32xbf16>
    %96 = vector.shape_cast %95 : vector<1x128x32xbf16> to vector<128x32xbf16>
    %cst_62 = arith.constant dense<0.000000e+00> : vector<2x32xf32>
    %97 = tpu.matmul %94, %96, %cst_62 {dimension_numbers = #tpu.dot_dimension_numbers<[1], [0], [0], [1], [0, 0, 1, 1], [], []>} : vector<2x128xbf16>, vector<128x32xbf16>, vector<2x32xf32> -> vector<2x32xf32>
    %98 = arith.addf %93, %97 : vector<2x32xf32>
    %c20 = arith.constant 20 : index
    %c0_63 = arith.constant 0 : index
    %99 = vector.load %arg12[%c20, %c0_63] : memref<56x128xbf16, #tpu.memory_space<vmem>>, vector<2x128xbf16>
    %c10_64 = arith.constant 10 : index
    %c0_65 = arith.constant 0 : index
    %c0_66 = arith.constant 0 : index
    %100 = vector.load %arg5[%c10_64, %c0_65, %c0_66] : memref<25x128x32xbf16, #tpu.memory_space<vmem>>, vector<1x128x32xbf16>
    %101 = vector.shape_cast %100 : vector<1x128x32xbf16> to vector<128x32xbf16>
    %cst_67 = arith.constant dense<0.000000e+00> : vector<2x32xf32>
    %102 = tpu.matmul %99, %101, %cst_67 {dimension_numbers = #tpu.dot_dimension_numbers<[1], [0], [0], [1], [0, 0, 1, 1], [], []>} : vector<2x128xbf16>, vector<128x32xbf16>, vector<2x32xf32> -> vector<2x32xf32>
    %103 = arith.addf %98, %102 : vector<2x32xf32>
    %c22 = arith.constant 22 : index
    %c0_68 = arith.constant 0 : index
    %104 = vector.load %arg12[%c22, %c0_68] : memref<56x128xbf16, #tpu.memory_space<vmem>>, vector<2x128xbf16>
    %c11 = arith.constant 11 : index
    %c0_69 = arith.constant 0 : index
    %c0_70 = arith.constant 0 : index
    %105 = vector.load %arg5[%c11, %c0_69, %c0_70] : memref<25x128x32xbf16, #tpu.memory_space<vmem>>, vector<1x128x32xbf16>
    %106 = vector.shape_cast %105 : vector<1x128x32xbf16> to vector<128x32xbf16>
    %cst_71 = arith.constant dense<0.000000e+00> : vector<2x32xf32>
    %107 = tpu.matmul %104, %106, %cst_71 {dimension_numbers = #tpu.dot_dimension_numbers<[1], [0], [0], [1], [0, 0, 1, 1], [], []>} : vector<2x128xbf16>, vector<128x32xbf16>, vector<2x32xf32> -> vector<2x32xf32>
    %108 = arith.addf %103, %107 : vector<2x32xf32>
    %c24 = arith.constant 24 : index
    %c0_72 = arith.constant 0 : index
    %109 = vector.load %arg12[%c24, %c0_72] : memref<56x128xbf16, #tpu.memory_space<vmem>>, vector<2x128xbf16>
    %c12_73 = arith.constant 12 : index
    %c0_74 = arith.constant 0 : index
    %c0_75 = arith.constant 0 : index
    %110 = vector.load %arg5[%c12_73, %c0_74, %c0_75] : memref<25x128x32xbf16, #tpu.memory_space<vmem>>, vector<1x128x32xbf16>
    %111 = vector.shape_cast %110 : vector<1x128x32xbf16> to vector<128x32xbf16>
    %cst_76 = arith.constant dense<0.000000e+00> : vector<2x32xf32>
    %112 = tpu.matmul %109, %111, %cst_76 {dimension_numbers = #tpu.dot_dimension_numbers<[1], [0], [0], [1], [0, 0, 1, 1], [], []>} : vector<2x128xbf16>, vector<128x32xbf16>, vector<2x32xf32> -> vector<2x32xf32>
    %113 = arith.addf %108, %112 : vector<2x32xf32>
    %c26 = arith.constant 26 : index
    %c0_77 = arith.constant 0 : index
    %114 = vector.load %arg12[%c26, %c0_77] : memref<56x128xbf16, #tpu.memory_space<vmem>>, vector<2x128xbf16>
    %c13 = arith.constant 13 : index
    %c0_78 = arith.constant 0 : index
    %c0_79 = arith.constant 0 : index
    %115 = vector.load %arg5[%c13, %c0_78, %c0_79] : memref<25x128x32xbf16, #tpu.memory_space<vmem>>, vector<1x128x32xbf16>
    %116 = vector.shape_cast %115 : vector<1x128x32xbf16> to vector<128x32xbf16>
    %cst_80 = arith.constant dense<0.000000e+00> : vector<2x32xf32>
    %117 = tpu.matmul %114, %116, %cst_80 {dimension_numbers = #tpu.dot_dimension_numbers<[1], [0], [0], [1], [0, 0, 1, 1], [], []>} : vector<2x128xbf16>, vector<128x32xbf16>, vector<2x32xf32> -> vector<2x32xf32>
    %118 = arith.addf %113, %117 : vector<2x32xf32>
    %c28 = arith.constant 28 : index
    %c0_81 = arith.constant 0 : index
    %119 = vector.load %arg12[%c28, %c0_81] : memref<56x128xbf16, #tpu.memory_space<vmem>>, vector<2x128xbf16>
    %c14_82 = arith.constant 14 : index
    %c0_83 = arith.constant 0 : index
    %c0_84 = arith.constant 0 : index
    %120 = vector.load %arg5[%c14_82, %c0_83, %c0_84] : memref<25x128x32xbf16, #tpu.memory_space<vmem>>, vector<1x128x32xbf16>
    %121 = vector.shape_cast %120 : vector<1x128x32xbf16> to vector<128x32xbf16>
    %cst_85 = arith.constant dense<0.000000e+00> : vector<2x32xf32>
    %122 = tpu.matmul %119, %121, %cst_85 {dimension_numbers = #tpu.dot_dimension_numbers<[1], [0], [0], [1], [0, 0, 1, 1], [], []>} : vector<2x128xbf16>, vector<128x32xbf16>, vector<2x32xf32> -> vector<2x32xf32>
    %123 = arith.addf %118, %122 : vector<2x32xf32>
    %c30 = arith.constant 30 : index
    %c0_86 = arith.constant 0 : index
    %124 = vector.load %arg12[%c30, %c0_86] : memref<56x128xbf16, #tpu.memory_space<vmem>>, vector<2x128xbf16>
    %c15 = arith.constant 15 : index
    %c0_87 = arith.constant 0 : index
    %c0_88 = arith.constant 0 : index
    %125 = vector.load %arg5[%c15, %c0_87, %c0_88] : memref<25x128x32xbf16, #tpu.memory_space<vmem>>, vector<1x128x32xbf16>
    %126 = vector.shape_cast %125 : vector<1x128x32xbf16> to vector<128x32xbf16>
    %cst_89 = arith.constant dense<0.000000e+00> : vector<2x32xf32>
    %127 = tpu.matmul %124, %126, %cst_89 {dimension_numbers = #tpu.dot_dimension_numbers<[1], [0], [0], [1], [0, 0, 1, 1], [], []>} : vector<2x128xbf16>, vector<128x32xbf16>, vector<2x32xf32> -> vector<2x32xf32>
    %128 = arith.addf %123, %127 : vector<2x32xf32>
    %c32 = arith.constant 32 : index
    %c0_90 = arith.constant 0 : index
    %129 = vector.load %arg12[%c32, %c0_90] : memref<56x128xbf16, #tpu.memory_space<vmem>>, vector<2x128xbf16>
    %c16_91 = arith.constant 16 : index
    %c0_92 = arith.constant 0 : index
    %c0_93 = arith.constant 0 : index
    %130 = vector.load %arg5[%c16_91, %c0_92, %c0_93] : memref<25x128x32xbf16, #tpu.memory_space<vmem>>, vector<1x128x32xbf16>
    %131 = vector.shape_cast %130 : vector<1x128x32xbf16> to vector<128x32xbf16>
    %cst_94 = arith.constant dense<0.000000e+00> : vector<2x32xf32>
    %132 = tpu.matmul %129, %131, %cst_94 {dimension_numbers = #tpu.dot_dimension_numbers<[1], [0], [0], [1], [0, 0, 1, 1], [], []>} : vector<2x128xbf16>, vector<128x32xbf16>, vector<2x32xf32> -> vector<2x32xf32>
    %133 = arith.addf %128, %132 : vector<2x32xf32>
    %c34 = arith.constant 34 : index
    %c0_95 = arith.constant 0 : index
    %134 = vector.load %arg12[%c34, %c0_95] : memref<56x128xbf16, #tpu.memory_space<vmem>>, vector<2x128xbf16>
    %c17 = arith.constant 17 : index
    %c0_96 = arith.constant 0 : index
    %c0_97 = arith.constant 0 : index
    %135 = vector.load %arg5[%c17, %c0_96, %c0_97] : memref<25x128x32xbf16, #tpu.memory_space<vmem>>, vector<1x128x32xbf16>
    %136 = vector.shape_cast %135 : vector<1x128x32xbf16> to vector<128x32xbf16>
    %cst_98 = arith.constant dense<0.000000e+00> : vector<2x32xf32>
    %137 = tpu.matmul %134, %136, %cst_98 {dimension_numbers = #tpu.dot_dimension_numbers<[1], [0], [0], [1], [0, 0, 1, 1], [], []>} : vector<2x128xbf16>, vector<128x32xbf16>, vector<2x32xf32> -> vector<2x32xf32>
    %138 = arith.addf %133, %137 : vector<2x32xf32>
    %c36 = arith.constant 36 : index
    %c0_99 = arith.constant 0 : index
    %139 = vector.load %arg12[%c36, %c0_99] : memref<56x128xbf16, #tpu.memory_space<vmem>>, vector<2x128xbf16>
    %c18_100 = arith.constant 18 : index
    %c0_101 = arith.constant 0 : index
    %c0_102 = arith.constant 0 : index
    %140 = vector.load %arg5[%c18_100, %c0_101, %c0_102] : memref<25x128x32xbf16, #tpu.memory_space<vmem>>, vector<1x128x32xbf16>
    %141 = vector.shape_cast %140 : vector<1x128x32xbf16> to vector<128x32xbf16>
    %cst_103 = arith.constant dense<0.000000e+00> : vector<2x32xf32>
    %142 = tpu.matmul %139, %141, %cst_103 {dimension_numbers = #tpu.dot_dimension_numbers<[1], [0], [0], [1], [0, 0, 1, 1], [], []>} : vector<2x128xbf16>, vector<128x32xbf16>, vector<2x32xf32> -> vector<2x32xf32>
    %143 = arith.addf %138, %142 : vector<2x32xf32>
    %c38 = arith.constant 38 : index
    %c0_104 = arith.constant 0 : index
    %144 = vector.load %arg12[%c38, %c0_104] : memref<56x128xbf16, #tpu.memory_space<vmem>>, vector<2x128xbf16>
    %c19 = arith.constant 19 : index
    %c0_105 = arith.constant 0 : index
    %c0_106 = arith.constant 0 : index
    %145 = vector.load %arg5[%c19, %c0_105, %c0_106] : memref<25x128x32xbf16, #tpu.memory_space<vmem>>, vector<1x128x32xbf16>
    %146 = vector.shape_cast %145 : vector<1x128x32xbf16> to vector<128x32xbf16>
    %cst_107 = arith.constant dense<0.000000e+00> : vector<2x32xf32>
    %147 = tpu.matmul %144, %146, %cst_107 {dimension_numbers = #tpu.dot_dimension_numbers<[1], [0], [0], [1], [0, 0, 1, 1], [], []>} : vector<2x128xbf16>, vector<128x32xbf16>, vector<2x32xf32> -> vector<2x32xf32>
    %148 = arith.addf %143, %147 : vector<2x32xf32>
    %c40 = arith.constant 40 : index
    %c0_108 = arith.constant 0 : index
    %149 = vector.load %arg12[%c40, %c0_108] : memref<56x128xbf16, #tpu.memory_space<vmem>>, vector<2x128xbf16>
    %c20_109 = arith.constant 20 : index
    %c0_110 = arith.constant 0 : index
    %c0_111 = arith.constant 0 : index
    %150 = vector.load %arg5[%c20_109, %c0_110, %c0_111] : memref<25x128x32xbf16, #tpu.memory_space<vmem>>, vector<1x128x32xbf16>
    %151 = vector.shape_cast %150 : vector<1x128x32xbf16> to vector<128x32xbf16>
    %cst_112 = arith.constant dense<0.000000e+00> : vector<2x32xf32>
    %152 = tpu.matmul %149, %151, %cst_112 {dimension_numbers = #tpu.dot_dimension_numbers<[1], [0], [0], [1], [0, 0, 1, 1], [], []>} : vector<2x128xbf16>, vector<128x32xbf16>, vector<2x32xf32> -> vector<2x32xf32>
    %153 = arith.addf %148, %152 : vector<2x32xf32>
    %c42 = arith.constant 42 : index
    %c0_113 = arith.constant 0 : index
    %154 = vector.load %arg12[%c42, %c0_113] : memref<56x128xbf16, #tpu.memory_space<vmem>>, vector<2x128xbf16>
    %c21 = arith.constant 21 : index
    %c0_114 = arith.constant 0 : index
    %c0_115 = arith.constant 0 : index
    %155 = vector.load %arg5[%c21, %c0_114, %c0_115] : memref<25x128x32xbf16, #tpu.memory_space<vmem>>, vector<1x128x32xbf16>
    %156 = vector.shape_cast %155 : vector<1x128x32xbf16> to vector<128x32xbf16>
    %cst_116 = arith.constant dense<0.000000e+00> : vector<2x32xf32>
    %157 = tpu.matmul %154, %156, %cst_116 {dimension_numbers = #tpu.dot_dimension_numbers<[1], [0], [0], [1], [0, 0, 1, 1], [], []>} : vector<2x128xbf16>, vector<128x32xbf16>, vector<2x32xf32> -> vector<2x32xf32>
    %158 = arith.addf %153, %157 : vector<2x32xf32>
    %c44 = arith.constant 44 : index
    %c0_117 = arith.constant 0 : index
    %159 = vector.load %arg12[%c44, %c0_117] : memref<56x128xbf16, #tpu.memory_space<vmem>>, vector<2x128xbf16>
    %c22_118 = arith.constant 22 : index
    %c0_119 = arith.constant 0 : index
    %c0_120 = arith.constant 0 : index
    %160 = vector.load %arg5[%c22_118, %c0_119, %c0_120] : memref<25x128x32xbf16, #tpu.memory_space<vmem>>, vector<1x128x32xbf16>
    %161 = vector.shape_cast %160 : vector<1x128x32xbf16> to vector<128x32xbf16>
    %cst_121 = arith.constant dense<0.000000e+00> : vector<2x32xf32>
    %162 = tpu.matmul %159, %161, %cst_121 {dimension_numbers = #tpu.dot_dimension_numbers<[1], [0], [0], [1], [0, 0, 1, 1], [], []>} : vector<2x128xbf16>, vector<128x32xbf16>, vector<2x32xf32> -> vector<2x32xf32>
    %163 = arith.addf %158, %162 : vector<2x32xf32>
    %c46 = arith.constant 46 : index
    %c0_122 = arith.constant 0 : index
    %164 = vector.load %arg12[%c46, %c0_122] : memref<56x128xbf16, #tpu.memory_space<vmem>>, vector<2x128xbf16>
    %c23 = arith.constant 23 : index
    %c0_123 = arith.constant 0 : index
    %c0_124 = arith.constant 0 : index
    %165 = vector.load %arg5[%c23, %c0_123, %c0_124] : memref<25x128x32xbf16, #tpu.memory_space<vmem>>, vector<1x128x32xbf16>
    %166 = vector.shape_cast %165 : vector<1x128x32xbf16> to vector<128x32xbf16>
    %cst_125 = arith.constant dense<0.000000e+00> : vector<2x32xf32>
    %167 = tpu.matmul %164, %166, %cst_125 {dimension_numbers = #tpu.dot_dimension_numbers<[1], [0], [0], [1], [0, 0, 1, 1], [], []>} : vector<2x128xbf16>, vector<128x32xbf16>, vector<2x32xf32> -> vector<2x32xf32>
    %168 = arith.addf %163, %167 : vector<2x32xf32>
    %c48 = arith.constant 48 : index
    %c0_126 = arith.constant 0 : index
    %169 = vector.load %arg12[%c48, %c0_126] : memref<56x128xbf16, #tpu.memory_space<vmem>>, vector<2x128xbf16>
    %c24_127 = arith.constant 24 : index
    %c0_128 = arith.constant 0 : index
    %c0_129 = arith.constant 0 : index
    %170 = vector.load %arg5[%c24_127, %c0_128, %c0_129] : memref<25x128x32xbf16, #tpu.memory_space<vmem>>, vector<1x128x32xbf16>
    %171 = vector.shape_cast %170 : vector<1x128x32xbf16> to vector<128x32xbf16>
    %cst_130 = arith.constant dense<0.000000e+00> : vector<2x32xf32>
    %172 = tpu.matmul %169, %171, %cst_130 {dimension_numbers = #tpu.dot_dimension_numbers<[1], [0], [0], [1], [0, 0, 1, 1], [], []>} : vector<2x128xbf16>, vector<128x32xbf16>, vector<2x32xf32> -> vector<2x32xf32>
    %173 = arith.addf %168, %172 : vector<2x32xf32>
    %c0_131 = arith.constant 0 : index
    %c0_132 = arith.constant 0 : index
    %174 = vector.load %arg6[%c0_131, %c0_132] : memref<1x32xf32, #tpu.memory_space<vmem>>, vector<1x32xf32>
    %175 = vector.broadcast %174 : vector<1x32xf32> to vector<2x32xf32>
    %176 = arith.addf %173, %175 : vector<2x32xf32>
    %cst_133 = arith.constant 0.000000e+00 : f32
    %177 = vector.broadcast %cst_133 : f32 to vector<2x32xf32>
    %178 = arith.maximumf %176, %177 : vector<2x32xf32>
    %179 = vector.shape_cast %178 : vector<2x32xf32> to vector<1x2x32xf32>
    %cst_134 = arith.constant dense<0.000000e+00> : vector<1xf32>
    %180 = vector.multi_reduction <add>, %179, %cst_134 [1, 2] : vector<1x2x32xf32> to vector<1xf32>
    %181 = vector.shape_cast %180 : vector<1xf32> to vector<1x1x1xf32>
    %182 = vector.extract %181[0, 0, 0] : f32 from vector<1x1x1xf32>
    %183 = vector.broadcast %182 : f32 to vector<1x1xf32>
    %cst_135 = arith.constant 6.400000e+01 : f32
    %184 = vector.broadcast %cst_135 : f32 to vector<1x1xf32>
    %185 = arith.divf %183, %184 : vector<1x1xf32>
    %186 = vector.broadcast %185 : vector<1x1xf32> to vector<2x32xf32>
    %187 = arith.subf %178, %186 : vector<2x32xf32>
    %188 = vector.broadcast %185 : vector<1x1xf32> to vector<2x32xf32>
    %189 = arith.subf %178, %188 : vector<2x32xf32>
    %190 = arith.mulf %187, %189 : vector<2x32xf32>
    %191 = vector.shape_cast %190 : vector<2x32xf32> to vector<1x2x32xf32>
    %cst_136 = arith.constant dense<0.000000e+00> : vector<1xf32>
    %192 = vector.multi_reduction <add>, %191, %cst_136 [1, 2] : vector<1x2x32xf32> to vector<1xf32>
    %193 = vector.shape_cast %192 : vector<1xf32> to vector<1x1x1xf32>
    %194 = vector.extract %193[0, 0, 0] : f32 from vector<1x1x1xf32>
    %195 = vector.broadcast %194 : f32 to vector<1x1xf32>
    %cst_137 = arith.constant 6.400000e+01 : f32
    %196 = vector.broadcast %cst_137 : f32 to vector<1x1xf32>
    %197 = arith.divf %195, %196 : vector<1x1xf32>
    %198 = vector.broadcast %185 : vector<1x1xf32> to vector<2x32xf32>
    %199 = arith.subf %178, %198 : vector<2x32xf32>
    %cst_138 = arith.constant 9.99999974E-6 : f32
    %200 = vector.broadcast %cst_138 : f32 to vector<1x1xf32>
    %201 = arith.addf %197, %200 : vector<1x1xf32>
    %202 = math.rsqrt %201 : vector<1x1xf32>
    %203 = vector.broadcast %202 : vector<1x1xf32> to vector<2x32xf32>
    %204 = arith.mulf %199, %203 : vector<2x32xf32>
    %c0_139 = arith.constant 0 : index
    %c0_140 = arith.constant 0 : index
    %205 = vector.load %arg7[%c0_139, %c0_140] : memref<1x1xf32, #tpu.memory_space<vmem>>, vector<1x1xf32>
    %206 = vector.broadcast %205 : vector<1x1xf32> to vector<2x32xf32>
    %207 = arith.mulf %204, %206 : vector<2x32xf32>
    %c0_141 = arith.constant 0 : index
    %c0_142 = arith.constant 0 : index
    %208 = vector.load %arg8[%c0_141, %c0_142] : memref<1x1xf32, #tpu.memory_space<vmem>>, vector<1x1xf32>
    %209 = vector.broadcast %208 : vector<1x1xf32> to vector<2x32xf32>
    %210 = arith.addf %207, %209 : vector<2x32xf32>
    %211 = arith.truncf %210 : vector<2x32xf32> to vector<2x32xbf16>
    %c0_143 = arith.constant 0 : index
    %c0_144 = arith.constant 0 : index
    %212 = vector.load %arg9[%c0_143, %c0_144] : memref<32x1xbf16, #tpu.memory_space<vmem>>, vector<32x1xbf16>
    %cst_145 = arith.constant dense<0.000000e+00> : vector<2x1xf32>
    %213 = tpu.matmul %211, %212, %cst_145 {dimension_numbers = #tpu.dot_dimension_numbers<[1], [0], [0], [1], [0, 0, 1, 1], [], []>} : vector<2x32xbf16>, vector<32x1xbf16>, vector<2x1xf32> -> vector<2x1xf32>
    %c0_146 = arith.constant 0 : index
    %c0_147 = arith.constant 0 : index
    %214 = vector.load %arg10[%c0_146, %c0_147] : memref<1x1xf32, #tpu.memory_space<vmem>>, vector<1x1xf32>
    %215 = vector.broadcast %214 : vector<1x1xf32> to vector<2x1xf32>
    %216 = arith.addf %213, %215 : vector<2x1xf32>
    %cst_148 = arith.constant 5.000000e-01 : f32
    %217 = vector.broadcast %cst_148 : f32 to vector<2x1xf32>
    %218 = arith.mulf %217, %216 : vector<2x1xf32>
    %219 = math.tanh %218 : vector<2x1xf32>
    %cst_149 = arith.constant 1.000000e+00 : f32
    %220 = vector.broadcast %cst_149 : f32 to vector<2x1xf32>
    %221 = arith.addf %219, %220 : vector<2x1xf32>
    %cst_150 = arith.constant 5.000000e-01 : f32
    %222 = vector.broadcast %cst_150 : f32 to vector<2x1xf32>
    %223 = arith.mulf %222, %221 : vector<2x1xf32>
    %c0_151 = arith.constant 0 : index
    %c0_152 = arith.constant 0 : index
    %224 = vector.load %arg11[%c0_151, %c0_152] : memref<2x1xf32, #tpu.memory_space<vmem>>, vector<2x1xf32>
    tpu.vector_store %arg11[%c0_151, %c0_152], %223 {strides = array<i32>} : memref<2x1xf32, #tpu.memory_space<vmem>>, vector<2x1xf32>,
    return
  }
}

</mosaic_0001>

<bundles_post_ra>
// kernel: _lambda_.2
= control target key start
LH: loop header
LB: loop body
LE: loop exit
PB: predicated region body
PF: predicated region fallthrough
CT: control target
= control target key end

     0   :  { %10 = vsyncpa [#allocation3], 0  ;;  %s999_s0 = inlined_call_operand.vmem [shape: bf16[288,32], index: 0, kind: input, shape index: {}]   ;;  %s1000_s1 = inlined_call_operand.hbm [shape: bf16[32,128], index: 1, kind: input, shape index: {}]   ;;  %s1001_s2 = inlined_call_operand.hbm [shape: f32[1,128], index: 2, kind: input, shape index: {}]   ;;  %s1002_s3 = inlined_call_operand.hbm [shape: f32[1,128], index: 3, kind: input, shape index: {}]   ;;  %s1003_s4 = inlined_call_operand.vmem [shape: f32[1,128], index: 4, kind: input, shape index: {}]   ;;  %s1004_s5 = inlined_call_operand.vmem [shape: bf16[72,128], index: 5, kind: output, shape index: {}]  }
   0x1   :  { %11 = vsyncpa [#allocation5], 0  ;;  %s865_s18 = smov [#allocation4]   ;;  %s866_s20 = smov [#allocation2]  }
   0x2   :  { %s32_s19 = sshll.u32 %s865_s18, 4  ;;  %s19_s21 = sshll.u32 %s866_s20, 4  ;;  %s33_s19 = int_to_ptr.vmem [resolvable:$true] %s32_s19  ;;  %s20_s21 = int_to_ptr.vmem [resolvable:$true] %s19_s21 }
   0x3   :  { %s809_s22 = scalar_lea.vmem %s33_s19, 16  ;;  %s813_s23 = scalar_lea.vmem %s33_s19, 32 }
   0x4   :  { %p810_p0 = scmp.ne.s32.totalorder %s33_s19, %s809_s22  ;;  %p814_p1 = scmp.lt.s32.totalorder %s33_s19, %s33_s19 }
   0x5   :  { %p815_p2 = scmp.lt.s32.totalorder %s813_s23, %s809_s22 }
   0x7   :  { %p816_p3 = por %p815_p2, %p814_p1 }
   0x9   :  { %p817_p4 = pnand %p816_p3, %p810_p0 }
   0xb   :  { %820 = shalt.err (!%p817_p4)
}
   0xc   :  { %35 = dma.hbm_to_vmem [thread:$0]  %s1001_s2, 16, %s33_s19, [#allocation5]  }
   0xd   :  { %s829_s26 = scalar_lea.vmem %s20_s21, 256  ;;  %p834_p6 = scmp.lt.s32.totalorder %s20_s21, %s20_s21 }
   0xe   :  { %p830_p5 = scmp.ne.s32.totalorder %s20_s21, %s829_s26  ;;  %p835_p7 = scmp.lt.s32.totalorder %s829_s26, %s829_s26 }
  0x10   :  { %p836_p8 = por %p835_p7, %p834_p6 }
  0x12   :  { %p837_p9 = pnand %p836_p8, %p830_p5 }
  0x14   :  { %840 = shalt.err (!%p837_p9)
}
  0x15   :  { %s867_s27 = smov 64   ;;  %s868_s28 = smov 4  }
  0x16   :  { %25 = dma.hbm_to_vmem [thread:$0]  %s1000_s1, 256, %s20_s21, [#allocation3], %s867_s27, %s867_s27, %s868_s28  }
  0x17   :  { %s869_s6 = smov [#allocation6]  }
  0x18   :  { %s42_s7 = sshll.u32 %s869_s6, 4  ;;  %s43_s7 = int_to_ptr.vmem [resolvable:$true] %s42_s7 }
  0x19   :  { %s849_s8 = scalar_lea.vmem %s43_s7, 16  ;;  %s853_s9 = scalar_lea.vmem %s43_s7, 32 }
  0x1a   :  { %p850_p10 = scmp.ne.s32.totalorder %s43_s7, %s849_s8  ;;  %p854_p11 = scmp.lt.s32.totalorder %s43_s7, %s43_s7 }
  0x1b   :  { %p855_p12 = scmp.lt.s32.totalorder %s853_s9, %s849_s8 }
  0x1d   :  { %p856_p13 = por %p855_p12, %p854_p11 }
  0x1f   :  { %p857_p0 = pnand %p856_p13, %p850_p10 }
  0x21   :  { %860 = shalt.err (!%p857_p0)
}
  0x22   :  { %45 = dma.hbm_to_vmem [thread:$0]  %s1002_s3, 16, %s43_s7, [#allocation5]  }
  0x23   :  { %861 = dma.done.wait [#allocation3], 256  }
  0x24   :  { %862 = vsyncadd [#allocation3], 4294967040 }
  0x25   :  { %863 = dma.done.wait [#allocation5], 32  }
  0x26   :  { %864 = vsyncadd [#allocation5], 4294967264  ;;  %v779_v0 = vld [vmem:[#allocation2 + $0x8] sm:$0xff]   ;;  %v780_v1 = vld [vmem:[#allocation2] sm:$0xff]   ;;  %vm200_vm0 = vcmask 261120  }
  0x27   :  { %730 = vmatprep.subr.bf16.mxu0 %v779_v0  ;;  %770 = vmatprep.subr.bf16.mxu1 %v779_v0  ;;  %v781_v2 = vld [vmem:[%s999_s0] sm:$0xff]   ;;  %v783_v3 = vld [vmem:[%s999_s0 + $0x50] sm:$0xff]   ;;  %v782_v4 = vld [vmem:[%s999_s0 + $0x8] sm:$0xff]  }
  0x28   :  { %731 = vmatpush3.bf16.msra.mxu0 %v779_v0  ;;  %772 = vmatpush3.bf16.msra.mxu1 %v779_v0  ;;  %v784_v5 = vld [vmem:[%s999_s0 + $0x58] sm:$0xff]   ;;  %v785_v6 = vld [vmem:[%s999_s0 + $0x10] sm:$0xff]   ;;  %v787_v7 = vld [vmem:[%s999_s0 + $0x60] sm:$0xff]  }
  0x29   :  { %732 = vmatprep.subr.bf16.mxu0 %v780_v1  ;;  %771 = vmatprep.subr.bf16.mxu1 %v780_v1  ;;  %v786_v8 = vld [vmem:[%s999_s0 + $0x18] sm:$0xff]   ;;  %v788_v9 = vld [vmem:[%s999_s0 + $0x68] sm:$0xff]   ;;  %v789_v10 = vld [vmem:[%s999_s0 + $0x20] sm:$0xff]  }
  0x2a   :  { %734 = vmatprep.mubr.msk.bf16.mxu0 %vm200_vm0, %v781_v2  ;;  %754 = vmatprep.mubr.msk.bf16.mxu1 %vm200_vm0, %v783_v3  ;;  %v791_v11 = vld [vmem:[%s999_s0 + $0x70] sm:$0xff]   ;;  %v790_v12 = vld [vmem:[%s999_s0 + $0x28] sm:$0xff]   ;;  %v792_v13 = vld [vmem:[%s999_s0 + $0x78] sm:$0xff]  }
  0x2b   :  { %v793_v14 = vld [vmem:[%s999_s0 + $0x30] sm:$0xff]   ;;  %v795_v15 = vld [vmem:[%s999_s0 + $0x80] sm:$0xff]   ;;  %v794_v16 = vld [vmem:[%s999_s0 + $0x38] sm:$0xff]  }
  0x2c   :  { %733 = vmatpush3.bf16.msra.mxu0 %v780_v1  ;;  %773 = vmatpush3.bf16.msra.mxu1 %v780_v1  ;;  %v796_v17 = vld [vmem:[%s999_s0 + $0x88] sm:$0xff]   ;;  %v797_v18 = vld [vmem:[%s999_s0 + $0x40] sm:$0xff]   ;;  %v666_v0 = vld [vmem:[#allocation4] ss:$0 sm:$0xff] }
  0x2d   :  { %v798_v19 = vld [vmem:[%s999_s0 + $0x48] sm:$0xff]  }
  0x2f   :  { %735 = vmatmul.mubr.msk.bf16.vlgmr.msra.gmra.mxu0 %vm200_vm0, %v782_v4  ;;  %755 = vmatmul.mubr.msk.bf16.vlgmr.msra.gmra.mxu1 %vm200_vm0, %v784_v5 }
  0x30   :  { %738 = vmatprep.mubr.msk.bf16.mxu0 %vm200_vm0, %v785_v6  ;;  %758 = vmatprep.mubr.msk.bf16.mxu1 %vm200_vm0, %v787_v7 }
  0x37   :  { %739 = vmatmul.mubr.msk.bf16.gmra.mxu0 %vm200_vm0, %v786_v8  ;;  %759 = vmatmul.mubr.msk.bf16.gmra.mxu1 %vm200_vm0, %v788_v9 }
  0x38   :  { %742 = vmatprep.mubr.msk.bf16.mxu0 %vm200_vm0, %v789_v10  ;;  %762 = vmatprep.mubr.msk.bf16.mxu1 %vm200_vm0, %v791_v11 }
  0x3f   :  { %743 = vmatmul.mubr.msk.bf16.gmra.mxu0 %vm200_vm0, %v790_v12  ;;  %763 = vmatmul.mubr.msk.bf16.gmra.mxu1 %vm200_vm0, %v792_v13 }
  0x40   :  { %746 = vmatprep.mubr.msk.bf16.mxu0 %vm200_vm0, %v793_v14  ;;  %766 = vmatprep.mubr.msk.bf16.mxu1 %vm200_vm0, %v795_v15 }
  0x47   :  { %747 = vmatmul.mubr.msk.bf16.gmra.mxu0 %vm200_vm0, %v794_v16  ;;  %767 = vmatmul.mubr.msk.bf16.gmra.mxu1 %vm200_vm0, %v796_v17 }
  0x48   :  { %750 = vmatprep.mubr.msk.bf16.mxu0 %vm200_vm0, %v797_v18 }
  0x4f   :  { %751 = vmatmul.mubr.msk.bf16.gmra.mxu0 %vm200_vm0, %v798_v19 }
  0xef   :  { %v736_v20 = vpop.f32.mrf.mxu0  ;;  %v756_v21 = vpop.f32.mrf.mxu1 }
  0xf1   :  { %v289_v22 = vpop.f32.mrf.mxu0  ;;  %v369_v23 = vpop.f32.mrf.mxu1 }
  0xf3   :  { %v737_v24 = vpop.f32.mrf.mxu0  ;;  %v757_v25 = vpop.f32.mrf.mxu1 }
  0xf5   :  { %v292_v26 = vpop.f32.mrf.mxu0  ;;  %v372_v27 = vpop.f32.mrf.mxu1 }
  0xf7   :  { %v740_v28 = vpop.f32.mrf.mxu0  ;;  %v760_v29 = vpop.f32.mrf.mxu1 }
  0xf9   :  { %v305_v30 = vpop.f32.mrf.mxu0  ;;  %v385_v31 = vpop.f32.mrf.mxu1 }
  0xfb   :  { %v741_v32 = vpop.f32.mrf.mxu0  ;;  %v761_v33 = vpop.f32.mrf.mxu1 }
  0xfd   :  { %v308_v34 = vpop.f32.mrf.mxu0  ;;  %v388_v35 = vpop.f32.mrf.mxu1 }
  0xff   :  { %v744_v36 = vpop.f32.mrf.mxu0  ;;  %v764_v37 = vpop.f32.mrf.mxu1 }
 0x100   :  { %v433_v59 = vmax.f32 %v292_v26, %v744_v36 }
 0x101   :  { %v321_v38 = vpop.f32.mrf.mxu0  ;;  %v401_v39 = vpop.f32.mrf.mxu1 }
 0x103   :  { %v745_v40 = vpop.f32.mrf.mxu0  ;;  %v765_v42 = vpop.f32.mrf.mxu1 }
 0x104   :  { %v434_v46 = vmax.f32 %v736_v20, %v745_v40 }
 0x105   :  { %v324_v41 = vpop.f32.mrf.mxu0  ;;  %v404_v44 = vpop.f32.mrf.mxu1 }
 0x106   :  { %v432_v50 = vmax.f32 %v289_v22, %v324_v41  ;;  %v443_v52 = vmax.f32 %v434_v46, %v369_v23 }
 0x107   :  { %v748_v43 = vpop.f32.mrf.mxu0  ;;  %v768_v48 = vpop.f32.mrf.mxu1 }
 0x108   :  { %v437_v56 = vmax.f32 %v308_v34, %v748_v43  ;;  %v452_v62 = vmax.f32 %v443_v52, %v404_v44 }
 0x109   :  { %v337_v45 = vpop.f32.mrf.mxu0  ;;  %v417_v57 = vpop.f32.mrf.mxu1 }
 0x10a   :  { %v435_v51 = vmax.f32 %v737_v24, %v337_v45  ;;  %v446_v4 = vmax.f32 %v437_v56, %v757_v25  ;;  %v468_v11 = vadd.f32 %v666_v0, %v452_v62 }
 0x10b   :  { %v749_v47 = vpop.f32.mrf.mxu0  ;;  %v769_v5 = vpop.f32.mrf.mxu1 }
 0x10c   :  { %v444_v60 = vmax.f32 %v435_v51, %v372_v27  ;;  %v438_v1 = vmax.f32 %v740_v28, %v749_v47  ;;  %v455_v16 = vmax.f32 %v446_v4, %v417_v57 }
 0x10d   :  { %v340_v49 = vpop.f32.mrf.mxu0  ;;  %v420_v17 = vpop.f32.mrf.mxu1 }
 0x10e   :  { %v436_v54 = vmax.f32 %v305_v30, %v340_v49  ;;  %v453_v7 = vmax.f32 %v444_v60, %v764_v37  ;;  %v447_v13 = vmax.f32 %v438_v1, %v385_v31  ;;  %v471_v28 = vadd.f32 %v666_v0, %v455_v16 }
 0x10f   :  { %v752_v53 = vpop.f32.mrf.mxu0 }
 0x110   :  { %v441_v55 = vmax.f32 %v432_v50, %v752_v53  ;;  %v445_v2 = vmax.f32 %v436_v54, %v756_v21  ;;  %v469_v18 = vadd.f32 %v666_v0, %v453_v7  ;;  %v477_v21 = vmax.f32 %v468_v11, 0.0 }
 0x111   :  { %v353_v58 = vpop.f32.mrf.mxu0  ;;  %v456_v24 = vmax.f32 %v447_v13, %v420_v17  ;;  %v480_v37 = vmax.f32 %v471_v28, 0.0 }
 0x112   :  { %v450_v61 = vmax.f32 %v441_v55, %v761_v33  ;;  %v439_v9 = vmax.f32 %v741_v32, %v353_v58  ;;  %v454_v12 = vmax.f32 %v445_v2, %v765_v42  ;;  %v478_v27 = vmax.f32 %v469_v18, 0.0 }
 0x113   :  { %v753_v63 = vpop.f32.mrf.mxu0  ;;  %v472_v34 = vadd.f32 %v666_v0, %v456_v24  ;;  %v667_v24 = vld [vmem:[#allocation6] ss:$0 sm:$0xff] }
 0x114   :  { %v442_v3 = vmax.f32 %v433_v59, %v753_v63  ;;  %v466_v8 = vadd.f32 %v666_v0, %v450_v61  ;;  %v448_v20 = vmax.f32 %v439_v9, %v388_v35  ;;  %v470_v23 = vadd.f32 %v666_v0, %v454_v12 }
 0x115   :  { %v356_v6 = vpop.f32.mrf.mxu0  ;;  %v481_v40 = vmax.f32 %v472_v34, 0.0 }
 0x116   :  { %v451_v10 = vmax.f32 %v442_v3, %v401_v39  ;;  %v440_v15 = vmax.f32 %v321_v38, %v356_v6  ;;  %v475_v19 = vmax.f32 %v466_v8, 0.0  ;;  %v457_v30 = vmax.f32 %v448_v20, %v768_v48 }
 0x117   :  { %v479_v33 = vmax.f32 %v470_v23, 0.0 }
 0x118   :  { %v467_v14 = vadd.f32 %v666_v0, %v451_v10  ;;  %v449_v26 = vmax.f32 %v440_v15, %v760_v29  ;;  %v473_v38 = vadd.f32 %v666_v0, %v457_v30 }
 0x11a   :  { %v476_v22 = vmax.f32 %v467_v14, 0.0  ;;  %v458_v36 = vmax.f32 %v449_v26, %v769_v5  ;;  %v482_v42 = vmax.f32 %v473_v38, 0.0 }
 0x11c   :  { %v484_v25 = vadd.f32 %v476_v22, %v475_v19  ;;  %v474_v41 = vadd.f32 %v666_v0, %v458_v36 }
 0x11e   :  { %v485_v32 = vadd.f32 %v484_v25, %v477_v21  ;;  %v483_v44 = vmax.f32 %v474_v41, 0.0 }
 0x120   :  { %v486_v31 = vadd.f32 %v485_v32, %v478_v27 }
 0x122   :  { %v487_v39 = vadd.f32 %v486_v31, %v479_v33  ;;  %v668_v31 = vld [vmem:[%s1003_s4] ss:$0 sm:$0xff] }
 0x124   :  { %v488_v35 = vadd.f32 %v487_v39, %v480_v37 }
 0x126   :  { %v489_v43 = vadd.f32 %v488_v35, %v481_v40 }
 0x128   :  { %v490_v45 = vadd.f32 %v489_v43, %v482_v42 }
 0x12a   :  { %v491_v46 = vadd.f32 %v490_v45, %v483_v44 }
 0x12c   :  { %v492_v29 = vrot.slane %v491_v46, 4 }
 0x12e   :  { %v493_v47 = vadd.f32 %v492_v29, %v491_v46 }
 0x130   :  { %v494_v49 = vrot.slane %v493_v47, 2 }
 0x132   :  { %v495_v48 = vadd.f32 %v494_v49, %v493_v47 }
 0x134   :  { %v496_v50 = vrot.slane %v495_v48, 1 }
 0x136   :  { %v497_v51 = vadd.f32 %v496_v50, %v495_v48 }
 0x138   :  { %v499_v52 = vmul.f32 0.013888889, %v497_v51 }
 0x13a   :  { %v500_v53 = vsub.f32 %v475_v19, %v499_v52  ;;  %v501_v54 = vsub.f32 %v476_v22, %v499_v52  ;;  %v502_v55 = vsub.f32 %v477_v21, %v499_v52  ;;  %v503_v56 = vsub.f32 %v478_v27, %v499_v52 }
 0x13b   :  { %v504_v59 = vsub.f32 %v479_v33, %v499_v52  ;;  %v505_v62 = vsub.f32 %v480_v37, %v499_v52  ;;  %v506_v1 = vsub.f32 %v481_v40, %v499_v52  ;;  %v507_v4 = vsub.f32 %v482_v42, %v499_v52 }
 0x13c   :  { %v509_v57 = vmul.f32 %v500_v53, %v500_v53  ;;  %v510_v58 = vmul.f32 %v501_v54, %v501_v54  ;;  %v511_v60 = vmul.f32 %v502_v55, %v502_v55  ;;  %v512_v63 = vmul.f32 %v503_v56, %v503_v56 }
 0x13d   :  { %v513_v2 = vmul.f32 %v504_v59, %v504_v59  ;;  %v514_v5 = vmul.f32 %v505_v62, %v505_v62  ;;  %v508_v7 = vsub.f32 %v483_v44, %v499_v52  ;;  %v515_v8 = vmul.f32 %v506_v1, %v506_v1 }
 0x13e   :  { %v518_v61 = vadd.f32 %v510_v58, %v509_v57  ;;  %v516_v10 = vmul.f32 %v507_v4, %v507_v4 }
 0x13f   :  { %v517_v12 = vmul.f32 %v508_v7, %v508_v7 }
 0x140   :  { %v519_v0 = vadd.f32 %v518_v61, %v511_v60 }
 0x142   :  { %v520_v3 = vadd.f32 %v519_v0, %v512_v63 }
 0x144   :  { %v521_v6 = vadd.f32 %v520_v3, %v513_v2 }
 0x146   :  { %v522_v9 = vadd.f32 %v521_v6, %v514_v5 }
 0x148   :  { %v523_v11 = vadd.f32 %v522_v9, %v515_v8 }
 0x14a   :  { %v524_v13 = vadd.f32 %v523_v11, %v516_v10 }
 0x14c   :  { %v525_v14 = vadd.f32 %v524_v13, %v517_v12 }
 0x14e   :  { %v526_v15 = vrot.slane %v525_v14, 4 }
 0x150   :  { %v527_v16 = vadd.f32 %v526_v15, %v525_v14 }
 0x152   :  { %v528_v17 = vrot.slane %v527_v16, 2 }
 0x154   :  { %v529_v18 = vadd.f32 %v528_v17, %v527_v16 }
 0x156   :  { %v530_v19 = vrot.slane %v529_v18, 1 }
 0x158   :  { %v531_v20 = vadd.f32 %v530_v19, %v529_v18 }
 0x15a   :  { %v532_v22 = vmul.f32 0.013888889, %v531_v20 }
 0x15c   :  { %v533_v21 = vadd.f32 1e-05, %v532_v22 }
 0x15e   :  { %799 = vrsqrt.f32 %v533_v21 }
 0x16b   :  { %v800_v23 = vpop.eup %799 }
 0x16c   :  { %v535_v25 = vmul.f32 %v800_v23, %v500_v53  ;;  %v536_v26 = vmul.f32 %v800_v23, %v501_v54  ;;  %v537_v27 = vmul.f32 %v800_v23, %v502_v55  ;;  %v538_v28 = vmul.f32 %v800_v23, %v503_v56 }
 0x16d   :  { %v539_v30 = vmul.f32 %v800_v23, %v504_v59  ;;  %v540_v32 = vmul.f32 %v800_v23, %v505_v62  ;;  %v541_v33 = vmul.f32 %v800_v23, %v506_v1  ;;  %v542_v34 = vmul.f32 %v800_v23, %v507_v4 }
 0x16e   :  { %v543_v36 = vmul.f32 %v800_v23, %v508_v7  ;;  %v551_v37 = vmul.f32 %v667_v24, %v535_v25  ;;  %v552_v38 = vmul.f32 %v667_v24, %v536_v26  ;;  %v553_v39 = vmul.f32 %v667_v24, %v537_v27 }
 0x16f   :  { %v554_v40 = vmul.f32 %v667_v24, %v538_v28  ;;  %v555_v41 = vmul.f32 %v667_v24, %v539_v30  ;;  %v556_v35 = vmul.f32 %v667_v24, %v540_v32  ;;  %v557_v42 = vmul.f32 %v667_v24, %v541_v33 }
 0x170   :  { %v558_v43 = vmul.f32 %v667_v24, %v542_v34  ;;  %v559_v44 = vmul.f32 %v667_v24, %v543_v36  ;;  %v567_v45 = vadd.f32 %v668_v31, %v551_v37  ;;  %v568_v46 = vadd.f32 %v668_v31, %v552_v38 }
 0x171   :  { %v569_v29 = vadd.f32 %v668_v31, %v553_v39  ;;  %v570_v47 = vadd.f32 %v668_v31, %v554_v40  ;;  %v571_v49 = vadd.f32 %v668_v31, %v555_v41  ;;  %v572_v48 = vadd.f32 %v668_v31, %v556_v35 }
 0x172   :  { %v573_v50 = vadd.f32 %v668_v31, %v557_v42  ;;  %v574_v51 = vadd.f32 %v668_v31, %v558_v43  ;;  %v575_v52 = vadd.f32 %v668_v31, %v559_v44  ;;  %v690_v53 = vpack.c.bf16 %v568_v46, %v567_v45 }
 0x173   :  { %v695_v54 = vpack.c.bf16 %v570_v47, %v569_v29  ;;  %v700_v55 = vpack.c.bf16 %v572_v48, %v571_v49 }
 0x174   :  { %v686_v56 = vpack.c.bf16 %v575_v52, %v575_v52  ;;  %691 = vst [vmem:[%s1004_s5] sm:$0xff] %v690_v53   ;;  %v705_v57 = vpack.c.bf16 %v574_v51, %v573_v50 }
 0x175   :  { %707 = vst [vmem:[%s1004_s5 + $0x8] sm:$0xff] %v695_v54   ;;  %708 = vst [vmem:[%s1004_s5 + $0x10] sm:$0xff] %v700_v55  }
 0x176   :  { %709 = vst [vmem:[%s1004_s5 + $0x18] sm:$0xff] %v705_v57   ;;  %621 = vst [vmem:[%s1004_s5 + $0x20] sm:$0xf] %v686_v56 }
 0x177   :  { %626 = vsyncpa [#allocation3], 1 }
 0x178   :  { %627 = vsyncpa [#allocation5], 1 }

// kernel: _lambda_.3
= control target key start
LH: loop header
LB: loop body
LE: loop exit
PB: predicated region body
PF: predicated region fallthrough
CT: control target
= control target key end

     0   :  { %vm7764_vm0 = vmmov 0   ;;  %vm5099_vm2 = vcmask 254976   ;;  %vm5176_vm3 = vcmask 261120   ;;  %vm5224_vm4 = vcmask 1024   ;;  %s9625_s1 = inlined_call_operand.vmem [shape: bf16[1152,128], index: 1, kind: input, shape index: {}]   ;;  %s9626_s0 = inlined_call_operand.vmem [shape: bf16[224,1152], index: 0, kind: input, shape index: {}]   ;;  %s9627_s5 = inlined_call_operand.vmem [shape: bf16[25,128,32], index: 5, kind: input, shape index: {}]   ;;  %s9628_s2 = inlined_call_operand.vmem [shape: f32[1,128], index: 2, kind: input, shape index: {}]   ;;  %s9629_s3 = inlined_call_operand.vmem [shape: f32[1,128], index: 3, kind: input, shape index: {}]   ;;  %s9630_s4 = inlined_call_operand.vmem [shape: f32[1,128], index: 4, kind: input, shape index: {}]   ;;  %s9631_s6 = inlined_call_operand.vmem [shape: f32[1,32], index: 6, kind: input, shape index: {}]   ;;  %s9632_s7 = inlined_call_operand.<no memory space> [shape: f32[1,1], index: 7, kind: input, shape index: {}]   ;;  %s9633_s8 = inlined_call_operand.<no memory space> [shape: f32[1,1], index: 8, kind: input, shape index: {}]   ;;  %s9634_s9 = inlined_call_operand.vmem [shape: bf16[32,1], index: 9, kind: input, shape index: {}]   ;;  %s9635_s10 = inlined_call_operand.<no memory space> [shape: f32[1,1], index: 10, kind: input, shape index: {}]   ;;  %s9636_s11 = inlined_call_operand.vmem [shape: f32[2,1], index: 11, kind: output, shape index: {}]  }
   0x1   :  { %v7283_v0 = vld [vmem:[%s9625_s1 + $0x78] sm:$0xff]   ;;  %v7287_v4 = vld [vmem:[%s9625_s1 + $0x70] sm:$0xff]   ;;  %v7291_v8 = vld [vmem:[%s9625_s1 + $0x68] sm:$0xff]  }
   0x2   :  { %v7284_v1 = vld [vmem:[%s9625_s1 + $0xf8] sm:$0xff]   ;;  %6072 = vmatprep.subr.bf16.mxu0 %v7283_v0  ;;  %v7288_v5 = vld [vmem:[%s9625_s1 + $0xf0] sm:$0xff]   ;;  %v7292_v9 = vld [vmem:[%s9625_s1 + $0xe8] sm:$0xff]  }
   0x3   :  { %v7285_v2 = vld [vmem:[%s9625_s1 + $0x38] sm:$0xff]   ;;  %6172 = vmatprep.subr.bf16.mxu1 %v7284_v1  ;;  %v7289_v6 = vld [vmem:[%s9625_s1 + $0x30] sm:$0xff]   ;;  %v7293_v10 = vld [vmem:[%s9625_s1 + $0x28] sm:$0xff]  }
   0x4   :  { %v7286_v3 = vld [vmem:[%s9625_s1 + $0xb8] sm:$0xff]   ;;  %6073 = vmatpush3.bf16.msra.mxu0 %v7285_v2  ;;  %v7290_v7 = vld [vmem:[%s9625_s1 + $0xb0] sm:$0xff]   ;;  %v7294_v11 = vld [vmem:[%s9625_s1 + $0xa8] sm:$0xff]  }
   0x5   :  { %6173 = vmatpush3.bf16.msra.mxu1 %v7286_v3  ;;  %6074 = vmatprep.subr.bf16.mxu0 %v7287_v4  ;;  %v7295_v12 = vld [vmem:[%s9625_s1 + $0x60] sm:$0xff]   ;;  %v7299_v16 = vld [vmem:[%s9625_s1 + $0x58] sm:$0xff]   ;;  %v7303_v20 = vld [vmem:[%s9625_s1 + $0x50] sm:$0xff]  }
   0x6   :  { %6174 = vmatprep.subr.bf16.mxu1 %v7288_v5  ;;  %v7296_v13 = vld [vmem:[%s9625_s1 + $0xe0] sm:$0xff]   ;;  %v7300_v17 = vld [vmem:[%s9625_s1 + $0xd8] sm:$0xff]   ;;  %v7304_v21 = vld [vmem:[%s9625_s1 + $0xd0] sm:$0xff]  }
   0x7   :  { %v7297_v14 = vld [vmem:[%s9625_s1 + $0x20] sm:$0xff]   ;;  %v7301_v18 = vld [vmem:[%s9625_s1 + $0x18] sm:$0xff]   ;;  %v7305_v22 = vld [vmem:[%s9625_s1 + $0x10] sm:$0xff]  }
   0x8   :  { %6075 = vmatpush3.bf16.msra.mxu0 %v7289_v6  ;;  %v7298_v15 = vld [vmem:[%s9625_s1 + $0xa0] sm:$0xff]   ;;  %v7302_v19 = vld [vmem:[%s9625_s1 + $0x98] sm:$0xff]   ;;  %v7306_v23 = vld [vmem:[%s9625_s1 + $0x90] sm:$0xff]  }
   0x9   :  { %6175 = vmatpush3.bf16.msra.mxu1 %v7290_v7  ;;  %6076 = vmatprep.subr.bf16.mxu0 %v7291_v8  ;;  %v7307_v24 = vld [vmem:[%s9625_s1 + $0x48] sm:$0xff]   ;;  %v7311_v28 = vld [vmem:[%s9625_s1 + $0x40] sm:$0xff]   ;;  %v7321_v36 = vld [vmem:[%s9625_s1 + $0x178] sm:$0xff]  }
   0xa   :  { %6176 = vmatprep.subr.bf16.mxu1 %v7292_v9  ;;  %v7308_v25 = vld [vmem:[%s9625_s1 + $0xc8] sm:$0xff]   ;;  %v7312_v29 = vld [vmem:[%s9625_s1 + $0xc0] sm:$0xff]   ;;  %v7322_v37 = vld [vmem:[%s9625_s1 + $0x138] sm:$0xff]  }
   0xb   :  { %v7309_v26 = vld [vmem:[%s9625_s1 + $0x8] sm:$0xff]   ;;  %v7313_v30 = vld [vmem:[%s9625_s1] sm:$0xff]   ;;  %v7325_v39 = vld [vmem:[%s9626_s0 + $0x54] ss:$36 sps:$4 sm:$0xff]  }
   0xc   :  { %6077 = vmatpush3.bf16.msra.mxu0 %v7293_v10  ;;  %v7310_v27 = vld [vmem:[%s9625_s1 + $0x88] sm:$0xff]   ;;  %v7314_v31 = vld [vmem:[%s9625_s1 + $0x80] sm:$0xff]   ;;  %v7328_v41 = vld [vmem:[%s9626_s0 + $0x50] ss:$36 sps:$4 sm:$0xff]  }
   0xd   :  { %6177 = vmatpush3.bf16.msra.mxu1 %v7294_v11  ;;  %6078 = vmatprep.subr.bf16.mxu0 %v7295_v12  ;;  %v7315_v32 = vld [vmem:[%s9626_s0] ss:$36 sps:$4 sm:$0xff]   ;;  %v7318_v34 = vld [vmem:[%s9626_s0 + $0x8] ss:$36 sps:$4 sm:$0xff]   ;;  %v7329_v42 = vld [vmem:[%s9625_s1 + $0x170] sm:$0xff]  }
   0xe   :  { %6178 = vmatprep.subr.bf16.mxu1 %v7296_v13  ;;  %v7317_v33 = vld [vmem:[%s9626_s0 + $0x4] ss:$36 sps:$4 sm:$0xff]   ;;  %v7320_v35 = vld [vmem:[%s9626_s0 + $0xc] ss:$36 sps:$4 sm:$0xff]   ;;  %v7330_v43 = vld [vmem:[%s9626_s0 + $0x94] ss:$36 sps:$4 sm:$0xff]  }
   0xf   :  { %1437 = vmatprep.mubr.bf16.mxu0 %v7317_v33  ;;  %1582 = vmatprep.mubr.bf16.mxu1 %v7320_v35  ;;  %v7323_v38 = vld [vmem:[%s9626_s0 + $0x4c] ss:$36 sps:$4 sm:$0xff]   ;;  %v7332_v44 = vld [vmem:[%s9626_s0 + $0x9c] ss:$36 sps:$4 sm:$0xff]   ;;  %v7339_v51 = vld [vmem:[%s9626_s0 + $0xe4] ss:$36 sps:$4 sm:$0xff]  }
  0x10   :  { %6079 = vmatpush3.bf16.msra.mxu0 %v7297_v14  ;;  %v7327_v40 = vld [vmem:[%s9626_s0 + $0x48] ss:$36 sps:$4 sm:$0xff]   ;;  %v7334_v45 = vld [vmem:[%s9625_s1 + $0x130] sm:$0xff]   ;;  %v7336_v47 = vld [vmem:[%s9626_s0 + $0x98] ss:$36 sps:$4 sm:$0xff]  }
  0x11   :  { %6179 = vmatpush3.bf16.msra.mxu1 %v7298_v15  ;;  %6080 = vmatprep.subr.bf16.mxu0 %v7299_v16  ;;  %v7335_v46 = vld [vmem:[%s9626_s0 + $0x90] ss:$36 sps:$4 sm:$0xff]   ;;  %v7343_v48 = vld [vmem:[%s9625_s1 + $0x168] sm:$0xff]   ;;  %v7337_v50 = vld [vmem:[%s9626_s0 + $0xdc] ss:$36 sps:$4 sm:$0xff]  }
  0x12   :  { %6180 = vmatprep.subr.bf16.mxu1 %v7300_v17  ;;  %v7344_v49 = vld [vmem:[%s9625_s1 + $0x128] sm:$0xff]   ;;  %v7341_v52 = vld [vmem:[%s9626_s0 + $0xd8] ss:$36 sps:$4 sm:$0xff]   ;;  %v7357_v53 = vld [vmem:[%s9625_s1 + $0x160] sm:$0xff]  }
  0x13   :  { %v7358_v54 = vld [vmem:[%s9625_s1 + $0x120] sm:$0xff]   ;;  %v7347_v57 = vld [vmem:[%s9626_s0 + $0x12c] ss:$36 sps:$4 sm:$0xff]   ;;  %v7365_v58 = vld [vmem:[%s9625_s1 + $0x1f8] sm:$0xff]  }
  0x14   :  { %6081 = vmatpush3.bf16.msra.mxu0 %v7301_v18  ;;  %v7342_v55 = vld [vmem:[%s9626_s0 + $0xe0] ss:$36 sps:$4 sm:$0xff]   ;;  %v7370_v60 = vld [vmem:[%s9625_s1 + $0x1b8] sm:$0xff]   ;;  %v7350_v61 = vld [vmem:[%s9626_s0 + $0x128] ss:$36 sps:$4 sm:$0xff]  }
  0x15   :  { %6181 = vmatpush3.bf16.msra.mxu1 %v7302_v19  ;;  %6082 = vmatprep.subr.bf16.mxu0 %v7303_v20  ;;  %v7345_v56 = vld [vmem:[%s9626_s0 + $0x124] ss:$36 sps:$4 sm:$0xff]   ;;  %v7351_v62 = vld [vmem:[%s9626_s0 + $0x16c] ss:$36 sps:$4 sm:$0xff]   ;;  %v7373_v63 = vld [vmem:[%s9625_s1 + $0x158] sm:$0xff]  }
  0x16   :  { %6182 = vmatprep.subr.bf16.mxu1 %v7304_v21  ;;  %v7349_v59 = vld [vmem:[%s9626_s0 + $0x120] ss:$36 sps:$4 sm:$0xff]   ;;  %v7374_v0 = vld [vmem:[%s9625_s1 + $0x118] sm:$0xff]   ;;  %v7381_v2 = vld [vmem:[%s9625_s1 + $0x1f0] sm:$0xff]  }
  0x17   :  { %v7353_v1 = vld [vmem:[%s9626_s0 + $0x174] ss:$36 sps:$4 sm:$0xff]   ;;  %v7355_v4 = vld [vmem:[%s9626_s0 + $0x168] ss:$36 sps:$4 sm:$0xff]   ;;  %v7361_v9 = vld [vmem:[%s9626_s0 + $0x1bc] ss:$36 sps:$4 sm:$0xff]  }
  0x18   :  { %6083 = vmatpush3.bf16.msra.mxu0 %v7305_v22  ;;  %v7382_v3 = vld [vmem:[%s9625_s1 + $0x1b0] sm:$0xff]   ;;  %v7397_v11 = vld [vmem:[%s9625_s1 + $0x1e8] sm:$0xff]   ;;  %v7364_v12 = vld [vmem:[%s9626_s0 + $0x1b8] ss:$36 sps:$4 sm:$0xff]  }
  0x19   :  { %6183 = vmatpush3.bf16.msra.mxu1 %v7306_v23  ;;  %6084 = vmatprep.subr.bf16.mxu0 %v7307_v24  ;;  %v7383_v5 = vld [vmem:[%s9625_s1 + $0x150] sm:$0xff]   ;;  %v7366_v13 = vld [vmem:[%s9626_s0 + $0x1fc] ss:$36 sps:$4 sm:$0xff]   ;;  %v7398_v14 = vld [vmem:[%s9625_s1 + $0x1a8] sm:$0xff]  }
  0x1a   :  { %6184 = vmatprep.subr.bf16.mxu1 %v7308_v25  ;;  %v7356_v6 = vld [vmem:[%s9626_s0 + $0x170] ss:$36 sps:$4 sm:$0xff]   ;;  %v7399_v15 = vld [vmem:[%s9625_s1 + $0x148] sm:$0xff]   ;;  %v7407_v18 = vld [vmem:[%s9625_s1 + $0x1e0] sm:$0xff]  }
  0x1b   :  { %v7359_v7 = vld [vmem:[%s9626_s0 + $0x1b4] ss:$36 sps:$4 sm:$0xff]   ;;  %v7400_v16 = vld [vmem:[%s9625_s1 + $0x108] sm:$0xff]   ;;  %v7372_v20 = vld [vmem:[%s9626_s0 + $0x200] ss:$36 sps:$4 sm:$0xff]  }
  0x1c   :  { %6085 = vmatpush3.bf16.msra.mxu0 %v7309_v26  ;;  %v7388_v8 = vld [vmem:[%s9625_s1 + $0x110] sm:$0xff]   ;;  %v7368_v17 = vld [vmem:[%s9626_s0 + $0x204] ss:$36 sps:$4 sm:$0xff]   ;;  %v7371_v19 = vld [vmem:[%s9626_s0 + $0x1f8] ss:$36 sps:$4 sm:$0xff]  }
  0x1d   :  { %6185 = vmatpush3.bf16.msra.mxu1 %v7310_v27  ;;  %6086 = vmatprep.subr.bf16.mxu0 %v7311_v28  ;;  %v7363_v10 = vld [vmem:[%s9626_s0 + $0x1b0] ss:$36 sps:$4 sm:$0xff]   ;;  %v7412_v21 = vld [vmem:[%s9625_s1 + $0x1a0] sm:$0xff]   ;;  %v7416_v25 = vld [vmem:[%s9625_s1 + $0x1d8] sm:$0xff]  }
  0x1e   :  { %6186 = vmatprep.subr.bf16.mxu1 %v7312_v29  ;;  %v7375_v22 = vld [vmem:[%s9626_s0 + $0x244] ss:$36 sps:$4 sm:$0xff]   ;;  %v7377_v23 = vld [vmem:[%s9626_s0 + $0x24c] ss:$36 sps:$4 sm:$0xff]   ;;  %v7418_v27 = vld [vmem:[%s9625_s1 + $0x198] sm:$0xff]  }
  0x1f   :  { %v7415_v24 = vld [vmem:[%s9625_s1 + $0x140] sm:$0xff]   ;;  %v7419_v28 = vld [vmem:[%s9625_s1 + $0x1d0] sm:$0xff]   ;;  %v7428_v35 = vld [vmem:[%s9625_s1 + $0x188] sm:$0xff]  }
  0x20   :  { %6087 = vmatpush3.bf16.msra.mxu0 %v7313_v30  ;;  %v7417_v26 = vld [vmem:[%s9625_s1 + $0x100] sm:$0xff]   ;;  %v7380_v30 = vld [vmem:[%s9626_s0 + $0x248] ss:$36 sps:$4 sm:$0xff]   ;;  %v7386_v33 = vld [vmem:[%s9626_s0 + $0x294] ss:$36 sps:$4 sm:$0xff]  }
  0x21   :  { %6187 = vmatpush3.bf16.msra.mxu1 %v7314_v31  ;;  %6272 = vmatprep.subr.bf16.mxu0 %v7321_v36  ;;  %v7379_v29 = vld [vmem:[%s9626_s0 + $0x240] ss:$36 sps:$4 sm:$0xff]   ;;  %v7384_v31 = vld [vmem:[%s9626_s0 + $0x28c] ss:$36 sps:$4 sm:$0xff]  }
  0x22   :  { %6372 = vmatprep.subr.bf16.mxu1 %v7365_v58  ;;  %v7429_v36 = vld [vmem:[%s9625_s1 + $0x1c0] sm:$0xff]  }
  0x23   :  { %1438 = vmatmul.mubr.bf16.vlgmr.msra.gmra.mxu0 %v7315_v32  ;;  %v7424_v32 = vld [vmem:[%s9625_s1 + $0x190] sm:$0xff]   ;;  %v7437_v58 = vld [vmem:[%s9626_s0 + $0x1c] ss:$36 sps:$4 sm:$0xff]  }
  0x24   :  { %1583 = vmatmul.mubr.bf16.vlgmr.msra.gmra.mxu1 %v7318_v34  ;;  %6273 = vmatpush3.bf16.msra.mxu0 %v7322_v37  ;;  %v7427_v34 = vld [vmem:[%s9625_s1 + $0x1c8] sm:$0xff]   ;;  %v7433_v37 = vld [vmem:[%s9625_s1 + $0x180] sm:$0xff]  }
  0x25   :  { %1445 = vmatprep.mubr.bf16.mxu0 %v7323_v38  ;;  %1590 = vmatprep.mubr.bf16.mxu1 %v7325_v39  ;;  %v7434_v38 = vld [vmem:[%s9625_s1 + $0x238] sm:$0xff]   ;;  %v7389_v39 = vld [vmem:[%s9626_s0 + $0x288] ss:$36 sps:$4 sm:$0xff]  }
  0x26   :  { %6274 = vmatprep.subr.bf16.mxu0 %v7329_v42  ;;  %6373 = vmatpush3.bf16.msra.mxu1 %v7370_v60  ;;  %v7393_v42 = vld [vmem:[%s9626_s0 + $0x2dc] ss:$36 sps:$4 sm:$0xff]  }
  0x27   :  { %6374 = vmatprep.subr.bf16.mxu1 %v7381_v2  ;;  %v7435_v60 = vld [vmem:[%s9626_s0 + $0x18] ss:$36 sps:$4 sm:$0xff]   ;;  %v7443_v2 = vld [vmem:[%s9626_s0 + $0x60] ss:$36 sps:$4 sm:$0xff]  }
  0x28   :  { %6275 = vmatpush3.bf16.msra.mxu0 %v7334_v45  ;;  %v7401_v45 = vld [vmem:[%s9626_s0 + $0x31c] ss:$36 sps:$4 sm:$0xff]  }
  0x29   :  { %6276 = vmatprep.subr.bf16.mxu0 %v7343_v48  ;;  %v7406_v48 = vld [vmem:[%s9626_s0 + $0x320] ss:$36 sps:$4 sm:$0xff]  }
  0x2a   :  { %6375 = vmatpush3.bf16.msra.mxu1 %v7382_v3  ;;  %v7445_v3 = vld [vmem:[%s9626_s0 + $0xa4] ss:$36 sps:$4 sm:$0xff]  }
  0x2b   :  { %1446 = vmatmul.mubr.bf16.gmra.mxu0 %v7327_v40  ;;  %6376 = vmatprep.subr.bf16.mxu1 %v7397_v11  ;;  %v7390_v40 = vld [vmem:[%s9626_s0 + $0x290] ss:$36 sps:$4 sm:$0xff]  }
  0x2c   :  { %1591 = vmatmul.mubr.bf16.gmra.mxu1 %v7328_v41  ;;  %1453 = vmatprep.mubr.bf16.mxu0 %v7330_v43  ;;  %v7391_v41 = vld [vmem:[%s9626_s0 + $0x2d4] ss:$36 sps:$4 sm:$0xff]  }
  0x2d   :  { %1598 = vmatprep.mubr.bf16.mxu1 %v7332_v44  ;;  %6277 = vmatpush3.bf16.msra.mxu0 %v7344_v49  ;;  %v7395_v43 = vld [vmem:[%s9626_s0 + $0x2d0] ss:$36 sps:$4 sm:$0xff]   ;;  %v7396_v44 = vld [vmem:[%s9626_s0 + $0x2d8] ss:$36 sps:$4 sm:$0xff]   ;;  %v7408_v49 = vld [vmem:[%s9626_s0 + $0x364] ss:$36 sps:$4 sm:$0xff]  }
  0x2e   :  { %6278 = vmatprep.subr.bf16.mxu0 %v7357_v53  ;;  %6377 = vmatpush3.bf16.msra.mxu1 %v7398_v14  ;;  %v7420_v53 = vld [vmem:[%s9626_s0 + $0x3ac] ss:$36 sps:$4 sm:$0xff]  }
  0x2f   :  { %6378 = vmatprep.subr.bf16.mxu1 %v7407_v18  ;;  %v7490_v11 = vld [vmem:[%s9625_s1 + $0x210] sm:$0xff]  }
  0x30   :  { %v7456_v14 = vld [vmem:[%s9626_s0 + $0xf0] ss:$36 sps:$4 sm:$0xff]  }
  0x31   :  { %6279 = vmatpush3.bf16.msra.mxu0 %v7358_v54  ;;  %v7422_v54 = vld [vmem:[%s9626_s0 + $0x3b4] ss:$36 sps:$4 sm:$0xff]  }
  0x32   :  { %6280 = vmatprep.subr.bf16.mxu0 %v7373_v63  ;;  %6379 = vmatpush3.bf16.msra.mxu1 %v7412_v21  ;;  %v7444_v63 = vld [vmem:[%s9625_s1 + $0x230] sm:$0xff]   ;;  %v7467_v21 = vld [vmem:[%s9626_s0 + $0x184] ss:$36 sps:$4 sm:$0xff]  }
  0x33   :  { %1454 = vmatmul.mubr.bf16.gmra.mxu0 %v7335_v46  ;;  %6380 = vmatprep.subr.bf16.mxu1 %v7416_v25  ;;  %v7403_v46 = vld [vmem:[%s9626_s0 + $0x324] ss:$36 sps:$4 sm:$0xff]   ;;  %v7460_v18 = vld [vmem:[%s9626_s0 + $0x130] ss:$36 sps:$4 sm:$0xff]  }
  0x34   :  { %1599 = vmatmul.mubr.bf16.gmra.mxu1 %v7336_v47  ;;  %1461 = vmatprep.mubr.bf16.mxu0 %v7337_v50  ;;  %v7405_v47 = vld [vmem:[%s9626_s0 + $0x318] ss:$36 sps:$4 sm:$0xff]   ;;  %v7410_v50 = vld [vmem:[%s9626_s0 + $0x36c] ss:$36 sps:$4 sm:$0xff]  }
  0x35   :  { %1606 = vmatprep.mubr.bf16.mxu1 %v7339_v51  ;;  %6281 = vmatpush3.bf16.msra.mxu0 %v7374_v0  ;;  %v7413_v51 = vld [vmem:[%s9626_s0 + $0x360] ss:$36 sps:$4 sm:$0xff]   ;;  %v7440_v0 = vld [vmem:[%s9626_s0 + $0x58] ss:$36 sps:$4 sm:$0xff]   ;;  %v7474_v25 = vld [vmem:[%s9626_s0 + $0x1cc] ss:$36 sps:$4 sm:$0xff]  }
  0x36   :  { %6282 = vmatprep.subr.bf16.mxu0 %v7383_v5  ;;  %6381 = vmatpush3.bf16.msra.mxu1 %v7418_v27  ;;  %v7470_v5 = vld [vmem:[%s9625_s1 + $0x220] sm:$0xff]   ;;  %v7476_v27 = vld [vmem:[%s9626_s0 + $0x1c8] ss:$36 sps:$4 sm:$0xff]  }
  0x37   :  { %6382 = vmatprep.subr.bf16.mxu1 %v7419_v28  ;;  %v7477_v28 = vld [vmem:[%s9626_s0 + $0x20c] ss:$36 sps:$4 sm:$0xff]  }
  0x39   :  { %6283 = vmatpush3.bf16.msra.mxu0 %v7388_v8  ;;  %v7450_v8 = vld [vmem:[%s9626_s0 + $0xa8] ss:$36 sps:$4 sm:$0xff]  }
  0x3a   :  { %6284 = vmatprep.subr.bf16.mxu0 %v7399_v15  ;;  %6383 = vmatpush3.bf16.msra.mxu1 %v7424_v32  ;;  %v7458_v15 = vld [vmem:[%s9626_s0 + $0x134] ss:$36 sps:$4 sm:$0xff]  }
  0x3b   :  { %1462 = vmatmul.mubr.bf16.gmra.mxu0 %v7341_v52  ;;  %6384 = vmatprep.subr.bf16.mxu1 %v7427_v34  ;;  %v7414_v52 = vld [vmem:[%s9626_s0 + $0x368] ss:$36 sps:$4 sm:$0xff]   ;;  %v7484_v32 = vld [vmem:[%s9626_s0 + $0x254] ss:$36 sps:$4 sm:$0xff]  }
  0x3c   :  { %1607 = vmatmul.mubr.bf16.gmra.mxu1 %v7342_v55  ;;  %1469 = vmatprep.mubr.bf16.mxu0 %v7345_v56  ;;  %v7425_v55 = vld [vmem:[%s9626_s0 + $0x3a8] ss:$36 sps:$4 sm:$0xff]   ;;  %v7426_v56 = vld [vmem:[%s9626_s0 + $0x3b0] ss:$36 sps:$4 sm:$0xff]  }
  0x3d   :  { %1614 = vmatprep.mubr.bf16.mxu1 %v7347_v57  ;;  %6285 = vmatpush3.bf16.msra.mxu0 %v7400_v16  ;;  %v7432_v57 = vld [vmem:[%s9626_s0 + $0x14] ss:$36 sps:$4 sm:$0xff]   ;;  %v7461_v16 = vld [vmem:[%s9626_s0 + $0x13c] ss:$36 sps:$4 sm:$0xff]  }
  0x3e   :  { %6286 = vmatprep.subr.bf16.mxu0 %v7415_v24  ;;  %6385 = vmatpush3.bf16.msra.mxu1 %v7428_v35  ;;  %v7471_v24 = vld [vmem:[%s9626_s0 + $0x1c4] ss:$36 sps:$4 sm:$0xff]   ;;  %v7486_v34 = vld [vmem:[%s9626_s0 + $0x250] ss:$36 sps:$4 sm:$0xff]   ;;  %v7489_v35 = vld [vmem:[%s9626_s0 + $0x258] ss:$36 sps:$4 sm:$0xff]  }
  0x3f   :  { %6386 = vmatprep.subr.bf16.mxu1 %v7429_v36  ;;  %v7491_v36 = vld [vmem:[%s9626_s0 + $0x29c] ss:$36 sps:$4 sm:$0xff]  }
  0x41   :  { %6287 = vmatpush3.bf16.msra.mxu0 %v7417_v26  ;;  %v7473_v26 = vld [vmem:[%s9626_s0 + $0x1c0] ss:$36 sps:$4 sm:$0xff]  }
  0x42   :  { %6722 = vmatprep.subr.bf16.mxu0 %v7434_v38  ;;  %6387 = vmatpush3.bf16.msra.mxu1 %v7433_v37  ;;  %v7494_v37 = vld [vmem:[%s9626_s0 + $0x2a4] ss:$36 sps:$4 sm:$0xff]  }
  0x43   :  { %1470 = vmatmul.mubr.bf16.gmra.mxu0 %v7349_v59  ;;  %v7430_v59 = vld [vmem:[%s9626_s0 + $0x10] ss:$36 sps:$4 sm:$0xff]  }
  0x44   :  { %1615 = vmatmul.mubr.bf16.gmra.mxu1 %v7350_v61  ;;  %1477 = vmatprep.mubr.bf16.mxu0 %v7351_v62  ;;  %v7438_v61 = vld [vmem:[%s9626_s0 + $0x5c] ss:$36 sps:$4 sm:$0xff]   ;;  %v7441_v62 = vld [vmem:[%s9626_s0 + $0x64] ss:$36 sps:$4 sm:$0xff]  }
  0x45   :  { %1622 = vmatprep.mubr.bf16.mxu1 %v7353_v1  ;;  %v7457_v1 = vld [vmem:[%s9625_s1 + $0x228] sm:$0xff]  }
  0x4b   :  { %1478 = vmatmul.mubr.bf16.gmra.mxu0 %v7355_v4  ;;  %v7448_v4 = vld [vmem:[%s9626_s0 + $0xac] ss:$36 sps:$4 sm:$0xff]  }
  0x4c   :  { %1623 = vmatmul.mubr.bf16.gmra.mxu1 %v7356_v6  ;;  %1485 = vmatprep.mubr.bf16.mxu0 %v7359_v7  ;;  %v7480_v6 = vld [vmem:[%s9625_s1 + $0x218] sm:$0xff]   ;;  %v7447_v7 = vld [vmem:[%s9626_s0 + $0xa0] ss:$36 sps:$4 sm:$0xff]  }
  0x4d   :  { %1630 = vmatprep.mubr.bf16.mxu1 %v7361_v9  ;;  %v7451_v9 = vld [vmem:[%s9626_s0 + $0xec] ss:$36 sps:$4 sm:$0xff]  }
  0x53   :  { %1486 = vmatmul.mubr.bf16.gmra.mxu0 %v7363_v10  ;;  %v7454_v10 = vld [vmem:[%s9626_s0 + $0xf4] ss:$36 sps:$4 sm:$0xff]  }
  0x54   :  { %1631 = vmatmul.mubr.bf16.gmra.mxu1 %v7364_v12  ;;  %1493 = vmatprep.mubr.bf16.mxu0 %v7366_v13  ;;  %v7503_v12 = vld [vmem:[%s9625_s1 + $0x208] sm:$0xff]  }
  0x55   :  { %1638 = vmatprep.mubr.bf16.mxu1 %v7368_v17  ;;  %v7453_v13 = vld [vmem:[%s9626_s0 + $0xe8] ss:$36 sps:$4 sm:$0xff]   ;;  %v7516_v17 = vld [vmem:[%s9625_s1 + $0x200] sm:$0xff]  }
  0x5b   :  { %1494 = vmatmul.mubr.bf16.gmra.mxu0 %v7371_v19  ;;  %v7463_v19 = vld [vmem:[%s9626_s0 + $0x138] ss:$36 sps:$4 sm:$0xff]  }
  0x5c   :  { %1639 = vmatmul.mubr.bf16.gmra.mxu1 %v7372_v20  ;;  %1501 = vmatprep.mubr.bf16.mxu0 %v7375_v22  ;;  %v7464_v20 = vld [vmem:[%s9626_s0 + $0x17c] ss:$36 sps:$4 sm:$0xff]  }
  0x5d   :  { %1646 = vmatprep.mubr.bf16.mxu1 %v7377_v23  ;;  %v7466_v22 = vld [vmem:[%s9626_s0 + $0x178] ss:$36 sps:$4 sm:$0xff]   ;;  %v7469_v23 = vld [vmem:[%s9626_s0 + $0x180] ss:$36 sps:$4 sm:$0xff]  }
  0x63   :  { %1502 = vmatmul.mubr.bf16.gmra.mxu0 %v7379_v29  ;;  %v7481_v29 = vld [vmem:[%s9626_s0 + $0x214] ss:$36 sps:$4 sm:$0xff]  }
  0x64   :  { %1647 = vmatmul.mubr.bf16.gmra.mxu1 %v7380_v30  ;;  %1509 = vmatprep.mubr.bf16.mxu0 %v7384_v31  ;;  %v7479_v30 = vld [vmem:[%s9626_s0 + $0x208] ss:$36 sps:$4 sm:$0xff]   ;;  %v7483_v31 = vld [vmem:[%s9626_s0 + $0x210] ss:$36 sps:$4 sm:$0xff]  }
  0x65   :  { %1654 = vmatprep.mubr.bf16.mxu1 %v7386_v33  ;;  %v7487_v33 = vld [vmem:[%s9626_s0 + $0x25c] ss:$36 sps:$4 sm:$0xff]  }
  0x6b   :  { %1510 = vmatmul.mubr.bf16.gmra.mxu0 %v7389_v39  ;;  %v7496_v39 = vld [vmem:[%s9626_s0 + $0x2a0] ss:$36 sps:$4 sm:$0xff]  }
  0x6c   :  { %1655 = vmatmul.mubr.bf16.gmra.mxu1 %v7390_v40  ;;  %1517 = vmatprep.mubr.bf16.mxu0 %v7391_v41  ;;  %v7497_v40 = vld [vmem:[%s9626_s0 + $0x2e4] ss:$36 sps:$4 sm:$0xff]   ;;  %v7500_v41 = vld [vmem:[%s9626_s0 + $0x2ec] ss:$36 sps:$4 sm:$0xff]  }
  0x6d   :  { %1662 = vmatprep.mubr.bf16.mxu1 %v7393_v42  ;;  %v7499_v42 = vld [vmem:[%s9626_s0 + $0x2e0] ss:$36 sps:$4 sm:$0xff]  }
  0x73   :  { %1518 = vmatmul.mubr.bf16.gmra.mxu0 %v7395_v43  ;;  %v7502_v43 = vld [vmem:[%s9626_s0 + $0x2e8] ss:$36 sps:$4 sm:$0xff]  }
  0x74   :  { %1663 = vmatmul.mubr.bf16.gmra.mxu1 %v7396_v44  ;;  %1525 = vmatprep.mubr.bf16.mxu0 %v7401_v45  ;;  %v7504_v44 = vld [vmem:[%s9626_s0 + $0x32c] ss:$36 sps:$4 sm:$0xff]   ;;  %v7507_v45 = vld [vmem:[%s9626_s0 + $0x334] ss:$36 sps:$4 sm:$0xff]  }
  0x75   :  { %1670 = vmatprep.mubr.bf16.mxu1 %v7403_v46 }
  0x7b   :  { %1526 = vmatmul.mubr.bf16.gmra.mxu0 %v7405_v47 }
  0x7c   :  { %1671 = vmatmul.mubr.bf16.gmra.mxu1 %v7406_v48  ;;  %1533 = vmatprep.mubr.bf16.mxu0 %v7408_v49 }
  0x7d   :  { %1678 = vmatprep.mubr.bf16.mxu1 %v7410_v50 }
  0x83   :  { %1534 = vmatmul.mubr.bf16.gmra.mxu0 %v7413_v51 }
  0x84   :  { %1679 = vmatmul.mubr.bf16.gmra.mxu1 %v7414_v52  ;;  %1541 = vmatprep.mubr.bf16.mxu0 %v7420_v53  ;;  %v7506_v53 = vld [vmem:[%s9626_s0 + $0x328] ss:$36 sps:$4 sm:$0xff]  }
  0x85   :  { %1686 = vmatprep.mubr.bf16.mxu1 %v7422_v54 }
  0x8b   :  { %1542 = vmatmul.mubr.bf16.gmra.mxu0 %v7425_v55  ;;  %v7509_v55 = vld [vmem:[%s9626_s0 + $0x330] ss:$36 sps:$4 sm:$0xff]  }
  0x8c   :  { %1687 = vmatmul.mubr.bf16.gmra.mxu1 %v7426_v56  ;;  %1727 = vmatprep.mubr.bf16.mxu0 %v7432_v57  ;;  %v7510_v56 = vld [vmem:[%s9626_s0 + $0x374] ss:$36 sps:$4 sm:$0xff]  }
  0x8d   :  { %1872 = vmatprep.mubr.bf16.mxu1 %v7437_v58 }
  0x93   :  { %1728 = vmatmul.mubr.bf16.vlgmr.msra.gmra.mxu0 %v7430_v59  ;;  %v7513_v59 = vld [vmem:[%s9626_s0 + $0x37c] ss:$36 sps:$4 sm:$0xff]  }
  0x94   :  { %6723 = vmatpush3.bf16.msra.mxu0 %v7434_v38  ;;  %1873 = vmatmul.mubr.bf16.vlgmr.msra.gmra.mxu1 %v7435_v60  ;;  %v7493_v38 = vld [vmem:[%s9626_s0 + $0x298] ss:$36 sps:$4 sm:$0xff]  }
  0x95   :  { %1735 = vmatprep.mubr.bf16.mxu0 %v7438_v61  ;;  %1880 = vmatprep.mubr.bf16.mxu1 %v7441_v62 }
  0x96   :  { %6724 = vmatprep.subr.bf16.mxu0 %v7444_v63 }
  0x98   :  { %6725 = vmatpush3.bf16.msra.mxu0 %v7444_v63 }
  0x99   :  { %6726 = vmatprep.subr.bf16.mxu0 %v7457_v1 }
  0x9b   :  { %1736 = vmatmul.mubr.bf16.gmra.mxu0 %v7440_v0 }
  0x9c   :  { %1881 = vmatmul.mubr.bf16.gmra.mxu1 %v7443_v2  ;;  %1743 = vmatprep.mubr.bf16.mxu0 %v7445_v3 }
  0x9d   :  { %1888 = vmatprep.mubr.bf16.mxu1 %v7448_v4  ;;  %6727 = vmatpush3.bf16.msra.mxu0 %v7457_v1 }
  0x9e   :  { %6728 = vmatprep.subr.bf16.mxu0 %v7470_v5 }
  0xa1   :  { %6729 = vmatpush3.bf16.msra.mxu0 %v7470_v5 }
  0xa2   :  { %6730 = vmatprep.subr.bf16.mxu0 %v7480_v6 }
  0xa3   :  { %1744 = vmatmul.mubr.bf16.gmra.mxu0 %v7447_v7  ;;  %v7512_v7 = vld [vmem:[%s9626_s0 + $0x370] ss:$36 sps:$4 sm:$0xff]  }
  0xa4   :  { %1889 = vmatmul.mubr.bf16.gmra.mxu1 %v7450_v8  ;;  %1751 = vmatprep.mubr.bf16.mxu0 %v7451_v9  ;;  %v7515_v9 = vld [vmem:[%s9626_s0 + $0x378] ss:$36 sps:$4 sm:$0xff]  }
  0xa5   :  { %1896 = vmatprep.mubr.bf16.mxu1 %v7454_v10  ;;  %6731 = vmatpush3.bf16.msra.mxu0 %v7480_v6  ;;  %v7517_v10 = vld [vmem:[%s9626_s0 + $0x3bc] ss:$36 sps:$4 sm:$0xff]  }
  0xa6   :  { %6732 = vmatprep.subr.bf16.mxu0 %v7490_v11 }
  0xa9   :  { %6733 = vmatpush3.bf16.msra.mxu0 %v7490_v11 }
  0xaa   :  { %6734 = vmatprep.subr.bf16.mxu0 %v7503_v12 }
  0xab   :  { %1752 = vmatmul.mubr.bf16.gmra.mxu0 %v7453_v13  ;;  %v7520_v13 = vld [vmem:[%s9626_s0 + $0x3c4] ss:$36 sps:$4 sm:$0xff]  }
  0xac   :  { %1897 = vmatmul.mubr.bf16.gmra.mxu1 %v7456_v14  ;;  %1759 = vmatprep.mubr.bf16.mxu0 %v7458_v15 }
  0xad   :  { %1904 = vmatprep.mubr.bf16.mxu1 %v7461_v16  ;;  %6735 = vmatpush3.bf16.msra.mxu0 %v7503_v12 }
  0xae   :  { %6736 = vmatprep.subr.bf16.mxu0 %v7516_v17 }
  0xb1   :  { %6737 = vmatpush3.bf16.msra.mxu0 %v7516_v17 }
  0xb3   :  { %1760 = vmatmul.mubr.bf16.gmra.mxu0 %v7460_v18 }
  0xb4   :  { %1905 = vmatmul.mubr.bf16.gmra.mxu1 %v7463_v19  ;;  %1767 = vmatprep.mubr.bf16.mxu0 %v7464_v20 }
  0xb5   :  { %1912 = vmatprep.mubr.bf16.mxu1 %v7467_v21 }
  0xbb   :  { %1768 = vmatmul.mubr.bf16.gmra.mxu0 %v7466_v22 }
  0xbc   :  { %1913 = vmatmul.mubr.bf16.gmra.mxu1 %v7469_v23  ;;  %1775 = vmatprep.mubr.bf16.mxu0 %v7471_v24 }
  0xbd   :  { %1920 = vmatprep.mubr.bf16.mxu1 %v7474_v25  ;;  %v7519_v25 = vld [vmem:[%s9626_s0 + $0x3b8] ss:$36 sps:$4 sm:$0xff]  }
  0xc3   :  { %1776 = vmatmul.mubr.bf16.gmra.mxu0 %v7473_v26 }
  0xc4   :  { %1921 = vmatmul.mubr.bf16.gmra.mxu1 %v7476_v27  ;;  %1783 = vmatprep.mubr.bf16.mxu0 %v7477_v28  ;;  %v7522_v27 = vld [vmem:[%s9626_s0 + $0x3c0] ss:$36 sps:$4 sm:$0xff]  }
  0xc5   :  { %1928 = vmatprep.mubr.bf16.mxu1 %v7481_v29  ;;  %v7523_v28 = vld [vmem:[%s9626_s0 + $0x20] ss:$36 sps:$4 sm:$0xff]  }
  0xcb   :  { %1784 = vmatmul.mubr.bf16.gmra.mxu0 %v7479_v30 }
  0xcc   :  { %1929 = vmatmul.mubr.bf16.gmra.mxu1 %v7483_v31  ;;  %1791 = vmatprep.mubr.bf16.mxu0 %v7484_v32 }
  0xcd   :  { %1936 = vmatprep.mubr.bf16.mxu1 %v7487_v33 }
  0xd3   :  { %1792 = vmatmul.mubr.bf16.gmra.mxu0 %v7486_v34 }
  0xd4   :  { %1937 = vmatmul.mubr.bf16.gmra.mxu1 %v7489_v35  ;;  %1799 = vmatprep.mubr.bf16.mxu0 %v7491_v36 }
  0xd5   :  { %1944 = vmatprep.mubr.bf16.mxu1 %v7494_v37 }
  0xdb   :  { %1800 = vmatmul.mubr.bf16.gmra.mxu0 %v7493_v38 }
  0xdc   :  { %1945 = vmatmul.mubr.bf16.gmra.mxu1 %v7496_v39  ;;  %1807 = vmatprep.mubr.bf16.mxu0 %v7497_v40 }
  0xdd   :  { %1952 = vmatprep.mubr.bf16.mxu1 %v7500_v41 }
  0xe3   :  { %v6088_v46 = vpop.f32.mrf.mxu0  ;;  %1808 = vmatmul.mubr.bf16.gmra.mxu0 %v7499_v42  ;;  %v7524_v42 = vld [vmem:[%s9626_s0 + $0x68] ss:$36 sps:$4 sm:$0xff]  }
  0xe4   :  { %v6188_v47 = vpop.f32.mrf.mxu1  ;;  %1953 = vmatmul.mubr.bf16.gmra.mxu1 %v7502_v43  ;;  %1815 = vmatprep.mubr.bf16.mxu0 %v7504_v44  ;;  %v7525_v44 = vld [vmem:[%s9626_s0 + $0xb0] ss:$36 sps:$4 sm:$0xff]  }
  0xe5   :  { %v6089_v48 = vpop.f32.mrf.mxu0  ;;  %1960 = vmatprep.mubr.bf16.mxu1 %v7507_v45 }
  0xe6   :  { %v6090_v49 = vadd.f32 %v6089_v48, %v6088_v46  ;;  %v6189_v50 = vpop.f32.mrf.mxu1 }
  0xe7   :  { %v6190_v51 = vadd.f32 %v6189_v50, %v6188_v47  ;;  %v6091_v52 = vpop.f32.mrf.mxu0 }
  0xe8   :  { %v6191_v54 = vpop.f32.mrf.mxu1 }
  0xe9   :  { %v8357_v57 = vadd.f32 %v6190_v51, %v6090_v49  ;;  %v6092_v58 = vpop.f32.mrf.mxu0 }
  0xea   :  { %v6093_v60 = vadd.f32 %v6092_v58, %v6091_v52  ;;  %v6192_v61 = vpop.f32.mrf.mxu1 }
  0xeb   :  { %v6193_v62 = vadd.f32 %v6192_v61, %v6191_v54  ;;  %v6094_v63 = vpop.f32.mrf.mxu0  ;;  %1816 = vmatmul.mubr.bf16.gmra.mxu0 %v7506_v53  ;;  %v7527_v61 = vld [vmem:[%s9626_s0 + $0x140] ss:$36 sps:$4 sm:$0xff]  }
  0xec   :  { %v6194_v0 = vpop.f32.mrf.mxu1  ;;  %1961 = vmatmul.mubr.bf16.gmra.mxu1 %v7509_v55  ;;  %1823 = vmatprep.mubr.bf16.mxu0 %v7510_v56 }
  0xed   :  { %v8362_v1 = vadd.f32 %v6193_v62, %v6093_v60  ;;  %v6095_v2 = vpop.f32.mrf.mxu0  ;;  %1968 = vmatprep.mubr.bf16.mxu1 %v7513_v59  ;;  %v7526_v59 = vld [vmem:[%s9626_s0 + $0xf8] ss:$36 sps:$4 sm:$0xff]  }
  0xee   :  { %v6096_v3 = vadd.f32 %v6095_v2, %v6094_v63  ;;  %v6195_v4 = vpop.f32.mrf.mxu1 }
  0xef   :  { %v6196_v5 = vadd.f32 %v6195_v4, %v6194_v0  ;;  %v6097_v6 = vpop.f32.mrf.mxu0 }
  0xf0   :  { %v6197_v8 = vpop.f32.mrf.mxu1 }
  0xf1   :  { %v8373_v11 = vadd.f32 %v6196_v5, %v6096_v3  ;;  %v6098_v12 = vpop.f32.mrf.mxu0 }
  0xf2   :  { %v6099_v14 = vadd.f32 %v6098_v12, %v6097_v6  ;;  %v6198_v15 = vpop.f32.mrf.mxu1 }
  0xf3   :  { %v6199_v16 = vadd.f32 %v6198_v15, %v6197_v8  ;;  %v6100_v17 = vpop.f32.mrf.mxu0  ;;  %1824 = vmatmul.mubr.bf16.gmra.mxu0 %v7512_v7  ;;  %v7529_v15 = vld [vmem:[%s9626_s0 + $0x1d0] ss:$36 sps:$4 sm:$0xff]  }
  0xf4   :  { %v6200_v18 = vpop.f32.mrf.mxu1  ;;  %1969 = vmatmul.mubr.bf16.gmra.mxu1 %v7515_v9  ;;  %1831 = vmatprep.mubr.bf16.mxu0 %v7517_v10 }
  0xf5   :  { %v8378_v19 = vadd.f32 %v6199_v16, %v6099_v14  ;;  %v6101_v20 = vpop.f32.mrf.mxu0  ;;  %1976 = vmatprep.mubr.bf16.mxu1 %v7520_v13  ;;  %v7528_v13 = vld [vmem:[%s9626_s0 + $0x188] ss:$36 sps:$4 sm:$0xff]  }
  0xf6   :  { %v6102_v21 = vadd.f32 %v6101_v20, %v6100_v17  ;;  %v6201_v22 = vpop.f32.mrf.mxu1 }
  0xf7   :  { %v6202_v23 = vadd.f32 %v6201_v22, %v6200_v18  ;;  %v6103_v24 = vpop.f32.mrf.mxu0 }
  0xf8   :  { %v6203_v26 = vpop.f32.mrf.mxu1 }
  0xf9   :  { %v8389_v29 = vadd.f32 %v6202_v23, %v6102_v21  ;;  %v6104_v30 = vpop.f32.mrf.mxu0 }
  0xfa   :  { %v6105_v31 = vadd.f32 %v6104_v30, %v6103_v24  ;;  %v6204_v32 = vpop.f32.mrf.mxu1 }
  0xfb   :  { %v6205_v33 = vadd.f32 %v6204_v32, %v6203_v26  ;;  %v6106_v34 = vpop.f32.mrf.mxu0  ;;  %1832 = vmatmul.mubr.bf16.gmra.mxu0 %v7519_v25 }
  0xfc   :  { %v6206_v35 = vpop.f32.mrf.mxu1  ;;  %1977 = vmatmul.mubr.bf16.gmra.mxu1 %v7522_v27  ;;  %6738 = vmatprep.mubr.bf16.mxu0 %v7523_v28 }
  0xfd   :  { %v8391_v36 = vadd.f32 %v6205_v33, %v6105_v31  ;;  %v6107_v37 = vpop.f32.mrf.mxu0  ;;  %v7530_v31 = vld [vmem:[%s9626_s0 + $0x218] ss:$36 sps:$4 sm:$0xff]   ;;  %v7531_v33 = vld [vmem:[%s9626_s0 + $0x260] ss:$36 sps:$4 sm:$0xff]  }
  0xfe   :  { %v6108_v38 = vadd.f32 %v6107_v37, %v6106_v34  ;;  %v6207_v39 = vpop.f32.mrf.mxu1 }
  0xff   :  { %v6208_v40 = vadd.f32 %v6207_v39, %v6206_v35  ;;  %v6109_v41 = vpop.f32.mrf.mxu0 }
 0x100   :  { %v6209_v43 = vpop.f32.mrf.mxu1 }
 0x101   :  { %v8399_v45 = vadd.f32 %v6208_v40, %v6108_v38  ;;  %v6110_v46 = vpop.f32.mrf.mxu0 }
 0x102   :  { %v6111_v47 = vadd.f32 %v6110_v46, %v6109_v41  ;;  %v6210_v48 = vpop.f32.mrf.mxu1 }
 0x103   :  { %v6211_v49 = vadd.f32 %v6210_v48, %v6209_v43  ;;  %v6112_v50 = vpop.f32.mrf.mxu0  ;;  %6739 = vmatmul.mubr.bf16.vlgmr.msra.gmra.mxu0 %v7524_v42 }
 0x104   :  { %v6212_v51 = vpop.f32.mrf.mxu1  ;;  %6742 = vmatprep.mubr.bf16.mxu0 %v7525_v44 }
 0x105   :  { %v8401_v52 = vadd.f32 %v6211_v49, %v6111_v47  ;;  %v6113_v53 = vpop.f32.mrf.mxu0  ;;  %v7532_v49 = vld [vmem:[%s9626_s0 + $0x2a8] ss:$36 sps:$4 sm:$0xff]  }
 0x106   :  { %v6114_v54 = vadd.f32 %v6113_v53, %v6112_v50  ;;  %v6213_v55 = vpop.f32.mrf.mxu1 }
 0x107   :  { %v6214_v56 = vadd.f32 %v6213_v55, %v6212_v51  ;;  %v6115_v58 = vpop.f32.mrf.mxu0  ;;  %v7533_v51 = vld [vmem:[%s9626_s0 + $0x2f0] ss:$36 sps:$4 sm:$0xff]  }
 0x108   :  { %v6215_v60 = vpop.f32.mrf.mxu1 }
 0x109   :  { %v8409_v62 = vadd.f32 %v6214_v56, %v6114_v54  ;;  %v6116_v63 = vpop.f32.mrf.mxu0 }
 0x10a   :  { %v6117_v0 = vadd.f32 %v6116_v63, %v6115_v58  ;;  %v6216_v2 = vpop.f32.mrf.mxu1 }
 0x10b   :  { %v6217_v3 = vadd.f32 %v6216_v2, %v6215_v60  ;;  %v6118_v4 = vpop.f32.mrf.mxu0  ;;  %6743 = vmatmul.mubr.bf16.gmra.mxu0 %v7526_v59 }
 0x10c   :  { %v6218_v5 = vpop.f32.mrf.mxu1  ;;  %6746 = vmatprep.mubr.bf16.mxu0 %v7527_v61 }
 0x10d   :  { %v8411_v6 = vadd.f32 %v6217_v3, %v6117_v0  ;;  %v6119_v7 = vpop.f32.mrf.mxu0 }
 0x10e   :  { %v6120_v8 = vadd.f32 %v6119_v7, %v6118_v4  ;;  %v6219_v9 = vpop.f32.mrf.mxu1 }
 0x10f   :  { %v6220_v10 = vadd.f32 %v6219_v9, %v6218_v5  ;;  %v6121_v12 = vpop.f32.mrf.mxu0  ;;  %v7534_v5 = vld [vmem:[%s9626_s0 + $0x338] ss:$36 sps:$4 sm:$0xff]  }
 0x110   :  { %v6221_v14 = vpop.f32.mrf.mxu1 }
 0x111   :  { %v8419_v16 = vadd.f32 %v6220_v10, %v6120_v8  ;;  %v6122_v17 = vpop.f32.mrf.mxu0  ;;  %v7535_v8 = vld [vmem:[%s9626_s0 + $0x380] ss:$36 sps:$4 sm:$0xff]  }
 0x112   :  { %v6123_v18 = vadd.f32 %v6122_v17, %v6121_v12  ;;  %v6222_v20 = vpop.f32.mrf.mxu1 }
 0x113   :  { %v6223_v21 = vadd.f32 %v6222_v20, %v6221_v14  ;;  %v6124_v22 = vpop.f32.mrf.mxu0  ;;  %6747 = vmatmul.mubr.bf16.gmra.mxu0 %v7528_v13 }
 0x114   :  { %v6224_v23 = vpop.f32.mrf.mxu1  ;;  %6750 = vmatprep.mubr.bf16.mxu0 %v7529_v15 }
 0x115   :  { %v8421_v24 = vadd.f32 %v6223_v21, %v6123_v18  ;;  %v6125_v25 = vpop.f32.mrf.mxu0 }
 0x116   :  { %v6126_v26 = vadd.f32 %v6125_v25, %v6124_v22  ;;  %v6225_v27 = vpop.f32.mrf.mxu1 }
 0x117   :  { %v6226_v28 = vadd.f32 %v6225_v27, %v6224_v23  ;;  %v6127_v30 = vpop.f32.mrf.mxu0 }
 0x118   :  { %v6227_v32 = vpop.f32.mrf.mxu1 }
 0x119   :  { %v8429_v34 = vadd.f32 %v6226_v28, %v6126_v26  ;;  %v6128_v35 = vpop.f32.mrf.mxu0  ;;  %v7536_v26 = vld [vmem:[%s9626_s0 + $0x3c8] ss:$36 sps:$4 sm:$0xff]  }
 0x11a   :  { %v6129_v37 = vadd.f32 %v6128_v35, %v6127_v30  ;;  %v6228_v38 = vpop.f32.mrf.mxu1 }
 0x11b   :  { %v6229_v39 = vadd.f32 %v6228_v38, %v6227_v32  ;;  %v6130_v40 = vpop.f32.mrf.mxu0  ;;  %6751 = vmatmul.mubr.bf16.gmra.mxu0 %v7530_v31 }
 0x11c   :  { %v6230_v41 = vpop.f32.mrf.mxu1  ;;  %6754 = vmatprep.mubr.bf16.mxu0 %v7531_v33 }
 0x11d   :  { %v8431_v42 = vadd.f32 %v6229_v39, %v6129_v37  ;;  %v6131_v43 = vpop.f32.mrf.mxu0 }
 0x11e   :  { %v6132_v44 = vadd.f32 %v6131_v43, %v6130_v40  ;;  %v6231_v46 = vpop.f32.mrf.mxu1 }
 0x11f   :  { %v6232_v47 = vadd.f32 %v6231_v46, %v6230_v41  ;;  %v6133_v48 = vpop.f32.mrf.mxu0 }
 0x120   :  { %v6233_v50 = vpop.f32.mrf.mxu1 }
 0x121   :  { %v8439_v53 = vadd.f32 %v6232_v47, %v6132_v44  ;;  %v6134_v54 = vpop.f32.mrf.mxu0 }
 0x122   :  { %v6135_v55 = vadd.f32 %v6134_v54, %v6133_v48  ;;  %v6234_v56 = vpop.f32.mrf.mxu1 }
 0x123   :  { %v6235_v58 = vadd.f32 %v6234_v56, %v6233_v50  ;;  %v6136_v59 = vpop.f32.mrf.mxu0  ;;  %6755 = vmatmul.mubr.bf16.gmra.mxu0 %v7532_v49 }
 0x124   :  { %v6236_v60 = vpop.f32.mrf.mxu1  ;;  %6758 = vmatprep.mubr.bf16.mxu0 %v7533_v51 }
 0x125   :  { %v8441_v61 = vadd.f32 %v6235_v58, %v6135_v55  ;;  %v6137_v63 = vpop.f32.mrf.mxu0 }
 0x126   :  { %v6138_v0 = vadd.f32 %v6137_v63, %v6136_v59  ;;  %v6237_v2 = vpop.f32.mrf.mxu1 }
 0x127   :  { %v6238_v3 = vadd.f32 %v6237_v2, %v6236_v60  ;;  %v6139_v4 = vpop.f32.mrf.mxu0 }
 0x128   :  { %v6239_v7 = vpop.f32.mrf.mxu1 }
 0x129   :  { %v8449_v9 = vadd.f32 %v6238_v3, %v6138_v0  ;;  %v6140_v10 = vpop.f32.mrf.mxu0 }
 0x12a   :  { %v6141_v12 = vadd.f32 %v6140_v10, %v6139_v4  ;;  %v6240_v13 = vpop.f32.mrf.mxu1 }
 0x12b   :  { %v6241_v14 = vadd.f32 %v6240_v13, %v6239_v7  ;;  %v6142_v15 = vpop.f32.mrf.mxu0  ;;  %6759 = vmatmul.mubr.bf16.gmra.mxu0 %v7534_v5 }
 0x12c   :  { %v6242_v17 = vpop.f32.mrf.mxu1  ;;  %6762 = vmatprep.mubr.bf16.mxu0 %v7535_v8 }
 0x12d   :  { %v8451_v18 = vadd.f32 %v6241_v14, %v6141_v12  ;;  %v6143_v20 = vpop.f32.mrf.mxu0 }
 0x12e   :  { %v6144_v21 = vadd.f32 %v6143_v20, %v6142_v15  ;;  %v6243_v22 = vpop.f32.mrf.mxu1 }
 0x12f   :  { %v6244_v23 = vadd.f32 %v6243_v22, %v6242_v17  ;;  %v6145_v25 = vpop.f32.mrf.mxu0 }
 0x130   :  { %v6245_v27 = vpop.f32.mrf.mxu1 }
 0x131   :  { %v8456_v28 = vadd.f32 %v6244_v23, %v6144_v21  ;;  %v6146_v30 = vpop.f32.mrf.mxu0 }
 0x132   :  { %v6147_v31 = vadd.f32 %v6146_v30, %v6145_v25  ;;  %v6246_v32 = vpop.f32.mrf.mxu1 }
 0x133   :  { %v6247_v33 = vadd.f32 %v6246_v32, %v6245_v27  ;;  %v6148_v35 = vpop.f32.mrf.mxu0  ;;  %6763 = vmatmul.mubr.bf16.gmra.mxu0 %v7536_v26 }
 0x134   :  { %v6248_v37 = vpop.f32.mrf.mxu1 }
 0x135   :  { %v8458_v38 = vadd.f32 %v6247_v33, %v6147_v31  ;;  %v6149_v39 = vpop.f32.mrf.mxu0 }
 0x136   :  { %v6150_v40 = vadd.f32 %v6149_v39, %v6148_v35  ;;  %v6249_v41 = vpop.f32.mrf.mxu1 }
 0x137   :  { %v6250_v43 = vadd.f32 %v6249_v41, %v6248_v37  ;;  %v6151_v44 = vpop.f32.mrf.mxu0 }
 0x138   :  { %v6251_v46 = vpop.f32.mrf.mxu1 }
 0x139   :  { %v8460_v47 = vadd.f32 %v6250_v43, %v6150_v40  ;;  %v6152_v48 = vpop.f32.mrf.mxu0 }
 0x13a   :  { %v6153_v49 = vadd.f32 %v6152_v48, %v6151_v44  ;;  %v6252_v50 = vpop.f32.mrf.mxu1 }
 0x13b   :  { %v6253_v51 = vadd.f32 %v6252_v50, %v6251_v46  ;;  %v6154_v54 = vpop.f32.mrf.mxu0 }
 0x13c   :  { %v6254_v55 = vpop.f32.mrf.mxu1 }
 0x13d   :  { %v8462_v56 = vadd.f32 %v6253_v51, %v6153_v49  ;;  %v6155_v58 = vpop.f32.mrf.mxu0 }
 0x13e   :  { %v6156_v59 = vadd.f32 %v6155_v58, %v6154_v54  ;;  %v6255_v60 = vpop.f32.mrf.mxu1 }
 0x13f   :  { %v6256_v63 = vadd.f32 %v6255_v60, %v6254_v55  ;;  %v6157_v0 = vpop.f32.mrf.mxu0 }
 0x140   :  { %v6257_v2 = vpop.f32.mrf.mxu1 }
 0x141   :  { %v8464_v3 = vadd.f32 %v6256_v63, %v6156_v59  ;;  %v6158_v4 = vpop.f32.mrf.mxu0 }
 0x142   :  { %v6159_v5 = vadd.f32 %v6158_v4, %v6157_v0  ;;  %v6258_v7 = vpop.f32.mrf.mxu1 }
 0x143   :  { %v6259_v8 = vadd.f32 %v6258_v7, %v6257_v2  ;;  %v6160_v10 = vpop.f32.mrf.mxu0 }
 0x144   :  { %v6260_v12 = vpop.f32.mrf.mxu1 }
 0x145   :  { %v8466_v13 = vadd.f32 %v6259_v8, %v6159_v5  ;;  %v6161_v14 = vpop.f32.mrf.mxu0 }
 0x146   :  { %v6162_v15 = vadd.f32 %v6161_v14, %v6160_v10  ;;  %v6261_v17 = vpop.f32.mrf.mxu1 }
 0x147   :  { %v6262_v20 = vadd.f32 %v6261_v17, %v6260_v12  ;;  %v6163_v21 = vpop.f32.mrf.mxu0 }
 0x148   :  { %v6263_v22 = vpop.f32.mrf.mxu1 }
 0x149   :  { %v8468_v23 = vadd.f32 %v6262_v20, %v6162_v15  ;;  %v6164_v25 = vpop.f32.mrf.mxu0 }
 0x14a   :  { %v6165_v26 = vadd.f32 %v6164_v25, %v6163_v21  ;;  %v6264_v27 = vpop.f32.mrf.mxu1 }
 0x14b   :  { %9637 = vst [vmem:[#allocation6_spill] sm:$0xff] %v8468_v23  ;;  %v6265_v30 = vadd.f32 %v6264_v27, %v6263_v22  ;;  %v6166_v31 = vpop.f32.mrf.mxu0  ;;  %v7541_v23 = vld [vmem:[%s9627_s5 + $0x58] sm:$0xff]  }
 0x14c   :  { %v6266_v32 = vpop.f32.mrf.mxu1 }
 0x14d   :  { %v8470_v33 = vadd.f32 %v6265_v30, %v6165_v26  ;;  %v6167_v35 = vpop.f32.mrf.mxu0 }
 0x14e   :  { %v6168_v37 = vadd.f32 %v6167_v35, %v6166_v31  ;;  %v6267_v39 = vpop.f32.mrf.mxu1 }
 0x14f   :  { %9638 = vst [vmem:[#allocation7_spill] sm:$0xff] %v8470_v33  ;;  %v6268_v40 = vadd.f32 %v6267_v39, %v6266_v32  ;;  %v6169_v41 = vpop.f32.mrf.mxu0 }
 0x150   :  { %v6269_v43 = vpop.f32.mrf.mxu1 }
 0x151   :  { %v8472_v44 = vadd.f32 %v6268_v40, %v6168_v37  ;;  %v6170_v46 = vpop.f32.mrf.mxu0 }
 0x152   :  { %v6171_v48 = vadd.f32 %v6170_v46, %v6169_v41  ;;  %v6270_v49 = vpop.f32.mrf.mxu1 }
 0x153   :  { %9639 = vst [vmem:[#allocation8_spill] sm:$0xff] %v8472_v44  ;;  %v6271_v50 = vadd.f32 %v6270_v49, %v6269_v43  ;;  %v6288_v51 = vpop.f32.mrf.mxu0 }
 0x154   :  { %v6388_v54 = vpop.f32.mrf.mxu1 }
 0x155   :  { %v8474_v55 = vadd.f32 %v6271_v50, %v6171_v48  ;;  %v6289_v58 = vpop.f32.mrf.mxu0 }
 0x156   :  { %v6290_v59 = vadd.f32 %v6289_v58, %v6288_v51  ;;  %v6389_v60 = vpop.f32.mrf.mxu1 }
 0x157   :  { %9640 = vst [vmem:[#allocation9_spill] sm:$0xff] %v8474_v55  ;;  %v6291_v63 = vpop.f32.mrf.mxu0  ;;  %v6390_v0 = vadd.f32 %v6389_v60, %v6388_v54  ;;  %v7540_v55 = vld [vmem:[%s9627_s5 + $0x60] sm:$0xff]  }
 0x158   :  { %v1730_v2 = vadd.f32 %v6290_v59, %v8357_v57  ;;  %v6391_v4 = vpop.f32.mrf.mxu1 }
 0x159   :  { %v6292_v5 = vpop.f32.mrf.mxu0 }
 0x15a   :  { %v6293_v7 = vadd.f32 %v6292_v5, %v6291_v63  ;;  %v6392_v8 = vpop.f32.mrf.mxu1  ;;  %v8477_v10 = vadd.f32 %v6390_v0, %v1730_v2 }
 0x15b   :  { %v6294_v12 = vpop.f32.mrf.mxu0  ;;  %v6393_v14 = vadd.f32 %v6392_v8, %v6391_v4  ;;  %v7763_v4 = vmov 0.0  }
 0x15c   :  { %v1733_v15 = vadd.f32 %v6293_v7, %v8362_v1  ;;  %v6394_v17 = vpop.f32.mrf.mxu1  ;;  %6766 = vmatprep.subr.bf16.mxu1 %v7763_v4  ;;  %6806 = vmatprep.subr.bf16.mxu0 %v7763_v4 }
 0x15d   :  { %v6295_v20 = vpop.f32.mrf.mxu0  ;;  %6782 = vmatprep.mubr.msk.bf16.mxu1 %vm7764_vm0, %v7763_v4  ;;  %6822 = vmatprep.mubr.msk.bf16.mxu0 %vm7764_vm0, %v7763_v4 }
 0x15e   :  { %v6296_v21 = vadd.f32 %v6295_v20, %v6294_v12  ;;  %v6395_v22 = vpop.f32.mrf.mxu1  ;;  %v8480_v25 = vadd.f32 %v6393_v14, %v1733_v15 }
 0x15f   :  { %v6297_v26 = vpop.f32.mrf.mxu0  ;;  %v6396_v27 = vadd.f32 %v6395_v22, %v6394_v17 }
 0x160   :  { %v1738_v57 = vadd.f32 %v6296_v21, %v8373_v11  ;;  %v6397_v30 = vpop.f32.mrf.mxu1 }
 0x161   :  { %v6298_v31 = vpop.f32.mrf.mxu0 }
 0x162   :  { %v6299_v32 = vadd.f32 %v6298_v31, %v6297_v26  ;;  %v6398_v35 = vpop.f32.mrf.mxu1  ;;  %v8483_v37 = vadd.f32 %v6396_v27, %v1738_v57 }
 0x163   :  { %v6300_v39 = vpop.f32.mrf.mxu0  ;;  %v6399_v40 = vadd.f32 %v6398_v35, %v6397_v30 }
 0x164   :  { %v1741_v1 = vadd.f32 %v6299_v32, %v8378_v19  ;;  %v6400_v41 = vpop.f32.mrf.mxu1 }
 0x165   :  { %v6301_v43 = vpop.f32.mrf.mxu0 }
 0x166   :  { %v6302_v46 = vadd.f32 %v6301_v43, %v6300_v39  ;;  %v6401_v48 = vpop.f32.mrf.mxu1  ;;  %v8486_v49 = vadd.f32 %v6399_v40, %v1741_v1 }
 0x167   :  { %v6303_v50 = vpop.f32.mrf.mxu0  ;;  %v6402_v51 = vadd.f32 %v6401_v48, %v6400_v41 }
 0x168   :  { %v1746_v11 = vadd.f32 %v6302_v46, %v8389_v29  ;;  %v6403_v54 = vpop.f32.mrf.mxu1  ;;  %v7537_v29 = vld [vmem:[%s9627_s5 + $0x78] sm:$0xff]  }
 0x169   :  { %v6304_v58 = vpop.f32.mrf.mxu0  ;;  %6767 = vmatpush3.bf16.msra.mxu1 %v7537_v29  ;;  %v7538_v29 = vld [vmem:[%s9627_s5 + $0x70] sm:$0xff]  }
 0x16a   :  { %v6305_v59 = vadd.f32 %v6304_v58, %v6303_v50  ;;  %v6404_v60 = vpop.f32.mrf.mxu1  ;;  %v8489_v63 = vadd.f32 %v6402_v51, %v1746_v11  ;;  %6768 = vmatprep.subr.bf16.mxu1 %v7763_v4 }
 0x16b   :  { %v6306_v0 = vpop.f32.mrf.mxu0  ;;  %v6405_v2 = vadd.f32 %v6404_v60, %v6403_v54 }
 0x16c   :  { %v1749_v19 = vadd.f32 %v6305_v59, %v8391_v36  ;;  %v6406_v5 = vpop.f32.mrf.mxu1 }
 0x16d   :  { %v6307_v7 = vpop.f32.mrf.mxu0  ;;  %6769 = vmatpush3.bf16.msra.mxu1 %v7538_v29 }
 0x16e   :  { %v6308_v8 = vadd.f32 %v6307_v7, %v6306_v0  ;;  %v6407_v12 = vpop.f32.mrf.mxu1  ;;  %v8497_v14 = vadd.f32 %v6405_v2, %v1749_v19  ;;  %6770 = vmatprep.subr.bf16.mxu1 %v7763_v4 }
 0x16f   :  { %v6309_v15 = vpop.f32.mrf.mxu0  ;;  %v6408_v17 = vadd.f32 %v6407_v12, %v6406_v5 }
 0x170   :  { %v1754_v20 = vadd.f32 %v6308_v8, %v8399_v45  ;;  %v6409_v21 = vpop.f32.mrf.mxu1 }
 0x171   :  { %v6310_v22 = vpop.f32.mrf.mxu0 }
 0x172   :  { %v6311_v36 = vadd.f32 %v6310_v22, %v6309_v15  ;;  %v6410_v26 = vpop.f32.mrf.mxu1  ;;  %v8501_v27 = vadd.f32 %v6408_v17, %v1754_v20 }
 0x173   :  { %v6312_v57 = vpop.f32.mrf.mxu0  ;;  %v6411_v30 = vadd.f32 %v6410_v26, %v6409_v21 }
 0x174   :  { %v1757_v31 = vadd.f32 %v6311_v36, %v8401_v52  ;;  %v6412_v32 = vpop.f32.mrf.mxu1 }
 0x175   :  { %v6313_v35 = vpop.f32.mrf.mxu0 }
 0x176   :  { %v6314_v39 = vadd.f32 %v6313_v35, %v6312_v57  ;;  %v6413_v40 = vpop.f32.mrf.mxu1  ;;  %v8504_v1 = vadd.f32 %v6411_v30, %v1757_v31 }
 0x177   :  { %v6315_v41 = vpop.f32.mrf.mxu0  ;;  %v6414_v45 = vadd.f32 %v6413_v40, %v6412_v32 }
 0x178   :  { %v1762_v43 = vadd.f32 %v6314_v39, %v8409_v62  ;;  %v6415_v46 = vpop.f32.mrf.mxu1 }
 0x179   :  { %v6316_v48 = vpop.f32.mrf.mxu0 }
 0x17a   :  { %v6317_v50 = vadd.f32 %v6316_v48, %v6315_v41  ;;  %v6416_v51 = vpop.f32.mrf.mxu1  ;;  %v8507_v11 = vadd.f32 %v6414_v45, %v1762_v43 }
 0x17b   :  { %v6318_v54 = vpop.f32.mrf.mxu0  ;;  %v6417_v58 = vadd.f32 %v6416_v51, %v6415_v46 }
 0x17c   :  { %v1765_v52 = vadd.f32 %v6317_v50, %v8411_v6  ;;  %v8510_v59 = vpop.f32.mrf.mxu1 }
 0x17d   :  { %v6319_v60 = vpop.f32.mrf.mxu0 }
 0x17e   :  { %v6320_v0 = vadd.f32 %v6319_v60, %v6318_v54  ;;  %v8512_v2 = vpop.f32.mrf.mxu1  ;;  %v8514_v19 = vadd.f32 %v6417_v58, %v1765_v52 }
 0x17f   :  { %v6321_v5 = vpop.f32.mrf.mxu0 }
 0x180   :  { %v8517_v62 = vadd.f32 %v6320_v0, %v8419_v16  ;;  %v8519_v7 = vpop.f32.mrf.mxu1 }
 0x181   :  { %v6322_v8 = vpop.f32.mrf.mxu0 }
 0x182   :  { %v6323_v6 = vadd.f32 %v6322_v8, %v6321_v5  ;;  %v8524_v12 = vpop.f32.mrf.mxu1 }
 0x183   :  { %v6324_v15 = vpop.f32.mrf.mxu0 }
 0x184   :  { %v8528_v17 = vadd.f32 %v6323_v6, %v8421_v24  ;;  %v8530_v20 = vpop.f32.mrf.mxu1 }
 0x185   :  { %v6325_v16 = vpop.f32.mrf.mxu0 }
 0x186   :  { %v6326_v21 = vadd.f32 %v6325_v16, %v6324_v15  ;;  %v8532_v22 = vpop.f32.mrf.mxu1 }
 0x187   :  { %v6327_v36 = vpop.f32.mrf.mxu0 }
 0x188   :  { %v8535_v26 = vadd.f32 %v6326_v21, %v8429_v34  ;;  %v8537_v57 = vpop.f32.mrf.mxu1 }
 0x189   :  { %v6328_v30 = vpop.f32.mrf.mxu0 }
 0x18a   :  { %v6329_v31 = vadd.f32 %v6328_v30, %v6327_v36  ;;  %v8539_v32 = vpop.f32.mrf.mxu1 }
 0x18b   :  { %v6330_v35 = vpop.f32.mrf.mxu0 }
 0x18c   :  { %v8542_v24 = vadd.f32 %v6329_v31, %v8431_v42  ;;  %v8544_v39 = vpop.f32.mrf.mxu1 }
 0x18d   :  { %v6331_v40 = vpop.f32.mrf.mxu0 }
 0x18e   :  { %v6332_v41 = vadd.f32 %v6331_v40, %v6330_v35  ;;  %v8546_v45 = vpop.f32.mrf.mxu1 }
 0x18f   :  { %v6333_v43 = vpop.f32.mrf.mxu0 }
 0x190   :  { %v8549_v34 = vadd.f32 %v6332_v41, %v8439_v53  ;;  %v8551_v46 = vpop.f32.mrf.mxu1 }
 0x191   :  { %v6334_v48 = vpop.f32.mrf.mxu0 }
 0x192   :  { %v6335_v50 = vadd.f32 %v6334_v48, %v6333_v43  ;;  %v8553_v51 = vpop.f32.mrf.mxu1 }
 0x193   :  { %v6336_v54 = vpop.f32.mrf.mxu0 }
 0x194   :  { %v8556_v42 = vadd.f32 %v6335_v50, %v8441_v61  ;;  %v8558_v58 = vpop.f32.mrf.mxu1 }
 0x195   :  { %v6337_v52 = vpop.f32.mrf.mxu0 }
 0x196   :  { %v6338_v60 = vadd.f32 %v6337_v52, %v6336_v54  ;;  %v8560_v0 = vpop.f32.mrf.mxu1 }
 0x197   :  { %v6339_v5 = vpop.f32.mrf.mxu0 }
 0x198   :  { %v8563_v53 = vadd.f32 %v6338_v60, %v8449_v9  ;;  %v8565_v6 = vpop.f32.mrf.mxu1 }
 0x199   :  { %v6340_v29 = vpop.f32.mrf.mxu0 }
 0x19a   :  { %v6341_v8 = vadd.f32 %v6340_v29, %v6339_v5  ;;  %v8570_v21 = vpop.f32.mrf.mxu1 }
 0x19b   :  { %v6342_v15 = vpop.f32.mrf.mxu0 }
 0x19c   :  { %v8568_v16 = vadd.f32 %v6341_v8, %v8451_v18  ;;  %v8575_v40 = vpop.f32.mrf.mxu1 }
 0x19d   :  { %v6343_v61 = vpop.f32.mrf.mxu0 }
 0x19e   :  { %v6344_v36 = vadd.f32 %v6343_v61, %v6342_v15  ;;  %v8580_v50 = vpop.f32.mrf.mxu1 }
 0x19f   :  { %v6345_v30 = vpop.f32.mrf.mxu0 }
 0x1a0   :  { %v8573_v31 = vadd.f32 %v6344_v36, %v8456_v28  ;;  %v8585_v5 = vpop.f32.mrf.mxu1 }
 0x1a1   :  { %v6346_v35 = vpop.f32.mrf.mxu0 }
 0x1a2   :  { %v6347_v9 = vadd.f32 %v6346_v35, %v6345_v30  ;;  %v8590_v61 = vpop.f32.mrf.mxu1 }
 0x1a3   :  { %v6348_v41 = vpop.f32.mrf.mxu0 }
 0x1a4   :  { %v8578_v43 = vadd.f32 %v6347_v9, %v8458_v38  ;;  %v8595_v9 = vpop.f32.mrf.mxu1 }
 0x1a5   :  { %v6349_v48 = vpop.f32.mrf.mxu0 }
 0x1a6   :  { %v6350_v18 = vadd.f32 %v6349_v48, %v6348_v41 }
 0x1a7   :  { %v6351_v54 = vpop.f32.mrf.mxu0 }
 0x1a8   :  { %v8583_v52 = vadd.f32 %v6350_v18, %v8460_v47 }
 0x1a9   :  { %v6352_v60 = vpop.f32.mrf.mxu0 }
 0x1aa   :  { %9641 = vst [vmem:[#allocation10_spill] sm:$0xff] %v8583_v52  ;;  %v6353_v28 = vadd.f32 %v6352_v60, %v6351_v54  ;;  %v7545_v52 = vld [vmem:[%s9627_s5 + $0x48] sm:$0xff]  }
 0x1ab   :  { %v6354_v29 = vpop.f32.mrf.mxu0 }
 0x1ac   :  { %v8588_v8 = vadd.f32 %v6353_v28, %v8462_v56  ;;  %v8604_v56 = vpop.f32.mrf.mxu1 }
 0x1ad   :  { %v6355_v15 = vpop.f32.mrf.mxu0 }
 0x1ae   :  { %9642 = vst [vmem:[#allocation11_spill] sm:$0xff] %v8588_v8  ;;  %v6356_v38 = vadd.f32 %v6355_v15, %v6354_v29  ;;  %v8613_v28 = vpop.f32.mrf.mxu1  ;;  %v7548_v8 = vld [vmem:[%s9627_s5 + $0x98] sm:$0xff]  }
 0x1af   :  { %v6357_v36 = vpop.f32.mrf.mxu0  ;;  %9649 = vst [vmem:[#allocation18_spill] sm:$0xff] %v8613_v28 }
 0x1b0   :  { %v8593_v30 = vadd.f32 %v6356_v38, %v8464_v3  ;;  %v7543_v3 = vld [vmem:[%s9627_s5 + $0xb8] sm:$0xff]   ;;  %v8623_v38 = vpop.f32.mrf.mxu1 }
 0x1b1   :  { %v6358_v35 = vpop.f32.mrf.mxu0  ;;  %6807 = vmatpush3.bf16.msra.mxu0 %v7543_v3  ;;  %9652 = vst [vmem:[#allocation21_spill] sm:$0xff] %v8623_v38  ;;  %v6423_v38 = vadd.f32 %v8524_v12, %v8519_v7  ;;  %v6432_v7 = vadd.f32 %v8546_v45, %v8544_v39  ;;  %v6426_v39 = vadd.f32 %v8532_v22, %v8530_v20 }
 0x1b2   :  { %9643 = vst [vmem:[#allocation12_spill] sm:$0xff] %v8593_v30  ;;  %v6359_v47 = vadd.f32 %v6358_v35, %v6357_v36  ;;  %6808 = vmatprep.subr.bf16.mxu0 %v7763_v4  ;;  %v7539_v35 = vld [vmem:[%s9627_s5 + $0x68] sm:$0xff]   ;;  %v8636_v33 = vpop.f32.mrf.mxu1 }
 0x1b3   :  { %v8597_v41 = vpop.f32.mrf.mxu0  ;;  %6771 = vmatpush3.bf16.msra.mxu1 %v7539_v35 }
 0x1b4   :  { %9644 = vst [vmem:[#allocation13_spill] sm:$0xff] %v8597_v41  ;;  %v8600_v48 = vadd.f32 %v6359_v47, %v8466_v13  ;;  %v7544_v13 = vld [vmem:[%s9627_s5 + $0xb0] sm:$0xff]   ;;  %v7546_v47 = vld [vmem:[%s9627_s5 + $0xa8] sm:$0xff]   ;;  %6772 = vmatprep.subr.bf16.mxu1 %v7763_v4  ;;  %v8648_v35 = vpop.f32.mrf.mxu1 }
 0x1b5   :  { %v8602_v18 = vpop.f32.mrf.mxu0  ;;  %6809 = vmatpush3.bf16.msra.mxu0 %v7544_v13 }
 0x1b6   :  { %9645 = vst [vmem:[#allocation14_spill] sm:$0xff] %v8600_v48  ;;  %9646 = vst [vmem:[#allocation15_spill] sm:$0xff] %v8602_v18  ;;  %6810 = vmatprep.subr.bf16.mxu0 %v7763_v4  ;;  %v7542_v48 = vld [vmem:[%s9627_s5 + $0x50] sm:$0xff]   ;;  %v7551_v18 = vld [vmem:[%s9627_s5 + $0x88] sm:$0xff]  }
 0x1b7   :  { %v8606_v54 = vpop.f32.mrf.mxu0  ;;  %6773 = vmatpush3.bf16.msra.mxu1 %v7540_v55  ;;  %v8658_v55 = vpop.f32.mrf.mxu1 }
 0x1b8   :  { %9647 = vst [vmem:[#allocation16_spill] sm:$0xff] %v8606_v54  ;;  %6774 = vmatprep.subr.bf16.mxu1 %v7763_v4 }
 0x1b9   :  { %v8611_v60 = vpop.f32.mrf.mxu0  ;;  %6811 = vmatpush3.bf16.msra.mxu0 %v7546_v47 }
 0x1ba   :  { %9648 = vst [vmem:[#allocation17_spill] sm:$0xff] %v8611_v60  ;;  %6812 = vmatprep.subr.bf16.mxu0 %v7763_v4  ;;  %v7547_v60 = vld [vmem:[%s9627_s5 + $0xa0] sm:$0xff]  }
 0x1bb   :  { %v8616_v29 = vpop.f32.mrf.mxu0  ;;  %6775 = vmatpush3.bf16.msra.mxu1 %v7541_v23  ;;  %v6420_v23 = vadd.f32 %v8512_v2, %v8510_v59  ;;  %v7552_v59 = vld [vmem:[%s9627_s5 + $0x80] sm:$0xff]  }
 0x1bc   :  { %9650 = vst [vmem:[#allocation19_spill] sm:$0xff] %v8616_v29  ;;  %6776 = vmatprep.subr.bf16.mxu1 %v7763_v4 }
 0x1bd   :  { %v8621_v15 = vpop.f32.mrf.mxu0  ;;  %6813 = vmatpush3.bf16.msra.mxu0 %v7547_v60  ;;  %v1915_v29 = vadd.f32 %v6420_v23, %v8517_v62 }
 0x1be   :  { %9651 = vst [vmem:[#allocation20_spill] sm:$0xff] %v8621_v15  ;;  %6814 = vmatprep.subr.bf16.mxu0 %v7763_v4 }
 0x1bf   :  { %v8626_v36 = vpop.f32.mrf.mxu0  ;;  %6777 = vmatpush3.bf16.msra.mxu1 %v7542_v48  ;;  %v7549_v48 = vld [vmem:[%s9627_s5 + $0x40] sm:$0xff]  }
 0x1c0   :  { %9653 = vst [vmem:[#allocation22_spill] sm:$0xff] %v8626_v36  ;;  %6778 = vmatprep.subr.bf16.mxu1 %v7763_v4 }
 0x1c1   :  { %v8634_v3 = vpop.f32.mrf.mxu0  ;;  %6815 = vmatpush3.bf16.msra.mxu0 %v7548_v8  ;;  %v8672_v8 = vpop.f32.mrf.mxu1 }
 0x1c2   :  { %9654 = vst [vmem:[#allocation23_spill] sm:$0xff] %v8634_v3  ;;  %6816 = vmatprep.subr.bf16.mxu0 %v7763_v4  ;;  %v7550_v3 = vld [vmem:[%s9627_s5 + $0x90] sm:$0xff]   ;;  %9655 = vst [vmem:[#allocation24_spill] sm:$0xff] %v8672_v8 }
 0x1c3   :  { %v8640_v13 = vpop.f32.mrf.mxu0  ;;  %6779 = vmatpush3.bf16.msra.mxu1 %v7545_v52  ;;  %v8696_v30 = vpop.f32.mrf.mxu1  ;;  %v1918_v52 = vadd.f32 %v6423_v38, %v8528_v17 }
 0x1c4   :  { %6780 = vmatprep.subr.bf16.mxu1 %v7763_v4 }
 0x1c5   :  { %v2019_v54 = vpop.f32.mrf.mxu0  ;;  %6817 = vmatpush3.bf16.msra.mxu0 %v7550_v3 }
 0x1c6   :  { %6818 = vmatprep.subr.bf16.mxu0 %v7763_v4  ;;  %v2020_v2 = vadd.f32 %v2019_v54, %v8477_v10 }
 0x1c7   :  { %v6741_v47 = vpop.f32.mrf.mxu0  ;;  %6781 = vmatpush3.bf16.msra.mxu1 %v7549_v48 }
 0x1c8   :  { %v8702_v10 = vadd.f32 %v6741_v47, %v8486_v49  ;;  %6786 = vmatprep.subr.bf16.mxu1 %v7763_v4 }
 0x1c9   :  { %v2022_v44 = vpop.f32.mrf.mxu0  ;;  %6819 = vmatpush3.bf16.msra.mxu0 %v7551_v18 }
 0x1ca   :  { %6820 = vmatprep.subr.bf16.mxu0 %v7763_v4  ;;  %v2023_v62 = vadd.f32 %v2022_v44, %v8480_v25  ;;  %v1931_v44 = vadd.f32 %v6432_v7, %v8549_v34  ;;  %v6435_v25 = vadd.f32 %v8553_v51, %v8551_v46  ;;  %v6444_v34 = vadd.f32 %v8580_v50, %v8575_v40 }
 0x1cb   :  { %v8662_v60 = vpop.f32.mrf.mxu0  ;;  %v6447_v50 = vadd.f32 %v8590_v61, %v8585_v5 }
 0x1cc   :  { %v1947_v40 = vadd.f32 %v6444_v34, %v8573_v31  ;;  %v6456_v31 = vadd.f32 %v8648_v35, %v8636_v33  ;;  %v9658_v33 = vld [vmem:[#allocation20_spill] sm:$0xff]  ;;  %v9665_v34 = vld [vmem:[#allocation22_spill] sm:$0xff] }
 0x1cd   :  { %v2035_v36 = vpop.f32.mrf.mxu0  ;;  %6821 = vmatpush3.bf16.msra.mxu0 %v7552_v59 }
 0x1ce   :  { %6846 = vmatprep.subr.bf16.mxu0 %v7763_v4  ;;  %v2036_v17 = vadd.f32 %v2035_v36, %v8489_v63  ;;  %v6429_v63 = vadd.f32 %v8539_v32, %v8537_v57  ;;  %v1923_v36 = vadd.f32 %v6426_v39, %v8535_v26  ;;  %v6438_v57 = vadd.f32 %v8560_v0, %v8558_v58 }
 0x1cf   :  { %v6745_v41 = vpop.f32.mrf.mxu0  ;;  %v6441_v58 = vadd.f32 %v8570_v21, %v8565_v6 }
 0x1d0   :  { %v2047_v3 = vadd.f32 %v6745_v41, %v8504_v1  ;;  %v8709_v41 = vpop.f32.mrf.mxu1  ;;  %v1926_v26 = vadd.f32 %v6429_v63, %v8542_v24  ;;  %v1939_v24 = vadd.f32 %v6438_v57, %v8563_v53  ;;  %v9656_v53 = vld [vmem:[#allocation24_spill] sm:$0xff]  ;;  %v9663_v63 = vld [vmem:[#allocation15_spill] sm:$0xff] }
 0x1d1   :  { %v2038_v28 = vpop.f32.mrf.mxu0  ;;  %v1942_v21 = vadd.f32 %v6441_v58, %v8568_v16  ;;  %v9668_v57 = vld [vmem:[#allocation8_spill] sm:$0xff]  ;;  %v5428_v58 = vld [vmem:[%s9628_s2] ss:$0 sm:$0xff] }
 0x1d2   :  { %v2130_v15 = vmax.f32 %v2020_v2, %v2047_v3  ;;  %v8723_v47 = vpop.f32.mrf.mxu1  ;;  %v2039_v59 = vadd.f32 %v2038_v28, %v8497_v14  ;;  %v2044_v28 = vadd.f32 %v8662_v60, %v8501_v27  ;;  %v1950_v27 = vadd.f32 %v6447_v50, %v8578_v43  ;;  %v9659_v43 = vld [vmem:[#allocation12_spill] sm:$0xff] }
 0x1d3   :  { %v6748_v8 = vpop.f32.mrf.mxu0 }
 0x1d4   :  { %v8704_v1 = vadd.f32 %v6748_v8, %v1915_v29  ;;  %v8733_v51 = vpop.f32.mrf.mxu1 }
 0x1d5   :  { %v2051_v12 = vpop.f32.mrf.mxu0 }
 0x1d6   :  { %v2133_v18 = vmax.f32 %v8702_v10, %v8704_v1  ;;  %v2052_v49 = vadd.f32 %v2051_v12, %v8507_v11  ;;  %v2028_v11 = vadd.f32 %v8640_v13, %v8483_v37  ;;  %v6466_v14 = vpop.f32.mrf.mxu1  ;;  %v2172_v10 = vlaneseq  ;;  %v9670_v1 = vld [vmem:[#allocation6_spill] sm:$0xff] }
 0x1d7   :  { %v6749_v54 = vpop.f32.mrf.mxu0 }
 0x1d8   :  { %v2131_v45 = vmax.f32 %v2023_v62, %v2052_v49  ;;  %v2063_v29 = vadd.f32 %v6749_v54, %v1918_v52  ;;  %v6467_v49 = vpop.f32.mrf.mxu1  ;;  %v6450_v54 = vadd.f32 %v8604_v56, %v8595_v9 }
 0x1d9   :  { %v2054_v38 = vpop.f32.mrf.mxu0 }
 0x1da   :  { %v2134_v23 = vmax.f32 %v2036_v17, %v2063_v29  ;;  %v2055_v8 = vadd.f32 %v2054_v38, %v8514_v19  ;;  %v1934_v19 = vadd.f32 %v6435_v25, %v8556_v42  ;;  %v6459_v17 = vadd.f32 %v9656_v53, %v8658_v55  ;;  %v9657_v29 = vld [vmem:[#allocation19_spill] sm:$0xff]  ;;  %v6469_v38 = vpop.f32.mrf.mxu1 }
 0x1db   :  { %v6752_v48 = vpop.f32.mrf.mxu0  ;;  %v6368_v35 = vadd.f32 %v9658_v33, %v9657_v29  ;;  %v2173_v53 = vshrl.u32 %v2172_v10, 7  ;;  %v9674_v29 = vld [vmem:[#allocation7_spill] sm:$0xff]  ;;  %v6465_v33 = vadd.f32 %v8733_v51, %v8723_v47 }
 0x1dc   :  { %v2132_v20 = vmax.f32 %v2028_v11, %v2055_v8  ;;  %v2076_v22 = vadd.f32 %v6752_v48, %v1931_v44  ;;  %v1963_v11 = vadd.f32 %v6456_v31, %v9659_v43  ;;  %v9661_v8 = vld [vmem:[#allocation21_spill] sm:$0xff] }
 0x1dd   :  { %v2067_v46 = vpop.f32.mrf.mxu0  ;;  %v9662_v48 = vld [vmem:[#allocation13_spill] sm:$0xff] }
 0x1de   :  { %v8736_v37 = vmax.f32 %v2130_v15, %v2076_v22  ;;  %v2068_v13 = vadd.f32 %v2067_v46, %v1923_v36  ;;  %v6362_v16 = vadd.f32 %v9663_v63, %v9662_v48  ;;  %v9664_v22 = vld [vmem:[#allocation10_spill] sm:$0xff]  ;;  %v9666_v46 = vld [vmem:[#allocation23_spill] sm:$0xff] }
 0x1df   :  { %v6753_v2 = vpop.f32.mrf.mxu0  ;;  %v1955_v36 = vadd.f32 %v6450_v54, %v9664_v22 }
 0x1e0   :  { %v2135_v32 = vmax.f32 %v2039_v59, %v2068_v13  ;;  %v2079_v3 = vadd.f32 %v6753_v2, %v1934_v19  ;;  %v6371_v59 = vadd.f32 %v9666_v46, %v9665_v34  ;;  %v9667_v19 = vld [vmem:[#allocation14_spill] sm:$0xff]  ;;  %v2179_v34 = vadd.s32 48, %v2173_v53 }
 0x1e1   :  { %v2070_v7 = vpop.f32.mrf.mxu0  ;;  %v1966_v2 = vadd.f32 %v6459_v17, %v9667_v19 }
 0x1e2   :  { %v2138_v15 = vmax.f32 %v2131_v45, %v2079_v3  ;;  %v2071_v42 = vadd.f32 %v2070_v7, %v1926_v26  ;;  %v6468_v3 = vadd.f32 %v6467_v49, %v6466_v14  ;;  %v6470_v26 = vpop.f32.mrf.mxu1  ;;  %v9672_v14 = vld [vmem:[#allocation17_spill] sm:$0xff]  ;;  %vm2186_vm1 = vcmp.lt.s32.totalorder %v2179_v34, 50 }
 0x1e3   :  { %v6756_v12 = vpop.f32.mrf.mxu0 }
 0x1e4   :  { %v2136_v0 = vmax.f32 %v2044_v28, %v2071_v42  ;;  %v2092_v52 = vadd.f32 %v6756_v12, %v1947_v40  ;;  %v9669_v28 = vld [vmem:[#allocation11_spill] sm:$0xff]  ;;  %v6462_v12 = vadd.f32 %v8709_v41, %v8696_v30 }
 0x1e5   :  { %v2083_v62 = vpop.f32.mrf.mxu0 }
 0x1e6   :  { %v8752_v5 = vmax.f32 %v2134_v23, %v2092_v52  ;;  %v2084_v61 = vadd.f32 %v2083_v62, %v1939_v24  ;;  %v9660_v23 = vld [vmem:[#allocation18_spill] sm:$0xff]  ;;  %v9671_v62 = vld [vmem:[#allocation16_spill] sm:$0xff] }
 0x1e7   :  { %v6757_v60 = vpop.f32.mrf.mxu0  ;;  %v6453_v9 = vadd.f32 %v9661_v8, %v9660_v23  ;;  %v6365_v31 = vadd.f32 %v9672_v14, %v9671_v62 }
 0x1e8   :  { %v2139_v39 = vmax.f32 %v2132_v20, %v2084_v61  ;;  %v2095_v6 = vadd.f32 %v6757_v60, %v1950_v27  ;;  %v6471_v61 = vadd.f32 %v6470_v26, %v6469_v38 }
 0x1e9   :  { %v2086_v45 = vpop.f32.mrf.mxu0  ;;  %v1958_v42 = vadd.f32 %v6453_v9, %v9669_v28 }
 0x1ea   :  { %v8762_v44 = vmax.f32 %v2135_v32, %v2095_v6  ;;  %v2087_v25 = vadd.f32 %v2086_v45, %v1942_v21  ;;  %v1834_v32 = vadd.f32 %v6368_v35, %v9668_v57 }
 0x1eb   :  { %v6760_v56 = vpop.f32.mrf.mxu0 }
 0x1ec   :  { %v2140_v55 = vmax.f32 %v2133_v18, %v2087_v25  ;;  %v2108_v20 = vadd.f32 %v6760_v56, %v1963_v11  ;;  %v1826_v18 = vadd.f32 %v6362_v16, %v9670_v1  ;;  %v1979_v6 = vadd.f32 %v6468_v3, %v1834_v32 }
 0x1ed   :  { %v2099_v13 = vpop.f32.mrf.mxu0  ;;  %v5429_v32 = vsel %vm2186_vm1, 1.0, %v7763_v4 }
 0x1ee   :  { %v2145_v7 = vmax.f32 %v2138_v15, %v2108_v20  ;;  %v2100_v40 = vadd.f32 %v2099_v13, %v1955_v36  ;;  %v9673_v15 = vld [vmem:[#allocation9_spill] sm:$0xff]  ;;  %v1971_v45 = vadd.f32 %v6462_v12, %v1826_v18 }
 0x1ef   :  { %v6761_v50 = vpop.f32.mrf.mxu0  ;;  %v1837_v49 = vadd.f32 %v6371_v59, %v9673_v15 }
 0x1f0   :  { %v2143_v52 = vmax.f32 %v2136_v0, %v2100_v40  ;;  %v2111_v24 = vadd.f32 %v6761_v50, %v1966_v2  ;;  %v2159_v17 = vadd.f32 %v5428_v58, %v2145_v7  ;;  %v1829_v0 = vadd.f32 %v6365_v31, %v9674_v29 }
 0x1f1   :  { %v2102_v27 = vpop.f32.mrf.mxu0  ;;  %v1982_v25 = vadd.f32 %v6471_v61, %v1837_v49 }
 0x1f2   :  { %v2146_v60 = vmax.f32 %v2139_v39, %v2111_v24  ;;  %v2103_v54 = vadd.f32 %v2102_v27, %v1958_v42  ;;  %v2166_v8 = vmax.f32 %v2159_v17, 0.0 }
 0x1f3   :  { %v6764_v21 = vpop.f32.mrf.mxu0 }
 0x1f4   :  { %v2144_v30 = vmax.f32 %v8736_v37, %v2103_v54  ;;  %v2124_v41 = vadd.f32 %v6764_v21, %v1979_v6  ;;  %v2160_v43 = vadd.f32 %v5428_v58, %v2146_v60  ;;  %v1974_v37 = vadd.f32 %v6465_v33, %v1829_v0 }
 0x1f5   :  { %v2115_v35 = vpop.f32.mrf.mxu0 }
 0x1f6   :  { %v2158_v38 = vadd.f32 %v5428_v58, %v2144_v30  ;;  %v2149_v39 = vmax.f32 %v8762_v44, %v2124_v41  ;;  %v2116_v11 = vadd.f32 %v2115_v35, %v1971_v45  ;;  %v2167_v16 = vmax.f32 %v2160_v43, 0.0 }
 0x1f7   :  { %v6765_v23 = vpop.f32.mrf.mxu0 }
 0x1f8   :  { %v2165_v9 = vmax.f32 %v2158_v38, 0.0  ;;  %v2147_v56 = vmax.f32 %v2140_v55, %v2116_v11  ;;  %v2127_v48 = vadd.f32 %v6765_v23, %v1982_v25  ;;  %v2163_v19 = vadd.f32 %v5428_v58, %v2149_v39 }
 0x1f9   :  { %v2118_v63 = vpop.f32.mrf.mxu0 }
 0x1fa   :  { %v2208_v20 = vadd.f32 %v2166_v8, %v2165_v9  ;;  %v2161_v22 = vadd.f32 %v5428_v58, %v2147_v56  ;;  %v2150_v36 = vmax.f32 %v2143_v52, %v2127_v48  ;;  %v2119_v47 = vadd.f32 %v2118_v63, %v1974_v37 }
 0x1fb   :  { %v2170_v3 = vmax.f32 %v2163_v19, 0.0 }
 0x1fc   :  { %v2168_v51 = vmax.f32 %v2161_v22, 0.0  ;;  %v2209_v46 = vadd.f32 %v2208_v20, %v2167_v16  ;;  %v2164_v59 = vadd.f32 %v5428_v58, %v2150_v36  ;;  %v2148_v13 = vmax.f32 %v8752_v5, %v2119_v47  ;;  %v5431_v36 = vld [vmem:[%s9630_s4] ss:$0 sm:$0xff] }
 0x1fe   :  { %v2210_v44 = vadd.f32 %v2209_v46, %v2168_v51  ;;  %v2162_v2 = vadd.f32 %v5428_v58, %v2148_v13  ;;  %v2171_v57 = vmax.f32 %v2164_v59, 0.0 }
 0x200   :  { %v2169_v55 = vmax.f32 %v2162_v2, 0.0  ;;  %v2207_v7 = vmul.f32 %v5429_v32, %v2171_v57 }
 0x202   :  { %v2211_v26 = vadd.f32 %v2210_v44, %v2169_v55 }
 0x204   :  { %v2212_v40 = vadd.f32 %v2211_v26, %v2170_v3 }
 0x206   :  { %v2213_v50 = vadd.f32 %v2212_v40, %v2207_v7 }
 0x208   :  { %v2214_v28 = vrot.slane %v2213_v50, 4 }
 0x20a   :  { %v2215_v42 = vadd.f32 %v2214_v28, %v2213_v50 }
 0x20c   :  { %v2216_v10 = vrot.slane %v2215_v42, 2 }
 0x20e   :  { %v2217_v1 = vadd.f32 %v2216_v10, %v2215_v42  ;;  %v7554_v10 = vld [vmem:[%s9627_s5 + $0x38] sm:$0xff]  }
 0x210   :  { %v2218_v18 = vrot.slane %v2217_v1, 1 }
 0x212   :  { %v2219_v12 = vadd.f32 %v2218_v18, %v2217_v1 }
 0x214   :  { %v2220_v5 = vmul.f32 0.02, %v2219_v12  ;;  %v7556_v12 = vld [vmem:[%s9627_s5 + $0x138] sm:$0xff]  }
 0x216   :  { %v2221_v52 = vsub.f32 %v2165_v9, %v2220_v5  ;;  %v2222_v24 = vsub.f32 %v2166_v8, %v2220_v5  ;;  %v2223_v62 = vsub.f32 %v2167_v16, %v2220_v5  ;;  %v2224_v58 = vsub.f32 %v2168_v51, %v2220_v5  ;;  %v5430_v9 = vld [vmem:[%s9629_s3] ss:$0 sm:$0xff] }
 0x217   :  { %v2225_v14 = vsub.f32 %v2169_v55, %v2220_v5  ;;  %v2226_v31 = vsub.f32 %v2170_v3, %v2220_v5  ;;  %v2227_v15 = vsub.f32 %v2171_v57, %v2220_v5 }
 0x218   :  { %v2235_v49 = vmul.f32 %v2221_v52, %v2221_v52  ;;  %v2236_v61 = vmul.f32 %v2222_v24, %v2222_v24  ;;  %v2237_v27 = vmul.f32 %v2223_v62, %v2223_v62  ;;  %v2238_v54 = vmul.f32 %v2224_v58, %v2224_v58 }
 0x219   :  { %v2234_v21 = vmul.f32 %v5429_v32, %v2227_v15  ;;  %v2239_v53 = vmul.f32 %v2225_v14, %v2225_v14  ;;  %v2240_v30 = vmul.f32 %v2226_v31, %v2226_v31 }
 0x21a   :  { %v2242_v60 = vadd.f32 %v2236_v61, %v2235_v49  ;;  %v7564_v49 = vld [vmem:[%s9627_s5 + $0x118] sm:$0xff]   ;;  %v7565_v61 = vld [vmem:[%s9627_s5 + $0x10] sm:$0xff]  }
 0x21b   :  { %v2241_v45 = vmul.f32 %v2234_v21, %v2234_v21  ;;  %v7570_v21 = vld [vmem:[%s9627_s5 + $0x100] sm:$0xff]  }
 0x21c   :  { %v2243_v6 = vadd.f32 %v2242_v60, %v2237_v27  ;;  %v7566_v27 = vld [vmem:[%s9627_s5 + $0x110] sm:$0xff]   ;;  %v7567_v60 = vld [vmem:[%s9627_s5 + $0x8] sm:$0xff]  }
 0x21e   :  { %v2244_v17 = vadd.f32 %v2243_v6, %v2238_v54  ;;  %v7568_v54 = vld [vmem:[%s9627_s5 + $0x108] sm:$0xff]   ;;  %v7569_v6 = vld [vmem:[%s9627_s5] sm:$0xff]  }
 0x220   :  { %v2245_v41 = vadd.f32 %v2244_v17, %v2239_v53  ;;  %v7571_v53 = vld [vmem:[%s9627_s5 + $0xf8] sm:$0xff]  }
 0x221   :  { %v7572_v17 = vld [vmem:[%s9627_s5 + $0x1b8] sm:$0xff]  }
 0x222   :  { %v2246_v29 = vadd.f32 %v2245_v41, %v2240_v30 }
 0x224   :  { %v2247_v0 = vadd.f32 %v2246_v29, %v2241_v45  ;;  %v7573_v45 = vld [vmem:[%s9627_s5 + $0xf0] sm:$0xff]  }
 0x225   :  { %v7574_v29 = vld [vmem:[%s9627_s5 + $0x1b0] sm:$0xff]  }
 0x226   :  { %v2248_v33 = vrot.slane %v2247_v0, 4 }
 0x228   :  { %v2249_v35 = vadd.f32 %v2248_v33, %v2247_v0  ;;  %v7575_v0 = vld [vmem:[%s9627_s5 + $0xe8] sm:$0xff]  }
 0x229   :  { %v7576_v33 = vld [vmem:[%s9627_s5 + $0x1a8] sm:$0xff]  }
 0x22a   :  { %v2250_v25 = vrot.slane %v2249_v35, 2 }
 0x22c   :  { %v2251_v43 = vadd.f32 %v2250_v25, %v2249_v35  ;;  %v7577_v35 = vld [vmem:[%s9627_s5 + $0xe0] sm:$0xff]  }
 0x22d   :  { %v7578_v25 = vld [vmem:[%s9627_s5 + $0x1a0] sm:$0xff]  }
 0x22e   :  { %v2252_v38 = vrot.slane %v2251_v43, 1 }
 0x230   :  { %v2253_v39 = vadd.f32 %v2252_v38, %v2251_v43  ;;  %v7579_v43 = vld [vmem:[%s9627_s5 + $0xd8] sm:$0xff]  }
 0x231   :  { %v7580_v38 = vld [vmem:[%s9627_s5 + $0x198] sm:$0xff]  }
 0x232   :  { %v2254_v11 = vmul.f32 0.02, %v2253_v39  ;;  %v7581_v39 = vld [vmem:[%s9627_s5 + $0xd0] sm:$0xff]  }
 0x234   :  { %v2255_v23 = vadd.f32 1e-05, %v2254_v11  ;;  %v7582_v11 = vld [vmem:[%s9627_s5 + $0x190] sm:$0xff]  }
 0x236   :  { %7757 = vrsqrt.f32 %v2255_v23  ;;  %v7583_v23 = vld [vmem:[%s9627_s5 + $0xc8] sm:$0xff]  }
 0x243   :  { %v7758_v8 = vpop.eup %7757 }
 0x244   :  { %v2257_v56 = vmul.f32 %v7758_v8, %v2221_v52  ;;  %v2258_v48 = vmul.f32 %v7758_v8, %v2222_v24  ;;  %v2259_v37 = vmul.f32 %v7758_v8, %v2223_v62  ;;  %v2260_v63 = vmul.f32 %v7758_v8, %v2224_v58  ;;  %v7557_v52 = vld [vmem:[%s9627_s5 + $0x30] sm:$0xff]   ;;  %v7559_v62 = vld [vmem:[%s9627_s5 + $0x28] sm:$0xff]  }
 0x245   :  { %v2261_v16 = vmul.f32 %v7758_v8, %v2225_v14  ;;  %v2262_v20 = vmul.f32 %v7758_v8, %v2226_v31  ;;  %v2263_v22 = vmul.f32 %v7758_v8, %v2227_v15  ;;  %v7558_v24 = vld [vmem:[%s9627_s5 + $0x130] sm:$0xff]   ;;  %v7560_v58 = vld [vmem:[%s9627_s5 + $0x128] sm:$0xff]   ;;  %v7561_v14 = vld [vmem:[%s9627_s5 + $0x20] sm:$0xff]  }
 0x246   :  { %v2271_v34 = vmul.f32 %v5430_v9, %v2257_v56  ;;  %v2272_v47 = vmul.f32 %v5430_v9, %v2258_v48  ;;  %v2273_v51 = vmul.f32 %v5430_v9, %v2259_v37  ;;  %v2274_v46 = vmul.f32 %v5430_v9, %v2260_v63  ;;  %v7562_v31 = vld [vmem:[%s9627_s5 + $0x120] sm:$0xff]   ;;  %v7563_v15 = vld [vmem:[%s9627_s5 + $0x18] sm:$0xff]   ;;  %v7584_v8 = vld [vmem:[%s9627_s5 + $0x188] sm:$0xff]  }
 0x247   :  { %v2275_v59 = vmul.f32 %v5430_v9, %v2261_v16  ;;  %v2276_v13 = vmul.f32 %v5430_v9, %v2262_v20  ;;  %v2277_v44 = vmul.f32 %v5430_v9, %v2263_v22  ;;  %v7585_v9 = vld [vmem:[%s9627_s5 + $0xc0] sm:$0xff]   ;;  %v7589_v63 = vld [vmem:[%s9627_s5 + $0x178] sm:$0xff]  }
 0x248   :  { %v2285_v19 = vadd.f32 %v5431_v36, %v2271_v34  ;;  %v2286_v2 = vadd.f32 %v5431_v36, %v2272_v47  ;;  %v2287_v57 = vadd.f32 %v5431_v36, %v2273_v51  ;;  %v2288_v55 = vadd.f32 %v5431_v36, %v2274_v46  ;;  %v7586_v56 = vld [vmem:[%s9627_s5 + $0x180] sm:$0xff]   ;;  %v7590_v20 = vld [vmem:[%s9627_s5 + $0x238] sm:$0xff]   ;;  %v7592_v34 = vld [vmem:[%s9627_s5 + $0x230] sm:$0xff]  }
 0x249   :  { %v2289_v32 = vadd.f32 %v5431_v36, %v2275_v59  ;;  %v2290_v3 = vadd.f32 %v5431_v36, %v2276_v13  ;;  %v2291_v26 = vadd.f32 %v5431_v36, %v2277_v44  ;;  %v7591_v36 = vld [vmem:[%s9627_s5 + $0x170] sm:$0xff]   ;;  %v7593_v47 = vld [vmem:[%s9627_s5 + $0x168] sm:$0xff]   ;;  %v7595_v46 = vld [vmem:[%s9627_s5 + $0x160] sm:$0xff]  }
 0x24a   :  { %v6058_v7 = vpack.c.bf16 %v2286_v2, %v2285_v19  ;;  %v6063_v40 = vpack.c.bf16 %v2288_v55, %v2287_v57  ;;  %v7594_v51 = vld [vmem:[%s9627_s5 + $0x228] sm:$0xff]   ;;  %v7596_v59 = vld [vmem:[%s9627_s5 + $0x220] sm:$0xff]   ;;  %v7597_v13 = vld [vmem:[%s9627_s5 + $0x158] sm:$0xff]  }
 0x24b   :  { %v6054_v50 = vpack.c.bf16 %v2291_v26, %v2291_v26  ;;  %v6068_v28 = vpack.c.bf16 %v2290_v3, %v2289_v32  ;;  %v7598_v44 = vld [vmem:[%s9627_s5 + $0x218] sm:$0xff]   ;;  %v7599_v19 = vld [vmem:[%s9627_s5 + $0x150] sm:$0xff]   ;;  %v7601_v57 = vld [vmem:[%s9627_s5 + $0x148] sm:$0xff]  }
 0x24c   :  { %6059 = vst [vmem:[#allocation2] sm:$0xff] %v6058_v7   ;;  %6070 = vst [vmem:[#allocation2 + $0x8] sm:$0xff] %v6063_v40   ;;  %v7600_v2 = vld [vmem:[%s9627_s5 + $0x210] sm:$0xff]   ;;  %v7602_v55 = vld [vmem:[%s9627_s5 + $0x208] sm:$0xff]  }
 0x24d   :  { %6071 = vst [vmem:[#allocation2 + $0x10] sm:$0xff] %v6068_v28   ;;  %2327 = vst [vmem:[#allocation2 + $0x18] sm:$0xf] %v6054_v50  ;;  %v7603_v32 = vld [vmem:[%s9627_s5 + $0x140] sm:$0xff]   ;;  %v7606_v7 = vld [vmem:[%s9627_s5 + $0x1f8] sm:$0xff]  }
 0x24e   :  { %v7604_v3 = vld [vmem:[%s9627_s5 + $0x200] sm:$0xff]   ;;  %v7607_v50 = vld [vmem:[%s9627_s5 + $0x2b8] sm:$0xff]  }
 0x253   :  { %v7553_v42 = vld [vmem:[#allocation2] ss:$0 sps:$4 sm:$0x22]   ;;  %v2768_v41 = vld [vmem:[#allocation2 + $0x4] sm:$0x1] }
 0x254   :  { %v7555_v1 = vld [vmem:[#allocation2] ss:$0 sps:$4 sm:$0x44]   ;;  %v2366_v18 = vrot.slane %v7553_v42, 1  ;;  %v3211_v28 = vld [vmem:[#allocation2 + $0x8] sm:$0x1] }
 0x255   :  { %v2565_v5 = vrot.slane %v7555_v1, 2  ;;  %v2328_v30 = vld [vmem:[#allocation2] sm:$0x1]  ;;  %v7588_v37 = vld [vmem:[#allocation2 + $0x4] ss:$0 sps:$4 sm:$0x44]  }
 0x256   :  { %6783 = vmatmul.mubr.bf16.vlgmr.msra.gmra.mxu1 %v2366_v18  ;;  %v7587_v48 = vld [vmem:[#allocation2] ss:$0 sps:$4 sm:$0x88]   ;;  %v3008_v22 = vrot.slane %v7588_v37, 2  ;;  %v7608_v42 = vld [vmem:[%s9627_s5 + $0x1f0] sm:$0xff]   ;;  %v7610_v1 = vld [vmem:[%s9627_s5 + $0x1e8] sm:$0xff]  }
 0x257   :  { %6787 = vmatpush3.bf16.msra.mxu1 %v7554_v10  ;;  %6823 = vmatmul.mubr.bf16.vlgmr.msra.gmra.mxu0 %v2565_v5  ;;  %v2677_v16 = vrot.slane %v7587_v48, 3  ;;  %v7605_v26 = vld [vmem:[#allocation2 + $0x4] ss:$0 sps:$4 sm:$0x22]   ;;  %v7609_v10 = vld [vmem:[%s9627_s5 + $0x2b0] sm:$0xff]   ;;  %v7611_v18 = vld [vmem:[%s9627_s5 + $0x2a8] sm:$0xff]  }
 0x258   :  { %6847 = vmatpush3.bf16.msra.mxu0 %v7556_v12  ;;  %6788 = vmatprep.subr.bf16.mxu1 %v7763_v4  ;;  %v2896_v40 = vrot.slane %v7605_v26, 1  ;;  %v7612_v12 = vld [vmem:[%s9627_s5 + $0x1e0] sm:$0xff]   ;;  %v3654_v48 = vld [vmem:[#allocation2 + $0xc] sm:$0x1]  ;;  %v7643_v37 = vld [vmem:[%s9627_s5 + $0x2f0] sm:$0xff]  }
 0x259   :  { %6848 = vmatprep.subr.bf16.mxu0 %v7763_v4  ;;  %6802 = vmatprep.mubr.msk.bf16.mxu1 %vm7764_vm0, %v7763_v4  ;;  %v7613_v5 = vld [vmem:[%s9627_s5 + $0x2a0] sm:$0xff]  }
 0x25a   :  { %6862 = vmatprep.mubr.msk.bf16.mxu0 %vm7764_vm0, %v7763_v4 }
 0x25b   :  { %6789 = vmatpush3.bf16.msra.mxu1 %v7557_v52  ;;  %v7614_v52 = vld [vmem:[%s9627_s5 + $0x1d8] sm:$0xff]  }
 0x25c   :  { %6849 = vmatpush3.bf16.msra.mxu0 %v7558_v24  ;;  %6790 = vmatprep.subr.bf16.mxu1 %v7763_v4  ;;  %v7615_v24 = vld [vmem:[%s9627_s5 + $0x298] sm:$0xff]  }
 0x25d   :  { %6850 = vmatprep.subr.bf16.mxu0 %v7763_v4 }
 0x25f   :  { %6791 = vmatpush3.bf16.msra.mxu1 %v7559_v62  ;;  %v7616_v62 = vld [vmem:[%s9627_s5 + $0x1d0] sm:$0xff]  }
 0x260   :  { %6851 = vmatpush3.bf16.msra.mxu0 %v7560_v58  ;;  %6792 = vmatprep.subr.bf16.mxu1 %v7763_v4  ;;  %v7617_v58 = vld [vmem:[%s9627_s5 + $0x290] sm:$0xff]  }
 0x261   :  { %6852 = vmatprep.subr.bf16.mxu0 %v7763_v4 }
 0x263   :  { %6793 = vmatpush3.bf16.msra.mxu1 %v7561_v14  ;;  %v7618_v14 = vld [vmem:[%s9627_s5 + $0x1c8] sm:$0xff]  }
 0x264   :  { %6853 = vmatpush3.bf16.msra.mxu0 %v7562_v31  ;;  %6794 = vmatprep.subr.bf16.mxu1 %v7763_v4  ;;  %v7619_v31 = vld [vmem:[%s9627_s5 + $0x288] sm:$0xff]  }
 0x265   :  { %6854 = vmatprep.subr.bf16.mxu0 %v7763_v4 }
 0x267   :  { %6795 = vmatpush3.bf16.msra.mxu1 %v7563_v15  ;;  %v7620_v15 = vld [vmem:[%s9627_s5 + $0x1c0] sm:$0xff]  }
 0x268   :  { %6855 = vmatpush3.bf16.msra.mxu0 %v7564_v49  ;;  %6796 = vmatprep.subr.bf16.mxu1 %v7763_v4  ;;  %v7621_v49 = vld [vmem:[%s9627_s5 + $0x280] sm:$0xff]  }
 0x269   :  { %6856 = vmatprep.subr.bf16.mxu0 %v7763_v4 }
 0x26b   :  { %6797 = vmatpush3.bf16.msra.mxu1 %v7565_v61  ;;  %v7622_v61 = vld [vmem:[#allocation2 + $0x4] ss:$0 sps:$4 sm:$0x88]  }
 0x26c   :  { %6857 = vmatpush3.bf16.msra.mxu0 %v7566_v27  ;;  %6798 = vmatprep.subr.bf16.mxu1 %v7763_v4  ;;  %v7623_v27 = vld [vmem:[#allocation2 + $0x8] ss:$0 sps:$4 sm:$0x44]  }
 0x26d   :  { %6858 = vmatprep.subr.bf16.mxu0 %v7763_v4 }
 0x26f   :  { %6799 = vmatpush3.bf16.msra.mxu1 %v7567_v60  ;;  %v7624_v60 = vld [vmem:[%s9627_s5 + $0x278] sm:$0xff]  }
 0x270   :  { %6859 = vmatpush3.bf16.msra.mxu0 %v7568_v54  ;;  %6800 = vmatprep.subr.bf16.mxu1 %v7763_v4  ;;  %v3120_v54 = vrot.slane %v7622_v61, 3  ;;  %v7671_v61 = vld [vmem:[%s9627_s5 + $0x348] sm:$0xff]  }
 0x271   :  { %6860 = vmatprep.subr.bf16.mxu0 %v7763_v4 }
 0x273   :  { %6801 = vmatpush3.bf16.msra.mxu1 %v7569_v6  ;;  %v7625_v6 = vld [vmem:[%s9627_s5 + $0x338] sm:$0xff]  }
 0x274   :  { %6861 = vmatpush3.bf16.msra.mxu0 %v7570_v21  ;;  %6826 = vmatprep.subr.bf16.mxu1 %v7763_v4  ;;  %v3451_v21 = vrot.slane %v7623_v27, 2  ;;  %v7672_v27 = vld [vmem:[%s9627_s5 + $0x408] sm:$0xff]  }
 0x275   :  { %6886 = vmatprep.subr.bf16.mxu0 %v7763_v4 }
 0x276   :  { %6803 = vmatmul.mubr.bf16.vlgmr.msra.gmra.mxu1 %v2328_v30  ;;  %v7628_v30 = vld [vmem:[%s9627_s5 + $0x268] sm:$0xff]  }
 0x277   :  { %6863 = vmatmul.mubr.bf16.vlgmr.msra.gmra.mxu0 %v2768_v41  ;;  %6827 = vmatpush3.bf16.msra.mxu1 %v7571_v53  ;;  %v7626_v53 = vld [vmem:[%s9627_s5 + $0x270] sm:$0xff]   ;;  %v7629_v41 = vld [vmem:[%s9627_s5 + $0x328] sm:$0xff]  }
 0x278   :  { %6887 = vmatpush3.bf16.msra.mxu0 %v7572_v17  ;;  %6828 = vmatprep.subr.bf16.mxu1 %v7763_v4  ;;  %v7627_v17 = vld [vmem:[%s9627_s5 + $0x330] sm:$0xff]  }
 0x279   :  { %6888 = vmatprep.subr.bf16.mxu0 %v7763_v4  ;;  %6842 = vmatprep.mubr.msk.bf16.mxu1 %vm7764_vm0, %v7763_v4 }
 0x27a   :  { %6902 = vmatprep.mubr.msk.bf16.mxu0 %vm7764_vm0, %v7763_v4 }
 0x27b   :  { %6829 = vmatpush3.bf16.msra.mxu1 %v7573_v45  ;;  %v7630_v45 = vld [vmem:[%s9627_s5 + $0x260] sm:$0xff]  }
 0x27c   :  { %6889 = vmatpush3.bf16.msra.mxu0 %v7574_v29  ;;  %6830 = vmatprep.subr.bf16.mxu1 %v7763_v4  ;;  %v7631_v29 = vld [vmem:[%s9627_s5 + $0x320] sm:$0xff]  }
 0x27d   :  { %6890 = vmatprep.subr.bf16.mxu0 %v7763_v4 }
 0x27f   :  { %6831 = vmatpush3.bf16.msra.mxu1 %v7575_v0  ;;  %v7632_v0 = vld [vmem:[%s9627_s5 + $0x258] sm:$0xff]  }
 0x280   :  { %6891 = vmatpush3.bf16.msra.mxu0 %v7576_v33  ;;  %6832 = vmatprep.subr.bf16.mxu1 %v7763_v4  ;;  %v7633_v33 = vld [vmem:[%s9627_s5 + $0x318] sm:$0xff]  }
 0x281   :  { %6892 = vmatprep.subr.bf16.mxu0 %v7763_v4 }
 0x283   :  { %6833 = vmatpush3.bf16.msra.mxu1 %v7577_v35  ;;  %v7634_v35 = vld [vmem:[%s9627_s5 + $0x250] sm:$0xff]  }
 0x284   :  { %6893 = vmatpush3.bf16.msra.mxu0 %v7578_v25  ;;  %6834 = vmatprep.subr.bf16.mxu1 %v7763_v4  ;;  %v7635_v25 = vld [vmem:[%s9627_s5 + $0x310] sm:$0xff]  }
 0x285   :  { %6894 = vmatprep.subr.bf16.mxu0 %v7763_v4 }
 0x287   :  { %6835 = vmatpush3.bf16.msra.mxu1 %v7579_v43  ;;  %v7636_v43 = vld [vmem:[%s9627_s5 + $0x248] sm:$0xff]  }
 0x288   :  { %6895 = vmatpush3.bf16.msra.mxu0 %v7580_v38  ;;  %6836 = vmatprep.subr.bf16.mxu1 %v7763_v4  ;;  %v7637_v38 = vld [vmem:[%s9627_s5 + $0x308] sm:$0xff]  }
 0x289   :  { %6896 = vmatprep.subr.bf16.mxu0 %v7763_v4 }
 0x28b   :  { %6837 = vmatpush3.bf16.msra.mxu1 %v7581_v39  ;;  %v7638_v39 = vld [vmem:[%s9627_s5 + $0x240] sm:$0xff]  }
 0x28c   :  { %6897 = vmatpush3.bf16.msra.mxu0 %v7582_v11  ;;  %6838 = vmatprep.subr.bf16.mxu1 %v7763_v4  ;;  %v7639_v11 = vld [vmem:[%s9627_s5 + $0x300] sm:$0xff]  }
 0x28d   :  { %6898 = vmatprep.subr.bf16.mxu0 %v7763_v4 }
 0x28f   :  { %6839 = vmatpush3.bf16.msra.mxu1 %v7583_v23  ;;  %v7640_v23 = vld [vmem:[#allocation2 + $0x8] ss:$0 sps:$4 sm:$0x22]  }
 0x290   :  { %6899 = vmatpush3.bf16.msra.mxu0 %v7584_v8  ;;  %6840 = vmatprep.subr.bf16.mxu1 %v7763_v4  ;;  %v7641_v8 = vld [vmem:[%s9627_s5 + $0x2f8] sm:$0xff]  }
 0x291   :  { %6900 = vmatprep.subr.bf16.mxu0 %v7763_v4 }
 0x293   :  { %6841 = vmatpush3.bf16.msra.mxu1 %v7585_v9  ;;  %v3339_v9 = vrot.slane %v7640_v23, 1 }
 0x294   :  { %6901 = vmatpush3.bf16.msra.mxu0 %v7586_v56  ;;  %6866 = vmatprep.subr.bf16.mxu1 %v7763_v4  ;;  %v7642_v56 = vld [vmem:[%s9627_s5 + $0x3b8] sm:$0xff]  }
 0x295   :  { %6926 = vmatprep.subr.bf16.mxu0 %v7763_v4 }
 0x296   :  { %6843 = vmatmul.mubr.bf16.vlgmr.msra.gmra.mxu1 %v2677_v16  ;;  %v7645_v16 = vld [vmem:[%s9627_s5 + $0x2e8] sm:$0xff]  }
 0x297   :  { %6903 = vmatmul.mubr.bf16.vlgmr.msra.gmra.mxu0 %v3008_v22  ;;  %6867 = vmatpush3.bf16.msra.mxu1 %v7589_v63  ;;  %v7644_v63 = vld [vmem:[%s9627_s5 + $0x3b0] sm:$0xff]   ;;  %v7647_v22 = vld [vmem:[%s9627_s5 + $0x2e0] sm:$0xff]  }
 0x298   :  { %6927 = vmatpush3.bf16.msra.mxu0 %v7590_v20  ;;  %6868 = vmatprep.subr.bf16.mxu1 %v7763_v4  ;;  %v7646_v20 = vld [vmem:[%s9627_s5 + $0x3a8] sm:$0xff]  }
 0x299   :  { %6928 = vmatprep.subr.bf16.mxu0 %v7763_v4  ;;  %6882 = vmatprep.mubr.msk.bf16.mxu1 %vm7764_vm0, %v7763_v4 }
 0x29a   :  { %6942 = vmatprep.mubr.msk.bf16.mxu0 %vm7764_vm0, %v7763_v4 }
 0x29b   :  { %6869 = vmatpush3.bf16.msra.mxu1 %v7591_v36  ;;  %v7648_v36 = vld [vmem:[%s9627_s5 + $0x3a0] sm:$0xff]  }
 0x29c   :  { %6929 = vmatpush3.bf16.msra.mxu0 %v7592_v34  ;;  %6870 = vmatprep.subr.bf16.mxu1 %v7763_v4  ;;  %v7649_v34 = vld [vmem:[%s9627_s5 + $0x2d8] sm:$0xff]  }
 0x29d   :  { %6930 = vmatprep.subr.bf16.mxu0 %v7763_v4 }
 0x29f   :  { %6871 = vmatpush3.bf16.msra.mxu1 %v7593_v47  ;;  %v7650_v47 = vld [vmem:[%s9627_s5 + $0x398] sm:$0xff]  }
 0x2a0   :  { %6931 = vmatpush3.bf16.msra.mxu0 %v7594_v51  ;;  %6872 = vmatprep.subr.bf16.mxu1 %v7763_v4  ;;  %v7651_v51 = vld [vmem:[%s9627_s5 + $0x2d0] sm:$0xff]  }
 0x2a1   :  { %6932 = vmatprep.subr.bf16.mxu0 %v7763_v4 }
 0x2a3   :  { %6873 = vmatpush3.bf16.msra.mxu1 %v7595_v46  ;;  %v7652_v46 = vld [vmem:[%s9627_s5 + $0x390] sm:$0xff]  }
 0x2a4   :  { %6933 = vmatpush3.bf16.msra.mxu0 %v7596_v59  ;;  %6874 = vmatprep.subr.bf16.mxu1 %v7763_v4  ;;  %v7653_v59 = vld [vmem:[%s9627_s5 + $0x2c8] sm:$0xff]  }
 0x2a5   :  { %6934 = vmatprep.subr.bf16.mxu0 %v7763_v4 }
 0x2a7   :  { %6875 = vmatpush3.bf16.msra.mxu1 %v7597_v13  ;;  %v7654_v13 = vld [vmem:[%s9627_s5 + $0x388] sm:$0xff]  }
 0x2a8   :  { %6935 = vmatpush3.bf16.msra.mxu0 %v7598_v44  ;;  %6876 = vmatprep.subr.bf16.mxu1 %v7763_v4  ;;  %v7655_v44 = vld [vmem:[%s9627_s5 + $0x2c0] sm:$0xff]  }
 0x2a9   :  { %6936 = vmatprep.subr.bf16.mxu0 %v7763_v4 }
 0x2ab   :  { %6877 = vmatpush3.bf16.msra.mxu1 %v7599_v19  ;;  %v7656_v19 = vld [vmem:[%s9627_s5 + $0x380] sm:$0xff]  }
 0x2ac   :  { %6937 = vmatpush3.bf16.msra.mxu0 %v7600_v2  ;;  %6878 = vmatprep.subr.bf16.mxu1 %v7763_v4  ;;  %v7657_v2 = vld [vmem:[#allocation2 + $0x8] ss:$0 sps:$4 sm:$0x88]  }
 0x2ad   :  { %6938 = vmatprep.subr.bf16.mxu0 %v7763_v4 }
 0x2af   :  { %6879 = vmatpush3.bf16.msra.mxu1 %v7601_v57  ;;  %v7658_v57 = vld [vmem:[#allocation2 + $0xc] ss:$0 sps:$4 sm:$0x44]  }
 0x2b0   :  { %6939 = vmatpush3.bf16.msra.mxu0 %v7602_v55  ;;  %6880 = vmatprep.subr.bf16.mxu1 %v7763_v4  ;;  %v7659_v55 = vld [vmem:[%s9627_s5 + $0x378] sm:$0xff]   ;;  %v3894_v26 = vrot.slane %v7658_v57, 2 }
 0x2b1   :  { %6940 = vmatprep.subr.bf16.mxu0 %v7763_v4 }
 0x2b3   :  { %6881 = vmatpush3.bf16.msra.mxu1 %v7603_v32  ;;  %v3563_v32 = vrot.slane %v7657_v2, 3 }
 0x2b4   :  { %6941 = vmatpush3.bf16.msra.mxu0 %v7604_v3  ;;  %6906 = vmatprep.subr.bf16.mxu1 %v7763_v4  ;;  %v7660_v3 = vld [vmem:[%s9627_s5 + $0x438] sm:$0xff]  }
 0x2b5   :  { %6966 = vmatprep.subr.bf16.mxu0 %v7763_v4 }
 0x2b6   :  { %6883 = vmatmul.mubr.bf16.vlgmr.msra.gmra.mxu1 %v2896_v40 }
 0x2b7   :  { %6943 = vmatmul.mubr.bf16.vlgmr.msra.gmra.mxu0 %v3211_v28  ;;  %6907 = vmatpush3.bf16.msra.mxu1 %v7606_v7 }
 0x2b8   :  { %6967 = vmatpush3.bf16.msra.mxu0 %v7607_v50  ;;  %6908 = vmatprep.subr.bf16.mxu1 %v7763_v4  ;;  %v7661_v50 = vld [vmem:[%s9627_s5 + $0x370] sm:$0xff]  }
 0x2b9   :  { %6968 = vmatprep.subr.bf16.mxu0 %v7763_v4  ;;  %6922 = vmatprep.mubr.msk.bf16.mxu1 %vm7764_vm0, %v7763_v4 }
 0x2ba   :  { %6982 = vmatprep.mubr.msk.bf16.mxu0 %vm7764_vm0, %v7763_v4 }
 0x2bb   :  { %6909 = vmatpush3.bf16.msra.mxu1 %v7608_v42  ;;  %v7662_v42 = vld [vmem:[%s9627_s5 + $0x430] sm:$0xff]  }
 0x2bc   :  { %6969 = vmatpush3.bf16.msra.mxu0 %v7609_v10  ;;  %6910 = vmatprep.subr.bf16.mxu1 %v7763_v4 }
 0x2bd   :  { %6970 = vmatprep.subr.bf16.mxu0 %v7763_v4 }
 0x2bf   :  { %6911 = vmatpush3.bf16.msra.mxu1 %v7610_v1 }
 0x2c0   :  { %6971 = vmatpush3.bf16.msra.mxu0 %v7611_v18  ;;  %6912 = vmatprep.subr.bf16.mxu1 %v7763_v4 }
 0x2c1   :  { %6972 = vmatprep.subr.bf16.mxu0 %v7763_v4 }
 0x2c3   :  { %6913 = vmatpush3.bf16.msra.mxu1 %v7612_v12  ;;  %v7663_v12 = vld [vmem:[%s9627_s5 + $0x368] sm:$0xff]  }
 0x2c4   :  { %6973 = vmatpush3.bf16.msra.mxu0 %v7613_v5  ;;  %6914 = vmatprep.subr.bf16.mxu1 %v7763_v4 }
 0x2c5   :  { %6974 = vmatprep.subr.bf16.mxu0 %v7763_v4 }
 0x2c7   :  { %6915 = vmatpush3.bf16.msra.mxu1 %v7614_v52  ;;  %v7664_v52 = vld [vmem:[%s9627_s5 + $0x428] sm:$0xff]  }
 0x2c8   :  { %6975 = vmatpush3.bf16.msra.mxu0 %v7615_v24  ;;  %6916 = vmatprep.subr.bf16.mxu1 %v7763_v4 }
 0x2c9   :  { %6976 = vmatprep.subr.bf16.mxu0 %v7763_v4 }
 0x2cb   :  { %6917 = vmatpush3.bf16.msra.mxu1 %v7616_v62  ;;  %v7665_v62 = vld [vmem:[%s9627_s5 + $0x360] sm:$0xff]  }
 0x2cc   :  { %6977 = vmatpush3.bf16.msra.mxu0 %v7617_v58  ;;  %6918 = vmatprep.subr.bf16.mxu1 %v7763_v4  ;;  %v7666_v58 = vld [vmem:[%s9627_s5 + $0x420] sm:$0xff]  }
 0x2cd   :  { %6978 = vmatprep.subr.bf16.mxu0 %v7763_v4 }
 0x2cf   :  { %6919 = vmatpush3.bf16.msra.mxu1 %v7618_v14  ;;  %v7667_v14 = vld [vmem:[%s9627_s5 + $0x358] sm:$0xff]  }
 0x2d0   :  { %6979 = vmatpush3.bf16.msra.mxu0 %v7619_v31  ;;  %6920 = vmatprep.subr.bf16.mxu1 %v7763_v4  ;;  %v7668_v31 = vld [vmem:[%s9627_s5 + $0x418] sm:$0xff]  }
 0x2d1   :  { %6980 = vmatprep.subr.bf16.mxu0 %v7763_v4 }
 0x2d3   :  { %6921 = vmatpush3.bf16.msra.mxu1 %v7620_v15  ;;  %v7669_v15 = vld [vmem:[%s9627_s5 + $0x350] sm:$0xff]  }
 0x2d4   :  { %6981 = vmatpush3.bf16.msra.mxu0 %v7621_v49  ;;  %6946 = vmatprep.subr.bf16.mxu1 %v7763_v4  ;;  %v7670_v49 = vld [vmem:[%s9627_s5 + $0x410] sm:$0xff]  }
 0x2d5   :  { %7006 = vmatprep.subr.bf16.mxu0 %v7763_v4 }
 0x2d6   :  { %6923 = vmatmul.mubr.bf16.vlgmr.msra.gmra.mxu1 %v3120_v54  ;;  %v7674_v54 = vld [vmem:[%s9627_s5 + $0x400] sm:$0xff]  }
 0x2d7   :  { %6983 = vmatmul.mubr.bf16.vlgmr.msra.gmra.mxu0 %v3451_v21  ;;  %6947 = vmatpush3.bf16.msra.mxu1 %v7624_v60  ;;  %v7673_v60 = vld [vmem:[%s9627_s5 + $0x340] sm:$0xff]   ;;  %v7676_v21 = vld [vmem:[%s9627_s5 + $0x3f8] sm:$0xff]  }
 0x2d8   :  { %7007 = vmatpush3.bf16.msra.mxu0 %v7625_v6  ;;  %6948 = vmatprep.subr.bf16.mxu1 %v7763_v4  ;;  %v7675_v6 = vld [vmem:[#allocation2 + $0xc] ss:$0 sps:$4 sm:$0x22]  }
 0x2d9   :  { %7008 = vmatprep.subr.bf16.mxu0 %v7763_v4  ;;  %6962 = vmatprep.mubr.msk.bf16.mxu1 %vm7764_vm0, %v7763_v4 }
 0x2da   :  { %7022 = vmatprep.mubr.msk.bf16.mxu0 %vm7764_vm0, %v7763_v4 }
 0x2db   :  { %6949 = vmatpush3.bf16.msra.mxu1 %v7626_v53  ;;  %v3782_v53 = vrot.slane %v7675_v6, 1 }
 0x2dc   :  { %7009 = vmatpush3.bf16.msra.mxu0 %v7627_v17  ;;  %6950 = vmatprep.subr.bf16.mxu1 %v7763_v4  ;;  %v7677_v17 = vld [vmem:[%s9627_s5 + $0x4b8] sm:$0xff]  }
 0x2dd   :  { %7010 = vmatprep.subr.bf16.mxu0 %v7763_v4 }
 0x2df   :  { %6951 = vmatpush3.bf16.msra.mxu1 %v7628_v30 }
 0x2e0   :  { %7011 = vmatpush3.bf16.msra.mxu0 %v7629_v41  ;;  %6952 = vmatprep.subr.bf16.mxu1 %v7763_v4  ;;  %v4097_v41 = vld [vmem:[#allocation2 + $0x10] sm:$0x1] }
 0x2e1   :  { %7012 = vmatprep.subr.bf16.mxu0 %v7763_v4 }
 0x2e3   :  { %6953 = vmatpush3.bf16.msra.mxu1 %v7630_v45 }
 0x2e4   :  { %7013 = vmatpush3.bf16.msra.mxu0 %v7631_v29  ;;  %6954 = vmatprep.subr.bf16.mxu1 %v7763_v4 }
 0x2e5   :  { %7014 = vmatprep.subr.bf16.mxu0 %v7763_v4 }
 0x2e7   :  { %6955 = vmatpush3.bf16.msra.mxu1 %v7632_v0  ;;  %v7678_v0 = vld [vmem:[%s9627_s5 + $0x3f0] sm:$0xff]  }
 0x2e8   :  { %7015 = vmatpush3.bf16.msra.mxu0 %v7633_v33  ;;  %6956 = vmatprep.subr.bf16.mxu1 %v7763_v4 }
 0x2e9   :  { %7016 = vmatprep.subr.bf16.mxu0 %v7763_v4 }
 0x2eb   :  { %6957 = vmatpush3.bf16.msra.mxu1 %v7634_v35  ;;  %v7679_v35 = vld [vmem:[%s9627_s5 + $0x4b0] sm:$0xff]  }
 0x2ec   :  { %7017 = vmatpush3.bf16.msra.mxu0 %v7635_v25  ;;  %6958 = vmatprep.subr.bf16.mxu1 %v7763_v4 }
 0x2ed   :  { %7018 = vmatprep.subr.bf16.mxu0 %v7763_v4 }
 0x2ef   :  { %6959 = vmatpush3.bf16.msra.mxu1 %v7636_v43 }
 0x2f0   :  { %7019 = vmatpush3.bf16.msra.mxu0 %v7637_v38  ;;  %6960 = vmatprep.subr.bf16.mxu1 %v7763_v4 }
 0x2f1   :  { %7020 = vmatprep.subr.bf16.mxu0 %v7763_v4 }
 0x2f3   :  { %6961 = vmatpush3.bf16.msra.mxu1 %v7638_v39 }
 0x2f4   :  { %7021 = vmatpush3.bf16.msra.mxu0 %v7639_v11  ;;  %6986 = vmatprep.subr.bf16.mxu1 %v7763_v4  ;;  %v7680_v11 = vld [vmem:[%s9627_s5 + $0x3e8] sm:$0xff]  }
 0x2f5   :  { %7046 = vmatprep.subr.bf16.mxu0 %v7763_v4 }
 0x2f6   :  { %6963 = vmatmul.mubr.bf16.vlgmr.msra.gmra.mxu1 %v3339_v9 }
 0x2f7   :  { %7023 = vmatmul.mubr.bf16.vlgmr.msra.gmra.mxu0 %v3654_v48  ;;  %6987 = vmatpush3.bf16.msra.mxu1 %v7641_v8  ;;  %v7681_v8 = vld [vmem:[%s9627_s5 + $0x4a8] sm:$0xff]   ;;  %v7683_v48 = vld [vmem:[%s9627_s5 + $0x4a0] sm:$0xff]  }
 0x2f8   :  { %7047 = vmatpush3.bf16.msra.mxu0 %v7642_v56  ;;  %6988 = vmatprep.subr.bf16.mxu1 %v7763_v4  ;;  %v7682_v56 = vld [vmem:[%s9627_s5 + $0x3e0] sm:$0xff]  }
 0x2f9   :  { %7048 = vmatprep.subr.bf16.mxu0 %v7763_v4  ;;  %7002 = vmatprep.mubr.msk.bf16.mxu1 %vm7764_vm0, %v7763_v4 }
 0x2fa   :  { %7062 = vmatprep.mubr.msk.bf16.mxu0 %vm7764_vm0, %v7763_v4 }
 0x2fb   :  { %6989 = vmatpush3.bf16.msra.mxu1 %v7643_v37  ;;  %v7684_v37 = vld [vmem:[%s9627_s5 + $0x3d8] sm:$0xff]  }
 0x2fc   :  { %7049 = vmatpush3.bf16.msra.mxu0 %v7644_v63  ;;  %6990 = vmatprep.subr.bf16.mxu1 %v7763_v4  ;;  %v7685_v63 = vld [vmem:[%s9627_s5 + $0x498] sm:$0xff]  }
 0x2fd   :  { %7050 = vmatprep.subr.bf16.mxu0 %v7763_v4 }
 0x2ff   :  { %6991 = vmatpush3.bf16.msra.mxu1 %v7645_v16  ;;  %v7686_v16 = vld [vmem:[%s9627_s5 + $0x3d0] sm:$0xff]  }
 0x300   :  { %7051 = vmatpush3.bf16.msra.mxu0 %v7646_v20  ;;  %6992 = vmatprep.subr.bf16.mxu1 %v7763_v4  ;;  %v7687_v20 = vld [vmem:[%s9627_s5 + $0x490] sm:$0xff]  }
 0x301   :  { %7052 = vmatprep.subr.bf16.mxu0 %v7763_v4 }
 0x303   :  { %6993 = vmatpush3.bf16.msra.mxu1 %v7647_v22  ;;  %v7688_v22 = vld [vmem:[%s9627_s5 + $0x3c8] sm:$0xff]  }
 0x304   :  { %7053 = vmatpush3.bf16.msra.mxu0 %v7648_v36  ;;  %6994 = vmatprep.subr.bf16.mxu1 %v7763_v4  ;;  %v7689_v36 = vld [vmem:[%s9627_s5 + $0x488] sm:$0xff]  }
 0x305   :  { %7054 = vmatprep.subr.bf16.mxu0 %v7763_v4 }
 0x307   :  { %6995 = vmatpush3.bf16.msra.mxu1 %v7649_v34  ;;  %v7690_v34 = vld [vmem:[%s9627_s5 + $0x3c0] sm:$0xff]  }
 0x308   :  { %7055 = vmatpush3.bf16.msra.mxu0 %v7650_v47  ;;  %6996 = vmatprep.subr.bf16.mxu1 %v7763_v4  ;;  %v7691_v47 = vld [vmem:[%s9627_s5 + $0x480] sm:$0xff]  }
 0x309   :  { %7056 = vmatprep.subr.bf16.mxu0 %v7763_v4 }
 0x30b   :  { %6997 = vmatpush3.bf16.msra.mxu1 %v7651_v51  ;;  %v7692_v51 = vld [vmem:[#allocation2 + $0xc] ss:$0 sps:$4 sm:$0x88]  }
 0x30c   :  { %7057 = vmatpush3.bf16.msra.mxu0 %v7652_v46  ;;  %6998 = vmatprep.subr.bf16.mxu1 %v7763_v4  ;;  %v7693_v46 = vld [vmem:[#allocation2 + $0x10] ss:$0 sps:$4 sm:$0x44]  }
 0x30d   :  { %7058 = vmatprep.subr.bf16.mxu0 %v7763_v4 }
 0x30f   :  { %6999 = vmatpush3.bf16.msra.mxu1 %v7653_v59  ;;  %v7694_v59 = vld [vmem:[%s9627_s5 + $0x478] sm:$0xff]  }
 0x310   :  { %7059 = vmatpush3.bf16.msra.mxu0 %v7654_v13  ;;  %7000 = vmatprep.subr.bf16.mxu1 %v7763_v4  ;;  %v4006_v13 = vrot.slane %v7692_v51, 3  ;;  %v7730_v51 = vld [vmem:[%s9627_s5 + $0x638] sm:$0xff]  }
 0x311   :  { %7060 = vmatprep.subr.bf16.mxu0 %v7763_v4 }
 0x313   :  { %7001 = vmatpush3.bf16.msra.mxu1 %v7655_v44  ;;  %v7695_v44 = vld [vmem:[%s9627_s5 + $0x538] sm:$0xff]  }
 0x314   :  { %7061 = vmatpush3.bf16.msra.mxu0 %v7656_v19  ;;  %7026 = vmatprep.subr.bf16.mxu1 %v7763_v4  ;;  %v4337_v19 = vrot.slane %v7693_v46, 2 }
 0x315   :  { %7086 = vmatprep.subr.bf16.mxu0 %v7763_v4 }
 0x316   :  { %7003 = vmatmul.mubr.bf16.vlgmr.msra.gmra.mxu1 %v3563_v32  ;;  %v9214_v7 = vpop.f32.mrf.mxu1  ;;  %v7696_v32 = vld [vmem:[%s9627_s5 + $0x470] sm:$0xff]  }
 0x317   :  { %7063 = vmatmul.mubr.bf16.vlgmr.msra.gmra.mxu0 %v3894_v26  ;;  %v9216_v40 = vpop.f32.mrf.mxu0  ;;  %7027 = vmatpush3.bf16.msra.mxu1 %v7659_v55  ;;  %v7697_v26 = vld [vmem:[%s9627_s5 + $0x530] sm:$0xff]  }
 0x318   :  { %7087 = vmatpush3.bf16.msra.mxu0 %v7660_v3  ;;  %v6784_v28 = vpop.f32.mrf.mxu1  ;;  %7028 = vmatprep.subr.bf16.mxu1 %v7763_v4 }
 0x319   :  { %v6824_v10 = vpop.f32.mrf.mxu0  ;;  %7088 = vmatprep.subr.bf16.mxu0 %v7763_v4  ;;  %7042 = vmatprep.mubr.msk.bf16.mxu1 %vm7764_vm0, %v7763_v4 }
 0x31a   :  { %v2453_v1 = vpop.f32.mrf.mxu1  ;;  %7102 = vmatprep.mubr.msk.bf16.mxu0 %vm7764_vm0, %v7763_v4 }
 0x31b   :  { %v2652_v18 = vpop.f32.mrf.mxu0  ;;  %7029 = vmatpush3.bf16.msra.mxu1 %v7661_v50  ;;  %v7699_v1 = vld [vmem:[%s9627_s5 + $0x528] sm:$0xff]  }
 0x31c   :  { %7089 = vmatpush3.bf16.msra.mxu0 %v7662_v42  ;;  %v6785_v5 = vpop.f32.mrf.mxu1  ;;  %7030 = vmatprep.subr.bf16.mxu1 %v7763_v4  ;;  %v7698_v42 = vld [vmem:[%s9627_s5 + $0x468] sm:$0xff]  }
 0x31d   :  { %v6825_v24 = vpop.f32.mrf.mxu0  ;;  %7090 = vmatprep.subr.bf16.mxu0 %v7763_v4  ;;  %v7701_v5 = vld [vmem:[%s9627_s5 + $0x520] sm:$0xff]  }
 0x31e   :  { %v7703_v24 = vld [vmem:[%s9627_s5 + $0x518] sm:$0xff]  }
 0x31f   :  { %7031 = vmatpush3.bf16.msra.mxu1 %v7663_v12  ;;  %v7700_v12 = vld [vmem:[%s9627_s5 + $0x460] sm:$0xff]  }
 0x320   :  { %7091 = vmatpush3.bf16.msra.mxu0 %v7664_v52  ;;  %7032 = vmatprep.subr.bf16.mxu1 %v7763_v4  ;;  %v7702_v52 = vld [vmem:[%s9627_s5 + $0x458] sm:$0xff]  }
 0x321   :  { %7092 = vmatprep.subr.bf16.mxu0 %v7763_v4 }
 0x323   :  { %7033 = vmatpush3.bf16.msra.mxu1 %v7665_v62  ;;  %v7704_v62 = vld [vmem:[%s9627_s5 + $0x450] sm:$0xff]  }
 0x324   :  { %7093 = vmatpush3.bf16.msra.mxu0 %v7666_v58  ;;  %7034 = vmatprep.subr.bf16.mxu1 %v7763_v4  ;;  %v7705_v58 = vld [vmem:[%s9627_s5 + $0x510] sm:$0xff]  }
 0x325   :  { %7094 = vmatprep.subr.bf16.mxu0 %v7763_v4 }
 0x327   :  { %7035 = vmatpush3.bf16.msra.mxu1 %v7667_v14  ;;  %v7706_v14 = vld [vmem:[%s9627_s5 + $0x448] sm:$0xff]  }
 0x328   :  { %7095 = vmatpush3.bf16.msra.mxu0 %v7668_v31  ;;  %7036 = vmatprep.subr.bf16.mxu1 %v7763_v4  ;;  %v7707_v31 = vld [vmem:[%s9627_s5 + $0x508] sm:$0xff]  }
 0x329   :  { %7096 = vmatprep.subr.bf16.mxu0 %v7763_v4 }
 0x32b   :  { %7037 = vmatpush3.bf16.msra.mxu1 %v7669_v15  ;;  %v7708_v15 = vld [vmem:[%s9627_s5 + $0x440] sm:$0xff]  }
 0x32c   :  { %7097 = vmatpush3.bf16.msra.mxu0 %v7670_v49  ;;  %7038 = vmatprep.subr.bf16.mxu1 %v7763_v4  ;;  %v7709_v49 = vld [vmem:[%s9627_s5 + $0x500] sm:$0xff]  }
 0x32d   :  { %7098 = vmatprep.subr.bf16.mxu0 %v7763_v4 }
 0x32f   :  { %7039 = vmatpush3.bf16.msra.mxu1 %v7671_v61  ;;  %v7710_v61 = vld [vmem:[#allocation2 + $0x10] ss:$0 sps:$4 sm:$0x22]  }
 0x330   :  { %7099 = vmatpush3.bf16.msra.mxu0 %v7672_v27  ;;  %7040 = vmatprep.subr.bf16.mxu1 %v7763_v4  ;;  %v7711_v27 = vld [vmem:[%s9627_s5 + $0x4f8] sm:$0xff]  }
 0x331   :  { %7100 = vmatprep.subr.bf16.mxu0 %v7763_v4 }
 0x333   :  { %7041 = vmatpush3.bf16.msra.mxu1 %v7673_v60  ;;  %v4225_v60 = vrot.slane %v7710_v61, 1  ;;  %v4983_v61 = vld [vmem:[#allocation2 + $0x18] sm:$0x1] }
 0x334   :  { %7101 = vmatpush3.bf16.msra.mxu0 %v7674_v54  ;;  %7066 = vmatprep.subr.bf16.mxu1 %v7763_v4  ;;  %v7712_v54 = vld [vmem:[%s9627_s5 + $0x5b8] sm:$0xff]  }
 0x335   :  { %7126 = vmatprep.subr.bf16.mxu0 %v7763_v4 }
 0x336   :  { %v2538_v30 = vpop.f32.mrf.mxu1  ;;  %7043 = vmatmul.mubr.bf16.vlgmr.msra.gmra.mxu1 %v3782_v53 }
 0x337   :  { %v2539_v45 = vadd.f32 %v2538_v30, %v9214_v7  ;;  %v9287_v29 = vpop.f32.mrf.mxu0  ;;  %7103 = vmatmul.mubr.bf16.vlgmr.msra.gmra.mxu0 %v4097_v41  ;;  %7067 = vmatpush3.bf16.msra.mxu1 %v7676_v21  ;;  %v4540_v21 = vld [vmem:[#allocation2 + $0x14] sm:$0x1] }
 0x338   :  { %7127 = vmatpush3.bf16.msra.mxu0 %v7677_v17  ;;  %v6804_v33 = vpop.f32.mrf.mxu1  ;;  %7068 = vmatprep.subr.bf16.mxu1 %v7763_v4  ;;  %v7713_v30 = vld [vmem:[%s9627_s5 + $0x4f0] sm:$0xff]  }
 0x339   :  { %v6864_v25 = vpop.f32.mrf.mxu0  ;;  %7128 = vmatprep.subr.bf16.mxu0 %v7763_v4  ;;  %7082 = vmatprep.mubr.msk.bf16.mxu1 %vm7764_vm0, %v7763_v4  ;;  %v2655_v43 = vadd.f32 %v9216_v40, %v2539_v45  ;;  %v7714_v45 = vld [vmem:[%s9627_s5 + $0x5b0] sm:$0xff]  }
 0x33a   :  { %v2541_v38 = vpop.f32.mrf.mxu1  ;;  %7142 = vmatprep.mubr.msk.bf16.mxu0 %vm7764_vm0, %v7763_v4  ;;  %v7715_v25 = vld [vmem:[%s9627_s5 + $0x4e8] sm:$0xff]  }
 0x33b   :  { %v2871_v39 = vpop.f32.mrf.mxu0  ;;  %7069 = vmatpush3.bf16.msra.mxu1 %v7678_v0  ;;  %v7716_v38 = vld [vmem:[%s9627_s5 + $0x5a8] sm:$0xff]  }
 0x33c   :  { %7129 = vmatpush3.bf16.msra.mxu0 %v7679_v35  ;;  %v6805_v23 = vpop.f32.mrf.mxu1  ;;  %7070 = vmatprep.subr.bf16.mxu1 %v7763_v4 }
 0x33d   :  { %v6865_v9 = vpop.f32.mrf.mxu0  ;;  %7130 = vmatprep.subr.bf16.mxu0 %v7763_v4  ;;  %v7718_v23 = vld [vmem:[%s9627_s5 + $0x5a0] sm:$0xff]  }
 0x33e   :  { %v7720_v9 = vld [vmem:[%s9627_s5 + $0x598] sm:$0xff]  }
 0x33f   :  { %7071 = vmatpush3.bf16.msra.mxu1 %v7680_v11  ;;  %v7717_v11 = vld [vmem:[%s9627_s5 + $0x4e0] sm:$0xff]  }
 0x340   :  { %7131 = vmatpush3.bf16.msra.mxu0 %v7681_v8  ;;  %7072 = vmatprep.subr.bf16.mxu1 %v7763_v4  ;;  %v7719_v8 = vld [vmem:[%s9627_s5 + $0x4d8] sm:$0xff]  }
 0x341   :  { %7132 = vmatprep.subr.bf16.mxu0 %v7763_v4 }
 0x343   :  { %7073 = vmatpush3.bf16.msra.mxu1 %v7682_v56  ;;  %v7721_v56 = vld [vmem:[%s9627_s5 + $0x4d0] sm:$0xff]  }
 0x344   :  { %7133 = vmatpush3.bf16.msra.mxu0 %v7683_v48  ;;  %7074 = vmatprep.subr.bf16.mxu1 %v7763_v4  ;;  %v7722_v48 = vld [vmem:[%s9627_s5 + $0x590] sm:$0xff]  }
 0x345   :  { %7134 = vmatprep.subr.bf16.mxu0 %v7763_v4 }
 0x347   :  { %7075 = vmatpush3.bf16.msra.mxu1 %v7684_v37  ;;  %v7723_v37 = vld [vmem:[%s9627_s5 + $0x4c8] sm:$0xff]  }
 0x348   :  { %7135 = vmatpush3.bf16.msra.mxu0 %v7685_v63  ;;  %7076 = vmatprep.subr.bf16.mxu1 %v7763_v4  ;;  %v7724_v63 = vld [vmem:[%s9627_s5 + $0x588] sm:$0xff]  }
 0x349   :  { %7136 = vmatprep.subr.bf16.mxu0 %v7763_v4 }
 0x34b   :  { %7077 = vmatpush3.bf16.msra.mxu1 %v7686_v16  ;;  %v7725_v16 = vld [vmem:[%s9627_s5 + $0x4c0] sm:$0xff]  }
 0x34c   :  { %7137 = vmatpush3.bf16.msra.mxu0 %v7687_v20  ;;  %7078 = vmatprep.subr.bf16.mxu1 %v7763_v4  ;;  %v7726_v20 = vld [vmem:[%s9627_s5 + $0x580] sm:$0xff]  }
 0x34d   :  { %7138 = vmatprep.subr.bf16.mxu0 %v7763_v4 }
 0x34f   :  { %7079 = vmatpush3.bf16.msra.mxu1 %v7688_v22  ;;  %v7727_v22 = vld [vmem:[#allocation2 + $0x10] ss:$0 sps:$4 sm:$0x88]  }
 0x350   :  { %7139 = vmatpush3.bf16.msra.mxu0 %v7689_v36  ;;  %7080 = vmatprep.subr.bf16.mxu1 %v7763_v4  ;;  %v7728_v36 = vld [vmem:[#allocation2 + $0x14] ss:$0 sps:$4 sm:$0x44]  }
 0x351   :  { %7140 = vmatprep.subr.bf16.mxu0 %v7763_v4  ;;  %v4780_v46 = vrot.slane %v7728_v36, 2 }
 0x353   :  { %7081 = vmatpush3.bf16.msra.mxu1 %v7690_v34  ;;  %v7729_v34 = vld [vmem:[%s9627_s5 + $0x578] sm:$0xff]  }
 0x354   :  { %7141 = vmatpush3.bf16.msra.mxu0 %v7691_v47  ;;  %7106 = vmatprep.subr.bf16.mxu1 %v7763_v4  ;;  %v4449_v47 = vrot.slane %v7727_v22, 3 }
 0x355   :  { %7166 = vmatprep.subr.bf16.mxu0 %v7763_v4 }
 0x356   :  { %v2761_v2 = vpop.f32.mrf.mxu1  ;;  %7083 = vmatmul.mubr.bf16.vlgmr.msra.gmra.mxu1 %v4006_v13 }
 0x357   :  { %v2767_v57 = vadd.f32 %v2761_v2, %v2655_v43  ;;  %v9358_v55 = vpop.f32.mrf.mxu0  ;;  %7143 = vmatmul.mubr.bf16.vlgmr.msra.gmra.mxu0 %v4337_v19  ;;  %7107 = vmatpush3.bf16.msra.mxu1 %v7694_v59  ;;  %v7731_v19 = vld [vmem:[%s9627_s5 + $0x570] sm:$0xff]  }
 0x358   :  { %7167 = vmatpush3.bf16.msra.mxu0 %v7695_v44  ;;  %v6844_v3 = vpop.f32.mrf.mxu1  ;;  %7108 = vmatprep.subr.bf16.mxu1 %v7763_v4 }
 0x359   :  { %v6904_v7 = vpop.f32.mrf.mxu0  ;;  %7168 = vmatprep.subr.bf16.mxu0 %v7763_v4  ;;  %7122 = vmatprep.mubr.msk.bf16.mxu1 %vm7764_vm0, %v7763_v4  ;;  %v2874_v40 = vadd.f32 %v9287_v29, %v2767_v57  ;;  %v7732_v57 = vld [vmem:[%s9627_s5 + $0x630] sm:$0xff]  }
 0x35a   :  { %v2764_v50 = vpop.f32.mrf.mxu1  ;;  %7182 = vmatprep.mubr.msk.bf16.mxu0 %vm7764_vm0, %v7763_v4  ;;  %v7733_v7 = vld [vmem:[%s9627_s5 + $0x568] sm:$0xff]  }
 0x35b   :  { %v3095_v28 = vpop.f32.mrf.mxu0  ;;  %7109 = vmatpush3.bf16.msra.mxu1 %v7696_v32  ;;  %v7734_v50 = vld [vmem:[%s9627_s5 + $0x628] sm:$0xff]  }
 0x35c   :  { %7169 = vmatpush3.bf16.msra.mxu0 %v7697_v26  ;;  %v6845_v10 = vpop.f32.mrf.mxu1  ;;  %7110 = vmatprep.subr.bf16.mxu1 %v7763_v4 }
 0x35d   :  { %v6905_v18 = vpop.f32.mrf.mxu0  ;;  %7170 = vmatprep.subr.bf16.mxu0 %v7763_v4  ;;  %v7736_v10 = vld [vmem:[%s9627_s5 + $0x620] sm:$0xff]  }
 0x35e   :  { %v7738_v18 = vld [vmem:[%s9627_s5 + $0x618] sm:$0xff]  }
 0x35f   :  { %7111 = vmatpush3.bf16.msra.mxu1 %v7698_v42  ;;  %v7735_v42 = vld [vmem:[%s9627_s5 + $0x560] sm:$0xff]  }
 0x360   :  { %7171 = vmatpush3.bf16.msra.mxu0 %v7699_v1  ;;  %7112 = vmatprep.subr.bf16.mxu1 %v7763_v4  ;;  %v7737_v1 = vld [vmem:[%s9627_s5 + $0x558] sm:$0xff]  }
 0x361   :  { %7172 = vmatprep.subr.bf16.mxu0 %v7763_v4 }
 0x363   :  { %7113 = vmatpush3.bf16.msra.mxu1 %v7700_v12  ;;  %v7739_v12 = vld [vmem:[%s9627_s5 + $0x550] sm:$0xff]  }
 0x364   :  { %7173 = vmatpush3.bf16.msra.mxu0 %v7701_v5  ;;  %7114 = vmatprep.subr.bf16.mxu1 %v7763_v4  ;;  %v7740_v5 = vld [vmem:[%s9627_s5 + $0x610] sm:$0xff]  }
 0x365   :  { %7174 = vmatprep.subr.bf16.mxu0 %v7763_v4 }
 0x367   :  { %7115 = vmatpush3.bf16.msra.mxu1 %v7702_v52  ;;  %v7741_v52 = vld [vmem:[%s9627_s5 + $0x548] sm:$0xff]  }
 0x368   :  { %7175 = vmatpush3.bf16.msra.mxu0 %v7703_v24  ;;  %7116 = vmatprep.subr.bf16.mxu1 %v7763_v4  ;;  %v7742_v24 = vld [vmem:[%s9627_s5 + $0x608] sm:$0xff]  }
 0x369   :  { %7176 = vmatprep.subr.bf16.mxu0 %v7763_v4 }
 0x36b   :  { %7117 = vmatpush3.bf16.msra.mxu1 %v7704_v62  ;;  %v7743_v62 = vld [vmem:[%s9627_s5 + $0x540] sm:$0xff]  }
 0x36c   :  { %7177 = vmatpush3.bf16.msra.mxu0 %v7705_v58  ;;  %7118 = vmatprep.subr.bf16.mxu1 %v7763_v4  ;;  %v7744_v58 = vld [vmem:[%s9627_s5 + $0x600] sm:$0xff]  }
 0x36d   :  { %7178 = vmatprep.subr.bf16.mxu0 %v7763_v4 }
 0x36f   :  { %7119 = vmatpush3.bf16.msra.mxu1 %v7706_v14  ;;  %v7745_v14 = vld [vmem:[#allocation2 + $0x14] ss:$0 sps:$4 sm:$0x22]  }
 0x370   :  { %7179 = vmatpush3.bf16.msra.mxu0 %v7707_v31  ;;  %7120 = vmatprep.subr.bf16.mxu1 %v7763_v4  ;;  %v7746_v31 = vld [vmem:[%s9627_s5 + $0x5f8] sm:$0xff]  }
 0x371   :  { %7180 = vmatprep.subr.bf16.mxu0 %v7763_v4 }
 0x373   :  { %7121 = vmatpush3.bf16.msra.mxu1 %v7708_v15  ;;  %v4668_v15 = vrot.slane %v7745_v14, 1 }
 0x374   :  { %7181 = vmatpush3.bf16.msra.mxu0 %v7709_v49  ;;  %7146 = vmatprep.subr.bf16.mxu1 %v7763_v4 }
 0x375   :  { %7206 = vmatprep.subr.bf16.mxu0 %v7763_v4 }
 0x376   :  { %v2980_v6 = vpop.f32.mrf.mxu1  ;;  %7123 = vmatmul.mubr.bf16.vlgmr.msra.gmra.mxu1 %v4225_v60 }
 0x377   :  { %v2986_v53 = vadd.f32 %v2980_v6, %v2874_v40  ;;  %v9429_v17 = vpop.f32.mrf.mxu0  ;;  %7183 = vmatmul.mubr.bf16.vlgmr.msra.gmra.mxu0 %v4540_v21  ;;  %7147 = vmatpush3.bf16.msra.mxu1 %v7711_v27 }
 0x378   :  { %7207 = vmatpush3.bf16.msra.mxu0 %v7712_v54  ;;  %v6884_v41 = vpop.f32.mrf.mxu1  ;;  %7148 = vmatprep.subr.bf16.mxu1 %v7763_v4  ;;  %v7747_v54 = vld [vmem:[%s9627_s5 + $0x5f0] sm:$0xff]  }
 0x379   :  { %v6944_v29 = vpop.f32.mrf.mxu0  ;;  %7208 = vmatprep.subr.bf16.mxu0 %v7763_v4  ;;  %7162 = vmatprep.mubr.msk.bf16.mxu1 %vm7764_vm0, %v7763_v4  ;;  %v3098_v0 = vadd.f32 %v9358_v55, %v2986_v53  ;;  %v7748_v41 = vld [vmem:[%s9627_s5 + $0x5e8] sm:$0xff]  }
 0x37a   :  { %v2983_v33 = vpop.f32.mrf.mxu1  ;;  %7222 = vmatprep.mubr.msk.bf16.mxu0 %vm7764_vm0, %v7763_v4 }
 0x37b   :  { %v3314_v35 = vpop.f32.mrf.mxu0  ;;  %7149 = vmatpush3.bf16.msra.mxu1 %v7713_v30  ;;  %v7750_v33 = vld [vmem:[%s9627_s5 + $0x5d8] sm:$0xff]  }
 0x37c   :  { %7209 = vmatpush3.bf16.msra.mxu0 %v7714_v45  ;;  %v6885_v43 = vpop.f32.mrf.mxu1  ;;  %7150 = vmatprep.subr.bf16.mxu1 %v7763_v4  ;;  %v7751_v35 = vld [vmem:[%s9627_s5 + $0x5d0] sm:$0xff]  }
 0x37d   :  { %v6945_v39 = vpop.f32.mrf.mxu0  ;;  %7210 = vmatprep.subr.bf16.mxu0 %v7763_v4  ;;  %v7753_v43 = vld [vmem:[%s9627_s5 + $0x5c0] sm:$0xff]  }
 0x37f   :  { %7151 = vmatpush3.bf16.msra.mxu1 %v7715_v25  ;;  %v7752_v25 = vld [vmem:[%s9627_s5 + $0x5c8] sm:$0xff]  }
 0x380   :  { %7211 = vmatpush3.bf16.msra.mxu0 %v7716_v38  ;;  %7152 = vmatprep.subr.bf16.mxu1 %v7763_v4  ;;  %v7754_v38 = vld [vmem:[#allocation2 + $0x14] ss:$0 sps:$4 sm:$0x88]  }
 0x381   :  { %7212 = vmatprep.subr.bf16.mxu0 %v7763_v4  ;;  %v4892_v39 = vrot.slane %v7754_v38, 3 }
 0x383   :  { %7153 = vmatpush3.bf16.msra.mxu1 %v7717_v11 }
 0x384   :  { %7213 = vmatpush3.bf16.msra.mxu0 %v7718_v23  ;;  %7154 = vmatprep.subr.bf16.mxu1 %v7763_v4 }
 0x385   :  { %7214 = vmatprep.subr.bf16.mxu0 %v7763_v4 }
 0x387   :  { %7155 = vmatpush3.bf16.msra.mxu1 %v7719_v8 }
 0x388   :  { %7215 = vmatpush3.bf16.msra.mxu0 %v7720_v9  ;;  %7156 = vmatprep.subr.bf16.mxu1 %v7763_v4 }
 0x389   :  { %7216 = vmatprep.subr.bf16.mxu0 %v7763_v4 }
 0x38b   :  { %7157 = vmatpush3.bf16.msra.mxu1 %v7721_v56 }
 0x38c   :  { %7217 = vmatpush3.bf16.msra.mxu0 %v7722_v48  ;;  %7158 = vmatprep.subr.bf16.mxu1 %v7763_v4 }
 0x38d   :  { %7218 = vmatprep.subr.bf16.mxu0 %v7763_v4 }
 0x38f   :  { %7159 = vmatpush3.bf16.msra.mxu1 %v7723_v37 }
 0x390   :  { %7219 = vmatpush3.bf16.msra.mxu0 %v7724_v63  ;;  %7160 = vmatprep.subr.bf16.mxu1 %v7763_v4 }
 0x391   :  { %7220 = vmatprep.subr.bf16.mxu0 %v7763_v4 }
 0x393   :  { %7161 = vmatpush3.bf16.msra.mxu1 %v7725_v16 }
 0x394   :  { %7221 = vmatpush3.bf16.msra.mxu0 %v7726_v20  ;;  %7186 = vmatprep.subr.bf16.mxu1 %v7763_v4 }
 0x395   :  { %7246 = vmatprep.subr.bf16.mxu0 %v7763_v4 }
 0x396   :  { %v3204_v59 = vpop.f32.mrf.mxu1  ;;  %7163 = vmatmul.mubr.bf16.vlgmr.msra.gmra.mxu1 %v4449_v47 }
 0x397   :  { %v3210_v13 = vadd.f32 %v3204_v59, %v3098_v0  ;;  %v9500_v44 = vpop.f32.mrf.mxu0  ;;  %7223 = vmatmul.mubr.bf16.vlgmr.msra.gmra.mxu0 %v4780_v46  ;;  %7187 = vmatpush3.bf16.msra.mxu1 %v7729_v34  ;;  %v7749_v0 = vld [vmem:[%s9627_s5 + $0x5e0] sm:$0xff]  }
 0x398   :  { %7247 = vmatpush3.bf16.msra.mxu0 %v7730_v51  ;;  %v6924_v2 = vpop.f32.mrf.mxu1  ;;  %7188 = vmatprep.subr.bf16.mxu1 %v7763_v4 }
 0x399   :  { %v6984_v55 = vpop.f32.mrf.mxu0  ;;  %7248 = vmatprep.subr.bf16.mxu0 %v7763_v4  ;;  %7202 = vmatprep.mubr.msk.bf16.mxu1 %vm7764_vm0, %v7763_v4  ;;  %v3317_v32 = vadd.f32 %v9429_v17, %v3210_v13 }
 0x39a   :  { %v3207_v3 = vpop.f32.mrf.mxu1  ;;  %7262 = vmatprep.mubr.msk.bf16.mxu0 %vm7764_vm0, %v7763_v4 }
 0x39b   :  { %v3538_v26 = vpop.f32.mrf.mxu0  ;;  %7189 = vmatpush3.bf16.msra.mxu1 %v7731_v19 }
 0x39c   :  { %7249 = vmatpush3.bf16.msra.mxu0 %v7732_v57  ;;  %v6925_v40 = vpop.f32.mrf.mxu1  ;;  %7190 = vmatprep.subr.bf16.mxu1 %v7763_v4 }
 0x39d   :  { %v6985_v28 = vpop.f32.mrf.mxu0  ;;  %7250 = vmatprep.subr.bf16.mxu0 %v7763_v4 }
 0x39f   :  { %7191 = vmatpush3.bf16.msra.mxu1 %v7733_v7 }
 0x3a0   :  { %7251 = vmatpush3.bf16.msra.mxu0 %v7734_v50  ;;  %7192 = vmatprep.subr.bf16.mxu1 %v7763_v4 }
 0x3a1   :  { %7252 = vmatprep.subr.bf16.mxu0 %v7763_v4 }
 0x3a3   :  { %7193 = vmatpush3.bf16.msra.mxu1 %v7735_v42 }
 0x3a4   :  { %7253 = vmatpush3.bf16.msra.mxu0 %v7736_v10  ;;  %7194 = vmatprep.subr.bf16.mxu1 %v7763_v4 }
 0x3a5   :  { %7254 = vmatprep.subr.bf16.mxu0 %v7763_v4 }
 0x3a7   :  { %7195 = vmatpush3.bf16.msra.mxu1 %v7737_v1 }
 0x3a8   :  { %7255 = vmatpush3.bf16.msra.mxu0 %v7738_v18  ;;  %7196 = vmatprep.subr.bf16.mxu1 %v7763_v4 }
 0x3a9   :  { %7256 = vmatprep.subr.bf16.mxu0 %v7763_v4 }
 0x3ab   :  { %7197 = vmatpush3.bf16.msra.mxu1 %v7739_v12 }
 0x3ac   :  { %7257 = vmatpush3.bf16.msra.mxu0 %v7740_v5  ;;  %7198 = vmatprep.subr.bf16.mxu1 %v7763_v4 }
 0x3ad   :  { %7258 = vmatprep.subr.bf16.mxu0 %v7763_v4 }
 0x3af   :  { %7199 = vmatpush3.bf16.msra.mxu1 %v7741_v52 }
 0x3b0   :  { %7259 = vmatpush3.bf16.msra.mxu0 %v7742_v24  ;;  %7200 = vmatprep.subr.bf16.mxu1 %v7763_v4 }
 0x3b1   :  { %7260 = vmatprep.subr.bf16.mxu0 %v7763_v4 }
 0x3b3   :  { %7201 = vmatpush3.bf16.msra.mxu1 %v7743_v62 }
 0x3b4   :  { %7261 = vmatpush3.bf16.msra.mxu0 %v7744_v58  ;;  %7226 = vmatprep.subr.bf16.mxu1 %v7763_v4 }
 0x3b6   :  { %v3423_v49 = vpop.f32.mrf.mxu1  ;;  %7203 = vmatmul.mubr.bf16.vlgmr.msra.gmra.mxu1 %v4668_v15 }
 0x3b7   :  { %v3429_v27 = vadd.f32 %v3423_v49, %v3317_v32  ;;  %v3754_v60 = vpop.f32.mrf.mxu0  ;;  %7263 = vmatmul.mubr.bf16.vlgmr.msra.gmra.mxu0 %v4983_v61  ;;  %7227 = vmatpush3.bf16.msra.mxu1 %v7746_v31 }
 0x3b8   :  { %v6964_v6 = vpop.f32.mrf.mxu1  ;;  %7228 = vmatprep.subr.bf16.mxu1 %v7763_v4  ;;  %7242 = vmatprep.mubr.msk.bf16.mxu1 %vm7764_vm0, %v7763_v4 }
 0x3b9   :  { %v7024_v21 = vpop.f32.mrf.mxu0  ;;  %v3541_v53 = vadd.f32 %v9500_v44, %v3429_v27 }
 0x3ba   :  { %v3426_v17 = vpop.f32.mrf.mxu1 }
 0x3bb   :  { %v3757_v30 = vpop.f32.mrf.mxu0  ;;  %7229 = vmatpush3.bf16.msra.mxu1 %v7747_v54 }
 0x3bc   :  { %v6965_v45 = vpop.f32.mrf.mxu1  ;;  %7230 = vmatprep.subr.bf16.mxu1 %v7763_v4 }
 0x3bd   :  { %v7025_v29 = vpop.f32.mrf.mxu0 }
 0x3bf   :  { %7231 = vmatpush3.bf16.msra.mxu1 %v7748_v41 }
 0x3c0   :  { %7232 = vmatprep.subr.bf16.mxu1 %v7763_v4 }
 0x3c3   :  { %7233 = vmatpush3.bf16.msra.mxu1 %v7749_v0 }
 0x3c4   :  { %7234 = vmatprep.subr.bf16.mxu1 %v7763_v4 }
 0x3c7   :  { %7235 = vmatpush3.bf16.msra.mxu1 %v7750_v33 }
 0x3c8   :  { %7236 = vmatprep.subr.bf16.mxu1 %v7763_v4 }
 0x3cb   :  { %7237 = vmatpush3.bf16.msra.mxu1 %v7751_v35 }
 0x3cc   :  { %7238 = vmatprep.subr.bf16.mxu1 %v7763_v4 }
 0x3cf   :  { %7239 = vmatpush3.bf16.msra.mxu1 %v7752_v25 }
 0x3d0   :  { %7240 = vmatprep.subr.bf16.mxu1 %v7763_v4 }
 0x3d3   :  { %7241 = vmatpush3.bf16.msra.mxu1 %v7753_v43 }
 0x3d4   :  { %7266 = vmatprep.subr.bf16.mxu1 %v7763_v4 }
 0x3d6   :  { %v3647_v11 = vpop.f32.mrf.mxu1  ;;  %7243 = vmatmul.mubr.bf16.vlgmr.msra.gmra.mxu1 %v4892_v39 }
 0x3d7   :  { %v3653_v23 = vadd.f32 %v3647_v11, %v3541_v53  ;;  %v3978_v8 = vpop.f32.mrf.mxu0  ;;  %7270 = vmatprep.mubr.msk.bf16.mxu1 %vm7764_vm0, %v7763_v4  ;;  %v6041_v11 = vld [vmem:[%s9631_s6] ss:$0 sm:$0xff] }
 0x3d8   :  { %v7004_v9 = vpop.f32.mrf.mxu1 }
 0x3d9   :  { %v7064_v56 = vpop.f32.mrf.mxu0  ;;  %v3760_v48 = vadd.f32 %v3754_v60, %v3653_v23 }
 0x3da   :  { %v3650_v37 = vpop.f32.mrf.mxu1 }
 0x3db   :  { %v3981_v63 = vpop.f32.mrf.mxu0 }
 0x3dc   :  { %v7005_v16 = vpop.f32.mrf.mxu1  ;;  %v7765_v63 = vmov 0  }
 0x3dd   :  { %v7065_v20 = vpop.f32.mrf.mxu0  ;;  %7281 = vset.pattern.permute.xlu1 %v7765_v63  ;;  %v16_v16 = vstv %s9632_s7  ;;  %7282 = vset.pattern.permute.xlu0 %v7765_v63 }
 0x3de   :  { %v18_v20 = vstv %s9633_s8  ;;  %17 = vst [vmem:[#allocation3] sm:$0x1] %v16_v16 }
 0x3df   :  { %19 = vst [vmem:[#allocation4] sm:$0x1] %v18_v20 }
 0x3f6   :  { %v3866_v22 = vpop.f32.mrf.mxu1 }
 0x3f7   :  { %v3872_v36 = vadd.f32 %v3866_v22, %v3760_v48  ;;  %v4197_v34 = vpop.f32.mrf.mxu0  ;;  %v6042_v22 = vld [vmem:[#allocation3] ss:$0 sm:$0xff] }
 0x3f8   :  { %v7044_v47 = vpop.f32.mrf.mxu1  ;;  %5137 = vperm.xlu1 %7281, %v6042_v22  }
 0x3f9   :  { %v7104_v51 = vpop.f32.mrf.mxu0  ;;  %v3984_v46 = vadd.f32 %v3978_v8, %v3872_v36  ;;  %v6043_v36 = vld [vmem:[#allocation4] ss:$0 sm:$0xff] }
 0x3fa   :  { %v3869_v59 = vpop.f32.mrf.mxu1 }
 0x3fb   :  { %v4200_v13 = vpop.f32.mrf.mxu0 }
 0x3fc   :  { %v7045_v44 = vpop.f32.mrf.mxu1  ;;  %5148 = vperm.xlu1 %7281, %v6043_v36  }
 0x3fd   :  { %v7105_v19 = vpop.f32.mrf.mxu0 }
 0x416   :  { %v4090_v2 = vpop.f32.mrf.mxu1 }
 0x417   :  { %v4096_v57 = vadd.f32 %v4090_v2, %v3984_v46  ;;  %v4421_v55 = vpop.f32.mrf.mxu0 }
 0x418   :  { %v7084_v32 = vpop.f32.mrf.mxu1 }
 0x419   :  { %v7144_v3 = vpop.f32.mrf.mxu0  ;;  %v4203_v26 = vadd.f32 %v4197_v34, %v4096_v57 }
 0x41a   :  { %v4093_v7 = vpop.f32.mrf.mxu1  ;;  %v7755_v3 = vld [vmem:[%s9634_s9 + $0x8] sm:$0xff]  }
 0x41b   :  { %v4424_v40 = vpop.f32.mrf.mxu0  ;;  %7267 = vmatpush3.bf16.msra.mxu1 %v7755_v3  ;;  %v20_v7 = vstv %s9635_s10 }
 0x41c   :  { %v7085_v50 = vpop.f32.mrf.mxu1  ;;  %7268 = vmatprep.subr.bf16.mxu1 %v7763_v4  ;;  %21 = vst [vmem:[#allocation5] sm:$0x1] %v20_v7 }
 0x41d   :  { %v7145_v28 = vpop.f32.mrf.mxu0 }
 0x436   :  { %v4309_v42 = vpop.f32.mrf.mxu1 }
 0x437   :  { %v4315_v10 = vadd.f32 %v4309_v42, %v4203_v26  ;;  %v4640_v1 = vpop.f32.mrf.mxu0  ;;  %v7756_v26 = vld [vmem:[%s9634_s9] sm:$0xff]  }
 0x438   :  { %v7124_v18 = vpop.f32.mrf.mxu1  ;;  %7269 = vmatpush3.bf16.msra.mxu1 %v7756_v26 }
 0x439   :  { %v7184_v12 = vpop.f32.mrf.mxu0  ;;  %v4427_v5 = vadd.f32 %v4421_v55, %v4315_v10 }
 0x43a   :  { %v4312_v52 = vpop.f32.mrf.mxu1 }
 0x43b   :  { %v4643_v24 = vpop.f32.mrf.mxu0 }
 0x43c   :  { %v7125_v62 = vpop.f32.mrf.mxu1 }
 0x43d   :  { %v7185_v58 = vpop.f32.mrf.mxu0 }
 0x456   :  { %v4533_v14 = vpop.f32.mrf.mxu1 }
 0x457   :  { %v4539_v31 = vadd.f32 %v4533_v14, %v4427_v5  ;;  %v4864_v15 = vpop.f32.mrf.mxu0 }
 0x458   :  { %v7164_v49 = vpop.f32.mrf.mxu1 }
 0x459   :  { %v7224_v61 = vpop.f32.mrf.mxu0  ;;  %v4646_v27 = vadd.f32 %v4640_v1, %v4539_v31  ;;  %v6044_v49 = vld [vmem:[#allocation5] ss:$0 sm:$0xff] }
 0x45a   :  { %v4536_v60 = vpop.f32.mrf.mxu1 }
 0x45b   :  { %v4867_v54 = vpop.f32.mrf.mxu0 }
 0x45c   :  { %v7165_v6 = vpop.f32.mrf.mxu1 }
 0x45d   :  { %v7225_v21 = vpop.f32.mrf.mxu0 }
 0x473   :  { %v5138_v24 = vpop.permute.xlu1 %5137 }
 0x476   :  { %v4752_v53 = vpop.f32.mrf.mxu1 }
 0x477   :  { %v5083_v17 = vpop.f32.mrf.mxu0  ;;  %v4758_v35 = vadd.f32 %v4752_v53, %v4646_v27  ;;  %v5149_v4 = vpop.permute.xlu1 %5148 }
 0x478   :  { %v7204_v30 = vpop.f32.mrf.mxu1 }
 0x479   :  { %v7264_v41 = vpop.f32.mrf.mxu0  ;;  %v4870_v25 = vadd.f32 %v4864_v15, %v4758_v35 }
 0x47a   :  { %v4755_v45 = vpop.f32.mrf.mxu1 }
 0x47b   :  { %v5086_v29 = vpop.f32.mrf.mxu0 }
 0x47c   :  { %v7205_v0 = vpop.f32.mrf.mxu1 }
 0x47d   :  { %v7265_v33 = vpop.f32.mrf.mxu0 }
 0x496   :  { %v4976_v43 = vpop.f32.mrf.mxu1 }
 0x497   :  { %v4982_v38 = vadd.f32 %v4976_v43, %v4870_v25 }
 0x498   :  { %v7244_v39 = vpop.f32.mrf.mxu1 }
 0x499   :  { %v5089_v23 = vadd.f32 %v5083_v17, %v4982_v38 }
 0x49a   :  { %v4979_v8 = vpop.f32.mrf.mxu1 }
 0x49b   :  { %v5097_v9 = vadd.f32 %v6041_v11, %v5089_v23 }
 0x49c   :  { %v7245_v56 = vpop.f32.mrf.mxu1 }
 0x49d   :  { %v5098_v48 = vmax.f32 %v5097_v9, 0.0 }
 0x49f   :  { %v5100_v37 = vsel %vm5099_vm2, %v5098_v48, 0.0 }
 0x4a0   :  { %5101 = vadd.xlane.f32.xlu0 %v5100_v37 }
 0x529   :  { %v5102_v34 = vpop.xlane.xlu0 %5101 }
 0x52a   :  { %v5103_v47 = vrot.slane %v5102_v34, 4 }
 0x52c   :  { %v5104_v51 = vadd.f32 %v5103_v47, %v5102_v34 }
 0x52e   :  { %v5105_v46 = vrot.slane %v5104_v51, 2 }
 0x530   :  { %v5106_v59 = vadd.f32 %v5105_v46, %v5104_v51 }
 0x532   :  { %v5107_v13 = vrot.slane %v5106_v59, 1 }
 0x534   :  { %v5108_v44 = vadd.f32 %v5107_v13, %v5106_v59 }
 0x536   :  { %7274 = vpush %v5108_v44 }
 0x567   :  { %s7275_s6 = spop %7274 }
 0x568   :  { %v5110_v19 = vstv %s7275_s6 }
 0x569   :  { %v5112_v2 = vmul.f32 0.015625, %v5110_v19 }
 0x56b   :  { %v5113_v57 = vsub.f32 %v5098_v48, %v5112_v2 }
 0x56d   :  { %v5114_v55 = vmul.f32 %v5113_v57, %v5113_v57 }
 0x56f   :  { %v5115_v32 = vsel %vm5099_vm2, %v5114_v55, 0.0 }
 0x570   :  { %5116 = vadd.xlane.f32.xlu0 %v5115_v32 }
 0x5f9   :  { %v5117_v40 = vpop.xlane.xlu0 %5116 }
 0x5fa   :  { %v5118_v50 = vrot.slane %v5117_v40, 4 }
 0x5fc   :  { %v5119_v28 = vadd.f32 %v5118_v50, %v5117_v40 }
 0x5fe   :  { %v5120_v42 = vrot.slane %v5119_v28, 2 }
 0x600   :  { %v5121_v10 = vadd.f32 %v5120_v42, %v5119_v28 }
 0x602   :  { %v5122_v1 = vrot.slane %v5121_v10, 1 }
 0x604   :  { %v5123_v18 = vadd.f32 %v5122_v1, %v5121_v10 }
 0x606   :  { %7276 = vpush %v5123_v18 }
 0x637   :  { %s7277_s17 = spop %7276 }
 0x638   :  { %v5125_v12 = vstv %s7277_s17 }
 0x639   :  { %v5126_v5 = vmul.f32 0.015625, %v5125_v12 }
 0x63b   :  { %v5127_v52 = vadd.f32 1e-05, %v5126_v5 }
 0x63d   :  { %7759 = vrsqrt.f32 %v5127_v52 }
 0x64a   :  { %v7760_v62 = vpop.eup %7759 }
 0x64b   :  { %v5129_v58 = vmul.f32 %v7760_v62, %v5113_v57 }
 0x64d   :  { %v5140_v14 = vmul.f32 %v5138_v24, %v5129_v58 }
 0x64f   :  { %v5151_v31 = vadd.f32 %v5149_v4, %v5140_v14 }
 0x651   :  { %v5152_v15 = vpack.c.bf16 %v5151_v31, %v5151_v31 }
 0x653   :  { %7271 = vmatmul.mubr.msk.bf16.vlgmr.msra.gmra.mxu1 %vm5176_vm3, %v5152_v15 }
 0x713   :  { %v5214_v61 = vpop.f32.mrf.mxu1 }
 0x714   :  { %v5215_v27 = vadd.f32 %v6044_v49, %v5214_v61 }
 0x715   :  { %v7272_v60 = vpop.f32.mrf.mxu1 }
 0x716   :  { %v5220_v54 = vmul.f32 0.5, %v5215_v27 }
 0x717   :  { %v5217_v6 = vpop.f32.mrf.mxu1 }
 0x718   :  { %7761 = vtanh.f32 %v5220_v54 }
 0x719   :  { %v7273_v21 = vpop.f32.mrf.mxu1 }
 0x725   :  { %v7762_v53 = vpop.eup %7761 }
 0x726   :  { %v5222_v17 = vadd.f32 1.0, %v7762_v53 }
 0x728   :  { %v5223_v30 = vmul.f32 0.5, %v5222_v17 }
 0x72a   :  { %5225 = vst.msk [vmem:[%s9636_s11] sm:$0x3] %vm5224_vm4, %v5223_v30 }

</bundles_post_ra>
